<compile_context>
chip_gen: v6e
topology: v6e:2x2x1
jax: 0.10.0
libtpu: 0.0.40
codegen_flags: <defaults>
</compile_context>

<pallas_src>
import jax
import jax.numpy as jnp
from jax import lax
from jax.experimental import pallas as pl
from jax.experimental.pallas import tpu as pltpu


# Per-axis parity/tap mixing matrix A[parity, tap, k] for nearest-2x upsample
# folded into a 3-tap "same" conv (see derivation in the header comment).
_PARITY_MIX = [
    [[1.0, 0.0, 0.0], [0.0, 1.0, 1.0]],   # output parity 0: taps {K0, K1+K2}
    [[1.0, 1.0, 0.0], [0.0, 0.0, 1.0]],   # output parity 1: taps {K0+K1, K2}
]


def _fold_upsample_into_weights(weight_oidhw, bias, dtype):
    """PyTorch (O,I,3,3,3) weights -> parity-combined (8, 8*Cin, Cout) weights."""
    cout, cin = weight_oidhw.shape[0], weight_oidhw.shape[1]
    kcl = jnp.transpose(weight_oidhw, (2, 3, 4, 1, 0)).astype(jnp.float32)  # (3,3,3,I,O)
    a = jnp.asarray(_PARITY_MIX, dtype=jnp.float32)                         # (2,2,3)
    # w2[pd,ph,pw, ad,ah,aw, i, o]
    w2 = jnp.einsum('xad,ybe,zcf,defio->xyzabcio', a, a, a, kcl)
    w2r = w2.reshape(8, 8 * cin, cout).astype(dtype)   # parity p = pd*4+ph*2+pw
    b2 = bias.reshape(1, cout).astype(jnp.float32)
    return w2r, b2


# ---------------------------------------------------------------------------
# Fused nearest-2x-upsample + 3x3x3 "same" Conv3d.
# Grid (N, D).  Per step: read 3 padded input D-planes (halo slab), emit all 8
# output parity planes (each (H*W, Cout)) with one (H*W, 8*Cin)@(8*Cin, Cout)
# matmul per parity.
# ---------------------------------------------------------------------------
def _fused_up_conv_kernel(x0_ref, x1_ref, x2_ref, w_ref, b_ref, o_ref):
    # x{0,1,2}_ref: (1, 1, Hp, Wp, Cin)  padded planes at padded-d = d, d+1, d+2
    # w_ref       : (8, 8*Cin, Cout)     parity-combined weights
    # b_ref       : (1, Cout)
    # o_ref       : (1, 8, 1, H*W, Cout)
    hp, wp, cin = x0_ref.shape[2], x0_ref.shape[3], x0_ref.shape[4]
    h, w = hp - 2, wp - 2
    planes = (x0_ref, x1_ref, x2_ref)
    bias = b_ref[...].astype(jnp.float32)                    # (1, Cout)

    for pd in range(2):
        for ph in range(2):
            for pw in range(2):
                p = pd * 4 + ph * 2 + pw
                cols = []
                for ad in range(2):                           # D tap
                    pr = planes[pd + ad]
                    for ah in range(2):                       # H tap
                        for aw in range(2):                   # W tap
                            cols.append(
                                pr[0, 0, ph + ah:ph + ah + h, pw + aw:pw + aw + w, :])
                # (H, W, 8*Cin) -> (H*W, 8*Cin); lane (channel) dim unchanged.
                lhs = jnp.concatenate(cols, axis=-1).reshape(h * w, 8 * cin)
                acc = jnp.dot(lhs, w_ref[p], preferred_element_type=jnp.float32)
                o_ref[0, p, 0] = (acc + bias).astype(o_ref.dtype)


def fused_upsample_conv2x(x_cl, w2r, b2):
    """x_cl: (N, D, H, W, Cin) -> parity buffer (N, 8, D, H*W, Cout)."""
    n, d, h, w, cin = x_cl.shape
    cout = w2r.shape[-1]
    # Zero-pad the SMALL (un-upsampled) input by 1; this exactly reproduces the
    # zero padding of the upsampled volume under the parity decomposition.
    xp = jnp.pad(x_cl, ((0, 0), (1, 1), (1, 1), (1, 1), (0, 0)))
    dp, hp, wp = d + 2, h + 2, w + 2

    def plane_spec(offset):
        return pl.BlockSpec((1, 1, hp, wp, cin),
                            lambda ni, di: (ni, di + offset, 0, 0, 0))

    return pl.pallas_call(
        _fused_up_conv_kernel,
        out_shape=jax.ShapeDtypeStruct((n, 8, d, h * w, cout), x_cl.dtype),
        grid_spec=pltpu.PrefetchScalarGridSpec(
            num_scalar_prefetch=0,
            grid=(n, d),
            in_specs=[
                plane_spec(0), plane_spec(1), plane_spec(2),
                pl.BlockSpec((8, 8 * cin, cout), lambda ni, di: (0, 0, 0)),
                pl.BlockSpec((1, cout), lambda ni, di: (0, 0)),
            ],
            out_specs=pl.BlockSpec((1, 8, 1, h * w, cout),
                                   lambda ni, di: (ni, 0, di, 0, 0)),
        ),
        compiler_params=pltpu.CompilerParams(
            dimension_semantics=("parallel", "parallel")),
    )(xp, xp, xp, w2r, b2)


# ---------------------------------------------------------------------------
# Pure nearest-2x upsample (with_conv=False): write the 8 parity copies
# directly (no dup-axis transpose glue, no in-kernel interleave).
# ---------------------------------------------------------------------------
def _upsample_parity_kernel(x_ref, o_ref):
    # x_ref: (1, 1, H, W, C);  o_ref: (1, 8, 1, H, W, C)
    v = x_ref[0, 0]
    for p in range(8):
        o_ref[0, p, 0] = v


def nearest_upsample_parity(x_cl):
    n, d, h, w, c = x_cl.shape
    return pl.pallas_call(
        _upsample_parity_kernel,
        out_shape=jax.ShapeDtypeStruct((n, 8, d, h, w, c), x_cl.dtype),
        grid_spec=pltpu.PrefetchScalarGridSpec(
            num_scalar_prefetch=0,
            grid=(n, d),
            in_specs=[pl.BlockSpec((1, 1, h, w, c),
                                   lambda ni, di: (ni, di, 0, 0, 0))],
            out_specs=pl.BlockSpec((1, 8, 1, h, w, c),
                                   lambda ni, di: (ni, 0, di, 0, 0, 0)),
        ),
        compiler_params=pltpu.CompilerParams(
            dimension_semantics=("parallel", "parallel")),
    )(x_cl)


def _assemble_parity_ncdhw(buf, n, d, h, w, c):
    """(N, 8=(pd,ph,pw), D, H, W, C) parity buffer -> (N, C, 2D, 2H, 2W)."""
    b = buf.reshape(n, 2, 2, 2, d, h, w, c)
    b = jnp.transpose(b, (0, 7, 4, 1, 5, 2, 6, 3))   # (N, C, D, pd, H, ph, W, pw)
    return b.reshape(n, c, 2 * d, 2 * h, 2 * w)


# ---------------------------------------------------------------------------
# Module forward
# ---------------------------------------------------------------------------
def upsample_forward(x_ncdhw, weight_oidhw=None, bias=None, with_conv=True):
    """Upsample.forward.  x: (N, C, D, H, W) like PyTorch; returns NCDHW."""
    n, c, d, h, w = x_ncdhw.shape
    x_cl = jnp.transpose(x_ncdhw, (0, 2, 3, 4, 1))       # NCDHW -> NDHWC (1x size)
    if not with_conv:
        buf = nearest_upsample_parity(x_cl)              # (N, 8, D, H, W, C)
        return _assemble_parity_ncdhw(buf, n, d, h, w, c)
    cout = weight_oidhw.shape[0]
    w2r, b2 = _fold_upsample_into_weights(weight_oidhw, bias, x_cl.dtype)
    buf = fused_upsample_conv2x(x_cl, w2r, b2)           # (N, 8, D, H*W, Cout)
    return _assemble_parity_ncdhw(buf.reshape(n, 8, d, h, w, cout), n, d, h, w, cout)


if __name__ == "__main__":
    key = jax.random.PRNGKey(0)
    kx, kw, kb = jax.random.split(key, 3)

    # Small shapes consistent with Conv3d (5D input): N, C, D, H, W
    N, C, D, H, W = 2, 4, 3, 6, 8
    x = jax.random.normal(kx, (N, C, D, H, W), dtype=jnp.float32)
    # PyTorch Conv3d weight layout: (O, I, kD, kH, kW)
    weight = 0.1 * jax.random.normal(kw, (C, C, 3, 3, 3), dtype=jnp.float32)
    bias = 0.1 * jax.random.normal(kb, (C,), dtype=jnp.float32)

    out = jax.block_until_ready(upsample_forward(x, weight, bias, with_conv=True))
    assert out.shape == (N, C, 2 * D, 2 * H, 2 * W), out.shape

    # plain-JAX reference for semantics check
    up_ref = jnp.repeat(jnp.repeat(jnp.repeat(x, 2, axis=2), 2, axis=3), 2, axis=4)
    ref = lax.conv_general_dilated(
        up_ref, weight, window_strides=(1, 1, 1),
        padding=((1, 1), (1, 1), (1, 1)),
        dimension_numbers=("NCDHW", "OIDHW", "NCDHW"),
    ) + bias.reshape(1, C, 1, 1, 1)
    err = float(jnp.max(jnp.abs(out - ref)))
    assert jnp.allclose(out, ref, atol=5e-2, rtol=5e-2), err

    # with_conv=False path (pure nearest upsample)
    out_nc = jax.block_until_ready(upsample_forward(x, with_conv=False))
    assert out_nc.shape == up_ref.shape
    assert jnp.allclose(out_nc, up_ref), "nearest upsample mismatch"

    print("KERNEL_OK")
</pallas_src>

<mosaic_0001>
module attributes {stable_mosaic.version = 11 : i64} {
  func.func @_fused_up_conv_kernel(%arg0: i32, %arg1: i32, %arg2: memref<1x1x8x10x4xf32, #tpu.memory_space<vmem>>, %arg3: memref<1x1x8x10x4xf32, #tpu.memory_space<vmem>>, %arg4: memref<1x1x8x10x4xf32, #tpu.memory_space<vmem>>, %arg5: memref<8x32x4xf32, #tpu.memory_space<vmem>>, %arg6: memref<1x4xf32, #tpu.memory_space<vmem>>, %arg7: memref<1x8x1x48x4xf32, #tpu.memory_space<vmem>>) attributes {dimension_semantics = [#tpu.dimension_semantics<parallel>, #tpu.dimension_semantics<parallel>], iteration_bounds = array<i64: 2, 3>, scalar_prefetch = 0 : i64, scratch_operands = 0 : i64, tpu.core_type = #tpu.core_type<tc>, window_params = [{transform_indices = @transform_0, window_bounds = array<i64: 1, 1, 8, 10, 4>}, {transform_indices = @transform_1, window_bounds = array<i64: 1, 1, 8, 10, 4>}, {transform_indices = @transform_2, window_bounds = array<i64: 1, 1, 8, 10, 4>}, {pipeline_mode = #tpu.pipeline_mode<synchronous>, transform_indices = @transform_3, window_bounds = array<i64: 8, 32, 4>}, {pipeline_mode = #tpu.pipeline_mode<synchronous>, transform_indices = @transform_4, window_bounds = array<i64: 1, 4>}, {transform_indices = @transform_5, window_bounds = array<i64: 1, 8, 1, 48, 4>}]} {
    %c0 = arith.constant 0 : index
    %c0_0 = arith.constant 0 : index
    %0 = vector.load %arg6[%c0, %c0_0] : memref<1x4xf32, #tpu.memory_space<vmem>>, vector<1x4xf32>
    %c0_1 = arith.constant 0 : index
    %c0_2 = arith.constant 0 : index
    %c0_3 = arith.constant 0 : index
    %c0_4 = arith.constant 0 : index
    %c0_5 = arith.constant 0 : index
    %1 = vector.load %arg2[%c0_1, %c0_2, %c0_3, %c0_4, %c0_5] : memref<1x1x8x10x4xf32, #tpu.memory_space<vmem>>, vector<1x1x6x8x4xf32>
    %2 = vector.shape_cast %1 : vector<1x1x6x8x4xf32> to vector<6x8x4xf32>
    %c0_6 = arith.constant 0 : index
    %c0_7 = arith.constant 0 : index
    %c0_8 = arith.constant 0 : index
    %c1 = arith.constant 1 : index
    %c0_9 = arith.constant 0 : index
    %3 = vector.load %arg2[%c0_6, %c0_7, %c0_8, %c1, %c0_9] : memref<1x1x8x10x4xf32, #tpu.memory_space<vmem>>, vector<1x1x6x8x4xf32>
    %4 = vector.shape_cast %3 : vector<1x1x6x8x4xf32> to vector<6x8x4xf32>
    %c0_10 = arith.constant 0 : index
    %c0_11 = arith.constant 0 : index
    %c1_12 = arith.constant 1 : index
    %c0_13 = arith.constant 0 : index
    %c0_14 = arith.constant 0 : index
    %5 = vector.load %arg2[%c0_10, %c0_11, %c1_12, %c0_13, %c0_14] : memref<1x1x8x10x4xf32, #tpu.memory_space<vmem>>, vector<1x1x6x8x4xf32>
    %6 = vector.shape_cast %5 : vector<1x1x6x8x4xf32> to vector<6x8x4xf32>
    %c0_15 = arith.constant 0 : index
    %c0_16 = arith.constant 0 : index
    %c1_17 = arith.constant 1 : index
    %c1_18 = arith.constant 1 : index
    %c0_19 = arith.constant 0 : index
    %7 = vector.load %arg2[%c0_15, %c0_16, %c1_17, %c1_18, %c0_19] : memref<1x1x8x10x4xf32, #tpu.memory_space<vmem>>, vector<1x1x6x8x4xf32>
    %8 = vector.shape_cast %7 : vector<1x1x6x8x4xf32> to vector<6x8x4xf32>
    %c0_20 = arith.constant 0 : index
    %c0_21 = arith.constant 0 : index
    %c0_22 = arith.constant 0 : index
    %c0_23 = arith.constant 0 : index
    %c0_24 = arith.constant 0 : index
    %9 = vector.load %arg3[%c0_20, %c0_21, %c0_22, %c0_23, %c0_24] : memref<1x1x8x10x4xf32, #tpu.memory_space<vmem>>, vector<1x1x6x8x4xf32>
    %10 = vector.shape_cast %9 : vector<1x1x6x8x4xf32> to vector<6x8x4xf32>
    %c0_25 = arith.constant 0 : index
    %c0_26 = arith.constant 0 : index
    %c0_27 = arith.constant 0 : index
    %c1_28 = arith.constant 1 : index
    %c0_29 = arith.constant 0 : index
    %11 = vector.load %arg3[%c0_25, %c0_26, %c0_27, %c1_28, %c0_29] : memref<1x1x8x10x4xf32, #tpu.memory_space<vmem>>, vector<1x1x6x8x4xf32>
    %12 = vector.shape_cast %11 : vector<1x1x6x8x4xf32> to vector<6x8x4xf32>
    %c0_30 = arith.constant 0 : index
    %c0_31 = arith.constant 0 : index
    %c1_32 = arith.constant 1 : index
    %c0_33 = arith.constant 0 : index
    %c0_34 = arith.constant 0 : index
    %13 = vector.load %arg3[%c0_30, %c0_31, %c1_32, %c0_33, %c0_34] : memref<1x1x8x10x4xf32, #tpu.memory_space<vmem>>, vector<1x1x6x8x4xf32>
    %14 = vector.shape_cast %13 : vector<1x1x6x8x4xf32> to vector<6x8x4xf32>
    %c0_35 = arith.constant 0 : index
    %c0_36 = arith.constant 0 : index
    %c1_37 = arith.constant 1 : index
    %c1_38 = arith.constant 1 : index
    %c0_39 = arith.constant 0 : index
    %15 = vector.load %arg3[%c0_35, %c0_36, %c1_37, %c1_38, %c0_39] : memref<1x1x8x10x4xf32, #tpu.memory_space<vmem>>, vector<1x1x6x8x4xf32>
    %16 = vector.shape_cast %15 : vector<1x1x6x8x4xf32> to vector<6x8x4xf32>
    %17 = tpu.concatenate %2, %4, %6, %8, %10, %12, %14, %16 in 2 : vector<6x8x4xf32>, vector<6x8x4xf32>, vector<6x8x4xf32>, vector<6x8x4xf32>, vector<6x8x4xf32>, vector<6x8x4xf32>, vector<6x8x4xf32>, vector<6x8x4xf32> -> vector<6x8x32xf32>
    %18 = vector.shape_cast %17 : vector<6x8x32xf32> to vector<48x32xf32>
    %c0_40 = arith.constant 0 : index
    %c0_41 = arith.constant 0 : index
    %c0_42 = arith.constant 0 : index
    %19 = vector.load %arg5[%c0_40, %c0_41, %c0_42] : memref<8x32x4xf32, #tpu.memory_space<vmem>>, vector<1x32x4xf32>
    %20 = vector.shape_cast %19 : vector<1x32x4xf32> to vector<32x4xf32>
    %cst = arith.constant dense<0.000000e+00> : vector<48x4xf32>
    %21 = tpu.matmul %18, %20, %cst {dimension_numbers = #tpu.dot_dimension_numbers<[1], [0], [0], [1], [0, 0, 1, 1], [], []>} : vector<48x32xf32>, vector<32x4xf32>, vector<48x4xf32> -> vector<48x4xf32>
    %22 = vector.broadcast %0 : vector<1x4xf32> to vector<48x4xf32>
    %23 = arith.addf %21, %22 : vector<48x4xf32>
    %c0_43 = arith.constant 0 : index
    %c0_44 = arith.constant 0 : index
    %c0_45 = arith.constant 0 : index
    %c0_46 = arith.constant 0 : index
    %c0_47 = arith.constant 0 : index
    %24 = vector.load %arg7[%c0_43, %c0_44, %c0_45, %c0_46, %c0_47] : memref<1x8x1x48x4xf32, #tpu.memory_space<vmem>>, vector<1x1x1x48x4xf32>
    %25 = vector.shape_cast %24 : vector<1x1x1x48x4xf32> to vector<48x4xf32>
    %26 = vector.shape_cast %23 : vector<48x4xf32> to vector<1x1x1x48x4xf32>
    tpu.vector_store %arg7[%c0_43, %c0_44, %c0_45, %c0_46, %c0_47], %26 {strides = array<i32>} : memref<1x8x1x48x4xf32, #tpu.memory_space<vmem>>, vector<1x1x1x48x4xf32>,
    %c0_48 = arith.constant 0 : index
    %c0_49 = arith.constant 0 : index
    %c0_50 = arith.constant 0 : index
    %c1_51 = arith.constant 1 : index
    %c0_52 = arith.constant 0 : index
    %27 = vector.load %arg2[%c0_48, %c0_49, %c0_50, %c1_51, %c0_52] : memref<1x1x8x10x4xf32, #tpu.memory_space<vmem>>, vector<1x1x6x8x4xf32>
    %28 = vector.shape_cast %27 : vector<1x1x6x8x4xf32> to vector<6x8x4xf32>
    %c0_53 = arith.constant 0 : index
    %c0_54 = arith.constant 0 : index
    %c0_55 = arith.constant 0 : index
    %c2 = arith.constant 2 : index
    %c0_56 = arith.constant 0 : index
    %29 = vector.load %arg2[%c0_53, %c0_54, %c0_55, %c2, %c0_56] : memref<1x1x8x10x4xf32, #tpu.memory_space<vmem>>, vector<1x1x6x8x4xf32>
    %30 = vector.shape_cast %29 : vector<1x1x6x8x4xf32> to vector<6x8x4xf32>
    %c0_57 = arith.constant 0 : index
    %c0_58 = arith.constant 0 : index
    %c1_59 = arith.constant 1 : index
    %c1_60 = arith.constant 1 : index
    %c0_61 = arith.constant 0 : index
    %31 = vector.load %arg2[%c0_57, %c0_58, %c1_59, %c1_60, %c0_61] : memref<1x1x8x10x4xf32, #tpu.memory_space<vmem>>, vector<1x1x6x8x4xf32>
    %32 = vector.shape_cast %31 : vector<1x1x6x8x4xf32> to vector<6x8x4xf32>
    %c0_62 = arith.constant 0 : index
    %c0_63 = arith.constant 0 : index
    %c1_64 = arith.constant 1 : index
    %c2_65 = arith.constant 2 : index
    %c0_66 = arith.constant 0 : index
    %33 = vector.load %arg2[%c0_62, %c0_63, %c1_64, %c2_65, %c0_66] : memref<1x1x8x10x4xf32, #tpu.memory_space<vmem>>, vector<1x1x6x8x4xf32>
    %34 = vector.shape_cast %33 : vector<1x1x6x8x4xf32> to vector<6x8x4xf32>
    %c0_67 = arith.constant 0 : index
    %c0_68 = arith.constant 0 : index
    %c0_69 = arith.constant 0 : index
    %c1_70 = arith.constant 1 : index
    %c0_71 = arith.constant 0 : index
    %35 = vector.load %arg3[%c0_67, %c0_68, %c0_69, %c1_70, %c0_71] : memref<1x1x8x10x4xf32, #tpu.memory_space<vmem>>, vector<1x1x6x8x4xf32>
    %36 = vector.shape_cast %35 : vector<1x1x6x8x4xf32> to vector<6x8x4xf32>
    %c0_72 = arith.constant 0 : index
    %c0_73 = arith.constant 0 : index
    %c0_74 = arith.constant 0 : index
    %c2_75 = arith.constant 2 : index
    %c0_76 = arith.constant 0 : index
    %37 = vector.load %arg3[%c0_72, %c0_73, %c0_74, %c2_75, %c0_76] : memref<1x1x8x10x4xf32, #tpu.memory_space<vmem>>, vector<1x1x6x8x4xf32>
    %38 = vector.shape_cast %37 : vector<1x1x6x8x4xf32> to vector<6x8x4xf32>
    %c0_77 = arith.constant 0 : index
    %c0_78 = arith.constant 0 : index
    %c1_79 = arith.constant 1 : index
    %c1_80 = arith.constant 1 : index
    %c0_81 = arith.constant 0 : index
    %39 = vector.load %arg3[%c0_77, %c0_78, %c1_79, %c1_80, %c0_81] : memref<1x1x8x10x4xf32, #tpu.memory_space<vmem>>, vector<1x1x6x8x4xf32>
    %40 = vector.shape_cast %39 : vector<1x1x6x8x4xf32> to vector<6x8x4xf32>
    %c0_82 = arith.constant 0 : index
    %c0_83 = arith.constant 0 : index
    %c1_84 = arith.constant 1 : index
    %c2_85 = arith.constant 2 : index
    %c0_86 = arith.constant 0 : index
    %41 = vector.load %arg3[%c0_82, %c0_83, %c1_84, %c2_85, %c0_86] : memref<1x1x8x10x4xf32, #tpu.memory_space<vmem>>, vector<1x1x6x8x4xf32>
    %42 = vector.shape_cast %41 : vector<1x1x6x8x4xf32> to vector<6x8x4xf32>
    %43 = tpu.concatenate %28, %30, %32, %34, %36, %38, %40, %42 in 2 : vector<6x8x4xf32>, vector<6x8x4xf32>, vector<6x8x4xf32>, vector<6x8x4xf32>, vector<6x8x4xf32>, vector<6x8x4xf32>, vector<6x8x4xf32>, vector<6x8x4xf32> -> vector<6x8x32xf32>
    %44 = vector.shape_cast %43 : vector<6x8x32xf32> to vector<48x32xf32>
    %c1_87 = arith.constant 1 : index
    %c0_88 = arith.constant 0 : index
    %c0_89 = arith.constant 0 : index
    %45 = vector.load %arg5[%c1_87, %c0_88, %c0_89] : memref<8x32x4xf32, #tpu.memory_space<vmem>>, vector<1x32x4xf32>
    %46 = vector.shape_cast %45 : vector<1x32x4xf32> to vector<32x4xf32>
    %cst_90 = arith.constant dense<0.000000e+00> : vector<48x4xf32>
    %47 = tpu.matmul %44, %46, %cst_90 {dimension_numbers = #tpu.dot_dimension_numbers<[1], [0], [0], [1], [0, 0, 1, 1], [], []>} : vector<48x32xf32>, vector<32x4xf32>, vector<48x4xf32> -> vector<48x4xf32>
    %48 = vector.broadcast %0 : vector<1x4xf32> to vector<48x4xf32>
    %49 = arith.addf %47, %48 : vector<48x4xf32>
    %c0_91 = arith.constant 0 : index
    %c1_92 = arith.constant 1 : index
    %c0_93 = arith.constant 0 : index
    %c0_94 = arith.constant 0 : index
    %c0_95 = arith.constant 0 : index
    %50 = vector.load %arg7[%c0_91, %c1_92, %c0_93, %c0_94, %c0_95] : memref<1x8x1x48x4xf32, #tpu.memory_space<vmem>>, vector<1x1x1x48x4xf32>
    %51 = vector.shape_cast %50 : vector<1x1x1x48x4xf32> to vector<48x4xf32>
    %52 = vector.shape_cast %49 : vector<48x4xf32> to vector<1x1x1x48x4xf32>
    tpu.vector_store %arg7[%c0_91, %c1_92, %c0_93, %c0_94, %c0_95], %52 {strides = array<i32>} : memref<1x8x1x48x4xf32, #tpu.memory_space<vmem>>, vector<1x1x1x48x4xf32>,
    %c0_96 = arith.constant 0 : index
    %c0_97 = arith.constant 0 : index
    %c1_98 = arith.constant 1 : index
    %c0_99 = arith.constant 0 : index
    %c0_100 = arith.constant 0 : index
    %53 = vector.load %arg2[%c0_96, %c0_97, %c1_98, %c0_99, %c0_100] : memref<1x1x8x10x4xf32, #tpu.memory_space<vmem>>, vector<1x1x6x8x4xf32>
    %54 = vector.shape_cast %53 : vector<1x1x6x8x4xf32> to vector<6x8x4xf32>
    %c0_101 = arith.constant 0 : index
    %c0_102 = arith.constant 0 : index
    %c1_103 = arith.constant 1 : index
    %c1_104 = arith.constant 1 : index
    %c0_105 = arith.constant 0 : index
    %55 = vector.load %arg2[%c0_101, %c0_102, %c1_103, %c1_104, %c0_105] : memref<1x1x8x10x4xf32, #tpu.memory_space<vmem>>, vector<1x1x6x8x4xf32>
    %56 = vector.shape_cast %55 : vector<1x1x6x8x4xf32> to vector<6x8x4xf32>
    %c0_106 = arith.constant 0 : index
    %c0_107 = arith.constant 0 : index
    %c2_108 = arith.constant 2 : index
    %c0_109 = arith.constant 0 : index
    %c0_110 = arith.constant 0 : index
    %57 = vector.load %arg2[%c0_106, %c0_107, %c2_108, %c0_109, %c0_110] : memref<1x1x8x10x4xf32, #tpu.memory_space<vmem>>, vector<1x1x6x8x4xf32>
    %58 = vector.shape_cast %57 : vector<1x1x6x8x4xf32> to vector<6x8x4xf32>
    %c0_111 = arith.constant 0 : index
    %c0_112 = arith.constant 0 : index
    %c2_113 = arith.constant 2 : index
    %c1_114 = arith.constant 1 : index
    %c0_115 = arith.constant 0 : index
    %59 = vector.load %arg2[%c0_111, %c0_112, %c2_113, %c1_114, %c0_115] : memref<1x1x8x10x4xf32, #tpu.memory_space<vmem>>, vector<1x1x6x8x4xf32>
    %60 = vector.shape_cast %59 : vector<1x1x6x8x4xf32> to vector<6x8x4xf32>
    %c0_116 = arith.constant 0 : index
    %c0_117 = arith.constant 0 : index
    %c1_118 = arith.constant 1 : index
    %c0_119 = arith.constant 0 : index
    %c0_120 = arith.constant 0 : index
    %61 = vector.load %arg3[%c0_116, %c0_117, %c1_118, %c0_119, %c0_120] : memref<1x1x8x10x4xf32, #tpu.memory_space<vmem>>, vector<1x1x6x8x4xf32>
    %62 = vector.shape_cast %61 : vector<1x1x6x8x4xf32> to vector<6x8x4xf32>
    %c0_121 = arith.constant 0 : index
    %c0_122 = arith.constant 0 : index
    %c1_123 = arith.constant 1 : index
    %c1_124 = arith.constant 1 : index
    %c0_125 = arith.constant 0 : index
    %63 = vector.load %arg3[%c0_121, %c0_122, %c1_123, %c1_124, %c0_125] : memref<1x1x8x10x4xf32, #tpu.memory_space<vmem>>, vector<1x1x6x8x4xf32>
    %64 = vector.shape_cast %63 : vector<1x1x6x8x4xf32> to vector<6x8x4xf32>
    %c0_126 = arith.constant 0 : index
    %c0_127 = arith.constant 0 : index
    %c2_128 = arith.constant 2 : index
    %c0_129 = arith.constant 0 : index
    %c0_130 = arith.constant 0 : index
    %65 = vector.load %arg3[%c0_126, %c0_127, %c2_128, %c0_129, %c0_130] : memref<1x1x8x10x4xf32, #tpu.memory_space<vmem>>, vector<1x1x6x8x4xf32>
    %66 = vector.shape_cast %65 : vector<1x1x6x8x4xf32> to vector<6x8x4xf32>
    %c0_131 = arith.constant 0 : index
    %c0_132 = arith.constant 0 : index
    %c2_133 = arith.constant 2 : index
    %c1_134 = arith.constant 1 : index
    %c0_135 = arith.constant 0 : index
    %67 = vector.load %arg3[%c0_131, %c0_132, %c2_133, %c1_134, %c0_135] : memref<1x1x8x10x4xf32, #tpu.memory_space<vmem>>, vector<1x1x6x8x4xf32>
    %68 = vector.shape_cast %67 : vector<1x1x6x8x4xf32> to vector<6x8x4xf32>
    %69 = tpu.concatenate %54, %56, %58, %60, %62, %64, %66, %68 in 2 : vector<6x8x4xf32>, vector<6x8x4xf32>, vector<6x8x4xf32>, vector<6x8x4xf32>, vector<6x8x4xf32>, vector<6x8x4xf32>, vector<6x8x4xf32>, vector<6x8x4xf32> -> vector<6x8x32xf32>
    %70 = vector.shape_cast %69 : vector<6x8x32xf32> to vector<48x32xf32>
    %c2_136 = arith.constant 2 : index
    %c0_137 = arith.constant 0 : index
    %c0_138 = arith.constant 0 : index
    %71 = vector.load %arg5[%c2_136, %c0_137, %c0_138] : memref<8x32x4xf32, #tpu.memory_space<vmem>>, vector<1x32x4xf32>
    %72 = vector.shape_cast %71 : vector<1x32x4xf32> to vector<32x4xf32>
    %cst_139 = arith.constant dense<0.000000e+00> : vector<48x4xf32>
    %73 = tpu.matmul %70, %72, %cst_139 {dimension_numbers = #tpu.dot_dimension_numbers<[1], [0], [0], [1], [0, 0, 1, 1], [], []>} : vector<48x32xf32>, vector<32x4xf32>, vector<48x4xf32> -> vector<48x4xf32>
    %74 = vector.broadcast %0 : vector<1x4xf32> to vector<48x4xf32>
    %75 = arith.addf %73, %74 : vector<48x4xf32>
    %c0_140 = arith.constant 0 : index
    %c2_141 = arith.constant 2 : index
    %c0_142 = arith.constant 0 : index
    %c0_143 = arith.constant 0 : index
    %c0_144 = arith.constant 0 : index
    %76 = vector.load %arg7[%c0_140, %c2_141, %c0_142, %c0_143, %c0_144] : memref<1x8x1x48x4xf32, #tpu.memory_space<vmem>>, vector<1x1x1x48x4xf32>
    %77 = vector.shape_cast %76 : vector<1x1x1x48x4xf32> to vector<48x4xf32>
    %78 = vector.shape_cast %75 : vector<48x4xf32> to vector<1x1x1x48x4xf32>
    tpu.vector_store %arg7[%c0_140, %c2_141, %c0_142, %c0_143, %c0_144], %78 {strides = array<i32>} : memref<1x8x1x48x4xf32, #tpu.memory_space<vmem>>, vector<1x1x1x48x4xf32>,
    %c0_145 = arith.constant 0 : index
    %c0_146 = arith.constant 0 : index
    %c1_147 = arith.constant 1 : index
    %c1_148 = arith.constant 1 : index
    %c0_149 = arith.constant 0 : index
    %79 = vector.load %arg2[%c0_145, %c0_146, %c1_147, %c1_148, %c0_149] : memref<1x1x8x10x4xf32, #tpu.memory_space<vmem>>, vector<1x1x6x8x4xf32>
    %80 = vector.shape_cast %79 : vector<1x1x6x8x4xf32> to vector<6x8x4xf32>
    %c0_150 = arith.constant 0 : index
    %c0_151 = arith.constant 0 : index
    %c1_152 = arith.constant 1 : index
    %c2_153 = arith.constant 2 : index
    %c0_154 = arith.constant 0 : index
    %81 = vector.load %arg2[%c0_150, %c0_151, %c1_152, %c2_153, %c0_154] : memref<1x1x8x10x4xf32, #tpu.memory_space<vmem>>, vector<1x1x6x8x4xf32>
    %82 = vector.shape_cast %81 : vector<1x1x6x8x4xf32> to vector<6x8x4xf32>
    %c0_155 = arith.constant 0 : index
    %c0_156 = arith.constant 0 : index
    %c2_157 = arith.constant 2 : index
    %c1_158 = arith.constant 1 : index
    %c0_159 = arith.constant 0 : index
    %83 = vector.load %arg2[%c0_155, %c0_156, %c2_157, %c1_158, %c0_159] : memref<1x1x8x10x4xf32, #tpu.memory_space<vmem>>, vector<1x1x6x8x4xf32>
    %84 = vector.shape_cast %83 : vector<1x1x6x8x4xf32> to vector<6x8x4xf32>
    %c0_160 = arith.constant 0 : index
    %c0_161 = arith.constant 0 : index
    %c2_162 = arith.constant 2 : index
    %c2_163 = arith.constant 2 : index
    %c0_164 = arith.constant 0 : index
    %85 = vector.load %arg2[%c0_160, %c0_161, %c2_162, %c2_163, %c0_164] : memref<1x1x8x10x4xf32, #tpu.memory_space<vmem>>, vector<1x1x6x8x4xf32>
    %86 = vector.shape_cast %85 : vector<1x1x6x8x4xf32> to vector<6x8x4xf32>
    %c0_165 = arith.constant 0 : index
    %c0_166 = arith.constant 0 : index
    %c1_167 = arith.constant 1 : index
    %c1_168 = arith.constant 1 : index
    %c0_169 = arith.constant 0 : index
    %87 = vector.load %arg3[%c0_165, %c0_166, %c1_167, %c1_168, %c0_169] : memref<1x1x8x10x4xf32, #tpu.memory_space<vmem>>, vector<1x1x6x8x4xf32>
    %88 = vector.shape_cast %87 : vector<1x1x6x8x4xf32> to vector<6x8x4xf32>
    %c0_170 = arith.constant 0 : index
    %c0_171 = arith.constant 0 : index
    %c1_172 = arith.constant 1 : index
    %c2_173 = arith.constant 2 : index
    %c0_174 = arith.constant 0 : index
    %89 = vector.load %arg3[%c0_170, %c0_171, %c1_172, %c2_173, %c0_174] : memref<1x1x8x10x4xf32, #tpu.memory_space<vmem>>, vector<1x1x6x8x4xf32>
    %90 = vector.shape_cast %89 : vector<1x1x6x8x4xf32> to vector<6x8x4xf32>
    %c0_175 = arith.constant 0 : index
    %c0_176 = arith.constant 0 : index
    %c2_177 = arith.constant 2 : index
    %c1_178 = arith.constant 1 : index
    %c0_179 = arith.constant 0 : index
    %91 = vector.load %arg3[%c0_175, %c0_176, %c2_177, %c1_178, %c0_179] : memref<1x1x8x10x4xf32, #tpu.memory_space<vmem>>, vector<1x1x6x8x4xf32>
    %92 = vector.shape_cast %91 : vector<1x1x6x8x4xf32> to vector<6x8x4xf32>
    %c0_180 = arith.constant 0 : index
    %c0_181 = arith.constant 0 : index
    %c2_182 = arith.constant 2 : index
    %c2_183 = arith.constant 2 : index
    %c0_184 = arith.constant 0 : index
    %93 = vector.load %arg3[%c0_180, %c0_181, %c2_182, %c2_183, %c0_184] : memref<1x1x8x10x4xf32, #tpu.memory_space<vmem>>, vector<1x1x6x8x4xf32>
    %94 = vector.shape_cast %93 : vector<1x1x6x8x4xf32> to vector<6x8x4xf32>
    %95 = tpu.concatenate %80, %82, %84, %86, %88, %90, %92, %94 in 2 : vector<6x8x4xf32>, vector<6x8x4xf32>, vector<6x8x4xf32>, vector<6x8x4xf32>, vector<6x8x4xf32>, vector<6x8x4xf32>, vector<6x8x4xf32>, vector<6x8x4xf32> -> vector<6x8x32xf32>
    %96 = vector.shape_cast %95 : vector<6x8x32xf32> to vector<48x32xf32>
    %c3 = arith.constant 3 : index
    %c0_185 = arith.constant 0 : index
    %c0_186 = arith.constant 0 : index
    %97 = vector.load %arg5[%c3, %c0_185, %c0_186] : memref<8x32x4xf32, #tpu.memory_space<vmem>>, vector<1x32x4xf32>
    %98 = vector.shape_cast %97 : vector<1x32x4xf32> to vector<32x4xf32>
    %cst_187 = arith.constant dense<0.000000e+00> : vector<48x4xf32>
    %99 = tpu.matmul %96, %98, %cst_187 {dimension_numbers = #tpu.dot_dimension_numbers<[1], [0], [0], [1], [0, 0, 1, 1], [], []>} : vector<48x32xf32>, vector<32x4xf32>, vector<48x4xf32> -> vector<48x4xf32>
    %100 = vector.broadcast %0 : vector<1x4xf32> to vector<48x4xf32>
    %101 = arith.addf %99, %100 : vector<48x4xf32>
    %c0_188 = arith.constant 0 : index
    %c3_189 = arith.constant 3 : index
    %c0_190 = arith.constant 0 : index
    %c0_191 = arith.constant 0 : index
    %c0_192 = arith.constant 0 : index
    %102 = vector.load %arg7[%c0_188, %c3_189, %c0_190, %c0_191, %c0_192] : memref<1x8x1x48x4xf32, #tpu.memory_space<vmem>>, vector<1x1x1x48x4xf32>
    %103 = vector.shape_cast %102 : vector<1x1x1x48x4xf32> to vector<48x4xf32>
    %104 = vector.shape_cast %101 : vector<48x4xf32> to vector<1x1x1x48x4xf32>
    tpu.vector_store %arg7[%c0_188, %c3_189, %c0_190, %c0_191, %c0_192], %104 {strides = array<i32>} : memref<1x8x1x48x4xf32, #tpu.memory_space<vmem>>, vector<1x1x1x48x4xf32>,
    %c0_193 = arith.constant 0 : index
    %c0_194 = arith.constant 0 : index
    %c0_195 = arith.constant 0 : index
    %c0_196 = arith.constant 0 : index
    %c0_197 = arith.constant 0 : index
    %105 = vector.load %arg3[%c0_193, %c0_194, %c0_195, %c0_196, %c0_197] : memref<1x1x8x10x4xf32, #tpu.memory_space<vmem>>, vector<1x1x6x8x4xf32>
    %106 = vector.shape_cast %105 : vector<1x1x6x8x4xf32> to vector<6x8x4xf32>
    %c0_198 = arith.constant 0 : index
    %c0_199 = arith.constant 0 : index
    %c0_200 = arith.constant 0 : index
    %c1_201 = arith.constant 1 : index
    %c0_202 = arith.constant 0 : index
    %107 = vector.load %arg3[%c0_198, %c0_199, %c0_200, %c1_201, %c0_202] : memref<1x1x8x10x4xf32, #tpu.memory_space<vmem>>, vector<1x1x6x8x4xf32>
    %108 = vector.shape_cast %107 : vector<1x1x6x8x4xf32> to vector<6x8x4xf32>
    %c0_203 = arith.constant 0 : index
    %c0_204 = arith.constant 0 : index
    %c1_205 = arith.constant 1 : index
    %c0_206 = arith.constant 0 : index
    %c0_207 = arith.constant 0 : index
    %109 = vector.load %arg3[%c0_203, %c0_204, %c1_205, %c0_206, %c0_207] : memref<1x1x8x10x4xf32, #tpu.memory_space<vmem>>, vector<1x1x6x8x4xf32>
    %110 = vector.shape_cast %109 : vector<1x1x6x8x4xf32> to vector<6x8x4xf32>
    %c0_208 = arith.constant 0 : index
    %c0_209 = arith.constant 0 : index
    %c1_210 = arith.constant 1 : index
    %c1_211 = arith.constant 1 : index
    %c0_212 = arith.constant 0 : index
    %111 = vector.load %arg3[%c0_208, %c0_209, %c1_210, %c1_211, %c0_212] : memref<1x1x8x10x4xf32, #tpu.memory_space<vmem>>, vector<1x1x6x8x4xf32>
    %112 = vector.shape_cast %111 : vector<1x1x6x8x4xf32> to vector<6x8x4xf32>
    %c0_213 = arith.constant 0 : index
    %c0_214 = arith.constant 0 : index
    %c0_215 = arith.constant 0 : index
    %c0_216 = arith.constant 0 : index
    %c0_217 = arith.constant 0 : index
    %113 = vector.load %arg4[%c0_213, %c0_214, %c0_215, %c0_216, %c0_217] : memref<1x1x8x10x4xf32, #tpu.memory_space<vmem>>, vector<1x1x6x8x4xf32>
    %114 = vector.shape_cast %113 : vector<1x1x6x8x4xf32> to vector<6x8x4xf32>
    %c0_218 = arith.constant 0 : index
    %c0_219 = arith.constant 0 : index
    %c0_220 = arith.constant 0 : index
    %c1_221 = arith.constant 1 : index
    %c0_222 = arith.constant 0 : index
    %115 = vector.load %arg4[%c0_218, %c0_219, %c0_220, %c1_221, %c0_222] : memref<1x1x8x10x4xf32, #tpu.memory_space<vmem>>, vector<1x1x6x8x4xf32>
    %116 = vector.shape_cast %115 : vector<1x1x6x8x4xf32> to vector<6x8x4xf32>
    %c0_223 = arith.constant 0 : index
    %c0_224 = arith.constant 0 : index
    %c1_225 = arith.constant 1 : index
    %c0_226 = arith.constant 0 : index
    %c0_227 = arith.constant 0 : index
    %117 = vector.load %arg4[%c0_223, %c0_224, %c1_225, %c0_226, %c0_227] : memref<1x1x8x10x4xf32, #tpu.memory_space<vmem>>, vector<1x1x6x8x4xf32>
    %118 = vector.shape_cast %117 : vector<1x1x6x8x4xf32> to vector<6x8x4xf32>
    %c0_228 = arith.constant 0 : index
    %c0_229 = arith.constant 0 : index
    %c1_230 = arith.constant 1 : index
    %c1_231 = arith.constant 1 : index
    %c0_232 = arith.constant 0 : index
    %119 = vector.load %arg4[%c0_228, %c0_229, %c1_230, %c1_231, %c0_232] : memref<1x1x8x10x4xf32, #tpu.memory_space<vmem>>, vector<1x1x6x8x4xf32>
    %120 = vector.shape_cast %119 : vector<1x1x6x8x4xf32> to vector<6x8x4xf32>
    %121 = tpu.concatenate %106, %108, %110, %112, %114, %116, %118, %120 in 2 : vector<6x8x4xf32>, vector<6x8x4xf32>, vector<6x8x4xf32>, vector<6x8x4xf32>, vector<6x8x4xf32>, vector<6x8x4xf32>, vector<6x8x4xf32>, vector<6x8x4xf32> -> vector<6x8x32xf32>
    %122 = vector.shape_cast %121 : vector<6x8x32xf32> to vector<48x32xf32>
    %c4 = arith.constant 4 : index
    %c0_233 = arith.constant 0 : index
    %c0_234 = arith.constant 0 : index
    %123 = vector.load %arg5[%c4, %c0_233, %c0_234] : memref<8x32x4xf32, #tpu.memory_space<vmem>>, vector<1x32x4xf32>
    %124 = vector.shape_cast %123 : vector<1x32x4xf32> to vector<32x4xf32>
    %cst_235 = arith.constant dense<0.000000e+00> : vector<48x4xf32>
    %125 = tpu.matmul %122, %124, %cst_235 {dimension_numbers = #tpu.dot_dimension_numbers<[1], [0], [0], [1], [0, 0, 1, 1], [], []>} : vector<48x32xf32>, vector<32x4xf32>, vector<48x4xf32> -> vector<48x4xf32>
    %126 = vector.broadcast %0 : vector<1x4xf32> to vector<48x4xf32>
    %127 = arith.addf %125, %126 : vector<48x4xf32>
    %c0_236 = arith.constant 0 : index
    %c4_237 = arith.constant 4 : index
    %c0_238 = arith.constant 0 : index
    %c0_239 = arith.constant 0 : index
    %c0_240 = arith.constant 0 : index
    %128 = vector.load %arg7[%c0_236, %c4_237, %c0_238, %c0_239, %c0_240] : memref<1x8x1x48x4xf32, #tpu.memory_space<vmem>>, vector<1x1x1x48x4xf32>
    %129 = vector.shape_cast %128 : vector<1x1x1x48x4xf32> to vector<48x4xf32>
    %130 = vector.shape_cast %127 : vector<48x4xf32> to vector<1x1x1x48x4xf32>
    tpu.vector_store %arg7[%c0_236, %c4_237, %c0_238, %c0_239, %c0_240], %130 {strides = array<i32>} : memref<1x8x1x48x4xf32, #tpu.memory_space<vmem>>, vector<1x1x1x48x4xf32>,
    %c0_241 = arith.constant 0 : index
    %c0_242 = arith.constant 0 : index
    %c0_243 = arith.constant 0 : index
    %c1_244 = arith.constant 1 : index
    %c0_245 = arith.constant 0 : index
    %131 = vector.load %arg3[%c0_241, %c0_242, %c0_243, %c1_244, %c0_245] : memref<1x1x8x10x4xf32, #tpu.memory_space<vmem>>, vector<1x1x6x8x4xf32>
    %132 = vector.shape_cast %131 : vector<1x1x6x8x4xf32> to vector<6x8x4xf32>
    %c0_246 = arith.constant 0 : index
    %c0_247 = arith.constant 0 : index
    %c0_248 = arith.constant 0 : index
    %c2_249 = arith.constant 2 : index
    %c0_250 = arith.constant 0 : index
    %133 = vector.load %arg3[%c0_246, %c0_247, %c0_248, %c2_249, %c0_250] : memref<1x1x8x10x4xf32, #tpu.memory_space<vmem>>, vector<1x1x6x8x4xf32>
    %134 = vector.shape_cast %133 : vector<1x1x6x8x4xf32> to vector<6x8x4xf32>
    %c0_251 = arith.constant 0 : index
    %c0_252 = arith.constant 0 : index
    %c1_253 = arith.constant 1 : index
    %c1_254 = arith.constant 1 : index
    %c0_255 = arith.constant 0 : index
    %135 = vector.load %arg3[%c0_251, %c0_252, %c1_253, %c1_254, %c0_255] : memref<1x1x8x10x4xf32, #tpu.memory_space<vmem>>, vector<1x1x6x8x4xf32>
    %136 = vector.shape_cast %135 : vector<1x1x6x8x4xf32> to vector<6x8x4xf32>
    %c0_256 = arith.constant 0 : index
    %c0_257 = arith.constant 0 : index
    %c1_258 = arith.constant 1 : index
    %c2_259 = arith.constant 2 : index
    %c0_260 = arith.constant 0 : index
    %137 = vector.load %arg3[%c0_256, %c0_257, %c1_258, %c2_259, %c0_260] : memref<1x1x8x10x4xf32, #tpu.memory_space<vmem>>, vector<1x1x6x8x4xf32>
    %138 = vector.shape_cast %137 : vector<1x1x6x8x4xf32> to vector<6x8x4xf32>
    %c0_261 = arith.constant 0 : index
    %c0_262 = arith.constant 0 : index
    %c0_263 = arith.constant 0 : index
    %c1_264 = arith.constant 1 : index
    %c0_265 = arith.constant 0 : index
    %139 = vector.load %arg4[%c0_261, %c0_262, %c0_263, %c1_264, %c0_265] : memref<1x1x8x10x4xf32, #tpu.memory_space<vmem>>, vector<1x1x6x8x4xf32>
    %140 = vector.shape_cast %139 : vector<1x1x6x8x4xf32> to vector<6x8x4xf32>
    %c0_266 = arith.constant 0 : index
    %c0_267 = arith.constant 0 : index
    %c0_268 = arith.constant 0 : index
    %c2_269 = arith.constant 2 : index
    %c0_270 = arith.constant 0 : index
    %141 = vector.load %arg4[%c0_266, %c0_267, %c0_268, %c2_269, %c0_270] : memref<1x1x8x10x4xf32, #tpu.memory_space<vmem>>, vector<1x1x6x8x4xf32>
    %142 = vector.shape_cast %141 : vector<1x1x6x8x4xf32> to vector<6x8x4xf32>
    %c0_271 = arith.constant 0 : index
    %c0_272 = arith.constant 0 : index
    %c1_273 = arith.constant 1 : index
    %c1_274 = arith.constant 1 : index
    %c0_275 = arith.constant 0 : index
    %143 = vector.load %arg4[%c0_271, %c0_272, %c1_273, %c1_274, %c0_275] : memref<1x1x8x10x4xf32, #tpu.memory_space<vmem>>, vector<1x1x6x8x4xf32>
    %144 = vector.shape_cast %143 : vector<1x1x6x8x4xf32> to vector<6x8x4xf32>
    %c0_276 = arith.constant 0 : index
    %c0_277 = arith.constant 0 : index
    %c1_278 = arith.constant 1 : index
    %c2_279 = arith.constant 2 : index
    %c0_280 = arith.constant 0 : index
    %145 = vector.load %arg4[%c0_276, %c0_277, %c1_278, %c2_279, %c0_280] : memref<1x1x8x10x4xf32, #tpu.memory_space<vmem>>, vector<1x1x6x8x4xf32>
    %146 = vector.shape_cast %145 : vector<1x1x6x8x4xf32> to vector<6x8x4xf32>
    %147 = tpu.concatenate %132, %134, %136, %138, %140, %142, %144, %146 in 2 : vector<6x8x4xf32>, vector<6x8x4xf32>, vector<6x8x4xf32>, vector<6x8x4xf32>, vector<6x8x4xf32>, vector<6x8x4xf32>, vector<6x8x4xf32>, vector<6x8x4xf32> -> vector<6x8x32xf32>
    %148 = vector.shape_cast %147 : vector<6x8x32xf32> to vector<48x32xf32>
    %c5 = arith.constant 5 : index
    %c0_281 = arith.constant 0 : index
    %c0_282 = arith.constant 0 : index
    %149 = vector.load %arg5[%c5, %c0_281, %c0_282] : memref<8x32x4xf32, #tpu.memory_space<vmem>>, vector<1x32x4xf32>
    %150 = vector.shape_cast %149 : vector<1x32x4xf32> to vector<32x4xf32>
    %cst_283 = arith.constant dense<0.000000e+00> : vector<48x4xf32>
    %151 = tpu.matmul %148, %150, %cst_283 {dimension_numbers = #tpu.dot_dimension_numbers<[1], [0], [0], [1], [0, 0, 1, 1], [], []>} : vector<48x32xf32>, vector<32x4xf32>, vector<48x4xf32> -> vector<48x4xf32>
    %152 = vector.broadcast %0 : vector<1x4xf32> to vector<48x4xf32>
    %153 = arith.addf %151, %152 : vector<48x4xf32>
    %c0_284 = arith.constant 0 : index
    %c5_285 = arith.constant 5 : index
    %c0_286 = arith.constant 0 : index
    %c0_287 = arith.constant 0 : index
    %c0_288 = arith.constant 0 : index
    %154 = vector.load %arg7[%c0_284, %c5_285, %c0_286, %c0_287, %c0_288] : memref<1x8x1x48x4xf32, #tpu.memory_space<vmem>>, vector<1x1x1x48x4xf32>
    %155 = vector.shape_cast %154 : vector<1x1x1x48x4xf32> to vector<48x4xf32>
    %156 = vector.shape_cast %153 : vector<48x4xf32> to vector<1x1x1x48x4xf32>
    tpu.vector_store %arg7[%c0_284, %c5_285, %c0_286, %c0_287, %c0_288], %156 {strides = array<i32>} : memref<1x8x1x48x4xf32, #tpu.memory_space<vmem>>, vector<1x1x1x48x4xf32>,
    %c0_289 = arith.constant 0 : index
    %c0_290 = arith.constant 0 : index
    %c1_291 = arith.constant 1 : index
    %c0_292 = arith.constant 0 : index
    %c0_293 = arith.constant 0 : index
    %157 = vector.load %arg3[%c0_289, %c0_290, %c1_291, %c0_292, %c0_293] : memref<1x1x8x10x4xf32, #tpu.memory_space<vmem>>, vector<1x1x6x8x4xf32>
    %158 = vector.shape_cast %157 : vector<1x1x6x8x4xf32> to vector<6x8x4xf32>
    %c0_294 = arith.constant 0 : index
    %c0_295 = arith.constant 0 : index
    %c1_296 = arith.constant 1 : index
    %c1_297 = arith.constant 1 : index
    %c0_298 = arith.constant 0 : index
    %159 = vector.load %arg3[%c0_294, %c0_295, %c1_296, %c1_297, %c0_298] : memref<1x1x8x10x4xf32, #tpu.memory_space<vmem>>, vector<1x1x6x8x4xf32>
    %160 = vector.shape_cast %159 : vector<1x1x6x8x4xf32> to vector<6x8x4xf32>
    %c0_299 = arith.constant 0 : index
    %c0_300 = arith.constant 0 : index
    %c2_301 = arith.constant 2 : index
    %c0_302 = arith.constant 0 : index
    %c0_303 = arith.constant 0 : index
    %161 = vector.load %arg3[%c0_299, %c0_300, %c2_301, %c0_302, %c0_303] : memref<1x1x8x10x4xf32, #tpu.memory_space<vmem>>, vector<1x1x6x8x4xf32>
    %162 = vector.shape_cast %161 : vector<1x1x6x8x4xf32> to vector<6x8x4xf32>
    %c0_304 = arith.constant 0 : index
    %c0_305 = arith.constant 0 : index
    %c2_306 = arith.constant 2 : index
    %c1_307 = arith.constant 1 : index
    %c0_308 = arith.constant 0 : index
    %163 = vector.load %arg3[%c0_304, %c0_305, %c2_306, %c1_307, %c0_308] : memref<1x1x8x10x4xf32, #tpu.memory_space<vmem>>, vector<1x1x6x8x4xf32>
    %164 = vector.shape_cast %163 : vector<1x1x6x8x4xf32> to vector<6x8x4xf32>
    %c0_309 = arith.constant 0 : index
    %c0_310 = arith.constant 0 : index
    %c1_311 = arith.constant 1 : index
    %c0_312 = arith.constant 0 : index
    %c0_313 = arith.constant 0 : index
    %165 = vector.load %arg4[%c0_309, %c0_310, %c1_311, %c0_312, %c0_313] : memref<1x1x8x10x4xf32, #tpu.memory_space<vmem>>, vector<1x1x6x8x4xf32>
    %166 = vector.shape_cast %165 : vector<1x1x6x8x4xf32> to vector<6x8x4xf32>
    %c0_314 = arith.constant 0 : index
    %c0_315 = arith.constant 0 : index
    %c1_316 = arith.constant 1 : index
    %c1_317 = arith.constant 1 : index
    %c0_318 = arith.constant 0 : index
    %167 = vector.load %arg4[%c0_314, %c0_315, %c1_316, %c1_317, %c0_318] : memref<1x1x8x10x4xf32, #tpu.memory_space<vmem>>, vector<1x1x6x8x4xf32>
    %168 = vector.shape_cast %167 : vector<1x1x6x8x4xf32> to vector<6x8x4xf32>
    %c0_319 = arith.constant 0 : index
    %c0_320 = arith.constant 0 : index
    %c2_321 = arith.constant 2 : index
    %c0_322 = arith.constant 0 : index
    %c0_323 = arith.constant 0 : index
    %169 = vector.load %arg4[%c0_319, %c0_320, %c2_321, %c0_322, %c0_323] : memref<1x1x8x10x4xf32, #tpu.memory_space<vmem>>, vector<1x1x6x8x4xf32>
    %170 = vector.shape_cast %169 : vector<1x1x6x8x4xf32> to vector<6x8x4xf32>
    %c0_324 = arith.constant 0 : index
    %c0_325 = arith.constant 0 : index
    %c2_326 = arith.constant 2 : index
    %c1_327 = arith.constant 1 : index
    %c0_328 = arith.constant 0 : index
    %171 = vector.load %arg4[%c0_324, %c0_325, %c2_326, %c1_327, %c0_328] : memref<1x1x8x10x4xf32, #tpu.memory_space<vmem>>, vector<1x1x6x8x4xf32>
    %172 = vector.shape_cast %171 : vector<1x1x6x8x4xf32> to vector<6x8x4xf32>
    %173 = tpu.concatenate %158, %160, %162, %164, %166, %168, %170, %172 in 2 : vector<6x8x4xf32>, vector<6x8x4xf32>, vector<6x8x4xf32>, vector<6x8x4xf32>, vector<6x8x4xf32>, vector<6x8x4xf32>, vector<6x8x4xf32>, vector<6x8x4xf32> -> vector<6x8x32xf32>
    %174 = vector.shape_cast %173 : vector<6x8x32xf32> to vector<48x32xf32>
    %c6 = arith.constant 6 : index
    %c0_329 = arith.constant 0 : index
    %c0_330 = arith.constant 0 : index
    %175 = vector.load %arg5[%c6, %c0_329, %c0_330] : memref<8x32x4xf32, #tpu.memory_space<vmem>>, vector<1x32x4xf32>
    %176 = vector.shape_cast %175 : vector<1x32x4xf32> to vector<32x4xf32>
    %cst_331 = arith.constant dense<0.000000e+00> : vector<48x4xf32>
    %177 = tpu.matmul %174, %176, %cst_331 {dimension_numbers = #tpu.dot_dimension_numbers<[1], [0], [0], [1], [0, 0, 1, 1], [], []>} : vector<48x32xf32>, vector<32x4xf32>, vector<48x4xf32> -> vector<48x4xf32>
    %178 = vector.broadcast %0 : vector<1x4xf32> to vector<48x4xf32>
    %179 = arith.addf %177, %178 : vector<48x4xf32>
    %c0_332 = arith.constant 0 : index
    %c6_333 = arith.constant 6 : index
    %c0_334 = arith.constant 0 : index
    %c0_335 = arith.constant 0 : index
    %c0_336 = arith.constant 0 : index
    %180 = vector.load %arg7[%c0_332, %c6_333, %c0_334, %c0_335, %c0_336] : memref<1x8x1x48x4xf32, #tpu.memory_space<vmem>>, vector<1x1x1x48x4xf32>
    %181 = vector.shape_cast %180 : vector<1x1x1x48x4xf32> to vector<48x4xf32>
    %182 = vector.shape_cast %179 : vector<48x4xf32> to vector<1x1x1x48x4xf32>
    tpu.vector_store %arg7[%c0_332, %c6_333, %c0_334, %c0_335, %c0_336], %182 {strides = array<i32>} : memref<1x8x1x48x4xf32, #tpu.memory_space<vmem>>, vector<1x1x1x48x4xf32>,
    %c0_337 = arith.constant 0 : index
    %c0_338 = arith.constant 0 : index
    %c1_339 = arith.constant 1 : index
    %c1_340 = arith.constant 1 : index
    %c0_341 = arith.constant 0 : index
    %183 = vector.load %arg3[%c0_337, %c0_338, %c1_339, %c1_340, %c0_341] : memref<1x1x8x10x4xf32, #tpu.memory_space<vmem>>, vector<1x1x6x8x4xf32>
    %184 = vector.shape_cast %183 : vector<1x1x6x8x4xf32> to vector<6x8x4xf32>
    %c0_342 = arith.constant 0 : index
    %c0_343 = arith.constant 0 : index
    %c1_344 = arith.constant 1 : index
    %c2_345 = arith.constant 2 : index
    %c0_346 = arith.constant 0 : index
    %185 = vector.load %arg3[%c0_342, %c0_343, %c1_344, %c2_345, %c0_346] : memref<1x1x8x10x4xf32, #tpu.memory_space<vmem>>, vector<1x1x6x8x4xf32>
    %186 = vector.shape_cast %185 : vector<1x1x6x8x4xf32> to vector<6x8x4xf32>
    %c0_347 = arith.constant 0 : index
    %c0_348 = arith.constant 0 : index
    %c2_349 = arith.constant 2 : index
    %c1_350 = arith.constant 1 : index
    %c0_351 = arith.constant 0 : index
    %187 = vector.load %arg3[%c0_347, %c0_348, %c2_349, %c1_350, %c0_351] : memref<1x1x8x10x4xf32, #tpu.memory_space<vmem>>, vector<1x1x6x8x4xf32>
    %188 = vector.shape_cast %187 : vector<1x1x6x8x4xf32> to vector<6x8x4xf32>
    %c0_352 = arith.constant 0 : index
    %c0_353 = arith.constant 0 : index
    %c2_354 = arith.constant 2 : index
    %c2_355 = arith.constant 2 : index
    %c0_356 = arith.constant 0 : index
    %189 = vector.load %arg3[%c0_352, %c0_353, %c2_354, %c2_355, %c0_356] : memref<1x1x8x10x4xf32, #tpu.memory_space<vmem>>, vector<1x1x6x8x4xf32>
    %190 = vector.shape_cast %189 : vector<1x1x6x8x4xf32> to vector<6x8x4xf32>
    %c0_357 = arith.constant 0 : index
    %c0_358 = arith.constant 0 : index
    %c1_359 = arith.constant 1 : index
    %c1_360 = arith.constant 1 : index
    %c0_361 = arith.constant 0 : index
    %191 = vector.load %arg4[%c0_357, %c0_358, %c1_359, %c1_360, %c0_361] : memref<1x1x8x10x4xf32, #tpu.memory_space<vmem>>, vector<1x1x6x8x4xf32>
    %192 = vector.shape_cast %191 : vector<1x1x6x8x4xf32> to vector<6x8x4xf32>
    %c0_362 = arith.constant 0 : index
    %c0_363 = arith.constant 0 : index
    %c1_364 = arith.constant 1 : index
    %c2_365 = arith.constant 2 : index
    %c0_366 = arith.constant 0 : index
    %193 = vector.load %arg4[%c0_362, %c0_363, %c1_364, %c2_365, %c0_366] : memref<1x1x8x10x4xf32, #tpu.memory_space<vmem>>, vector<1x1x6x8x4xf32>
    %194 = vector.shape_cast %193 : vector<1x1x6x8x4xf32> to vector<6x8x4xf32>
    %c0_367 = arith.constant 0 : index
    %c0_368 = arith.constant 0 : index
    %c2_369 = arith.constant 2 : index
    %c1_370 = arith.constant 1 : index
    %c0_371 = arith.constant 0 : index
    %195 = vector.load %arg4[%c0_367, %c0_368, %c2_369, %c1_370, %c0_371] : memref<1x1x8x10x4xf32, #tpu.memory_space<vmem>>, vector<1x1x6x8x4xf32>
    %196 = vector.shape_cast %195 : vector<1x1x6x8x4xf32> to vector<6x8x4xf32>
    %c0_372 = arith.constant 0 : index
    %c0_373 = arith.constant 0 : index
    %c2_374 = arith.constant 2 : index
    %c2_375 = arith.constant 2 : index
    %c0_376 = arith.constant 0 : index
    %197 = vector.load %arg4[%c0_372, %c0_373, %c2_374, %c2_375, %c0_376] : memref<1x1x8x10x4xf32, #tpu.memory_space<vmem>>, vector<1x1x6x8x4xf32>
    %198 = vector.shape_cast %197 : vector<1x1x6x8x4xf32> to vector<6x8x4xf32>
    %199 = tpu.concatenate %184, %186, %188, %190, %192, %194, %196, %198 in 2 : vector<6x8x4xf32>, vector<6x8x4xf32>, vector<6x8x4xf32>, vector<6x8x4xf32>, vector<6x8x4xf32>, vector<6x8x4xf32>, vector<6x8x4xf32>, vector<6x8x4xf32> -> vector<6x8x32xf32>
    %200 = vector.shape_cast %199 : vector<6x8x32xf32> to vector<48x32xf32>
    %c7 = arith.constant 7 : index
    %c0_377 = arith.constant 0 : index
    %c0_378 = arith.constant 0 : index
    %201 = vector.load %arg5[%c7, %c0_377, %c0_378] : memref<8x32x4xf32, #tpu.memory_space<vmem>>, vector<1x32x4xf32>
    %202 = vector.shape_cast %201 : vector<1x32x4xf32> to vector<32x4xf32>
    %cst_379 = arith.constant dense<0.000000e+00> : vector<48x4xf32>
    %203 = tpu.matmul %200, %202, %cst_379 {dimension_numbers = #tpu.dot_dimension_numbers<[1], [0], [0], [1], [0, 0, 1, 1], [], []>} : vector<48x32xf32>, vector<32x4xf32>, vector<48x4xf32> -> vector<48x4xf32>
    %204 = vector.broadcast %0 : vector<1x4xf32> to vector<48x4xf32>
    %205 = arith.addf %203, %204 : vector<48x4xf32>
    %c0_380 = arith.constant 0 : index
    %c7_381 = arith.constant 7 : index
    %c0_382 = arith.constant 0 : index
    %c0_383 = arith.constant 0 : index
    %c0_384 = arith.constant 0 : index
    %206 = vector.load %arg7[%c0_380, %c7_381, %c0_382, %c0_383, %c0_384] : memref<1x8x1x48x4xf32, #tpu.memory_space<vmem>>, vector<1x1x1x48x4xf32>
    %207 = vector.shape_cast %206 : vector<1x1x1x48x4xf32> to vector<48x4xf32>
    %208 = vector.shape_cast %205 : vector<48x4xf32> to vector<1x1x1x48x4xf32>
    tpu.vector_store %arg7[%c0_380, %c7_381, %c0_382, %c0_383, %c0_384], %208 {strides = array<i32>} : memref<1x8x1x48x4xf32, #tpu.memory_space<vmem>>, vector<1x1x1x48x4xf32>,
    return
  }
  func.func @transform_0(%arg0: i32, %arg1: i32) -> (i32, i32, i32, i32, i32) {
    %c0_i32 = arith.constant 0 : i32
    %0 = arith.addi %arg1, %c0_i32 : i32
    %c0_i32_0 = arith.constant 0 : i32
    %c0_i32_1 = arith.constant 0 : i32
    %c0_i32_2 = arith.constant 0 : i32
    %c0_i32_3 = arith.constant 0 : i32
    return %arg0, %0, %c0_i32_0, %c0_i32_1, %c0_i32_2 : i32, i32, i32, i32, i32
  }
  func.func @transform_1(%arg0: i32, %arg1: i32) -> (i32, i32, i32, i32, i32) {
    %c1_i32 = arith.constant 1 : i32
    %0 = arith.addi %arg1, %c1_i32 : i32
    %c0_i32 = arith.constant 0 : i32
    %c0_i32_0 = arith.constant 0 : i32
    %c0_i32_1 = arith.constant 0 : i32
    %c0_i32_2 = arith.constant 0 : i32
    return %arg0, %0, %c0_i32, %c0_i32_0, %c0_i32_1 : i32, i32, i32, i32, i32
  }
  func.func @transform_2(%arg0: i32, %arg1: i32) -> (i32, i32, i32, i32, i32) {
    %c2_i32 = arith.constant 2 : i32
    %0 = arith.addi %arg1, %c2_i32 : i32
    %c0_i32 = arith.constant 0 : i32
    %c0_i32_0 = arith.constant 0 : i32
    %c0_i32_1 = arith.constant 0 : i32
    %c0_i32_2 = arith.constant 0 : i32
    return %arg0, %0, %c0_i32, %c0_i32_0, %c0_i32_1 : i32, i32, i32, i32, i32
  }
  func.func @transform_3(%arg0: i32, %arg1: i32) -> (i32, i32, i32) {
    %c0_i32 = arith.constant 0 : i32
    %c0_i32_0 = arith.constant 0 : i32
    %c0_i32_1 = arith.constant 0 : i32
    %c0_i32_2 = arith.constant 0 : i32
    return %c0_i32, %c0_i32_0, %c0_i32_1 : i32, i32, i32
  }
  func.func @transform_4(%arg0: i32, %arg1: i32) -> (i32, i32) {
    %c0_i32 = arith.constant 0 : i32
    %c0_i32_0 = arith.constant 0 : i32
    %c0_i32_1 = arith.constant 0 : i32
    return %c0_i32, %c0_i32_0 : i32, i32
  }
  func.func @transform_5(%arg0: i32, %arg1: i32) -> (i32, i32, i32, i32, i32) {
    %c0_i32 = arith.constant 0 : i32
    %c0_i32_0 = arith.constant 0 : i32
    %c0_i32_1 = arith.constant 0 : i32
    %c0_i32_2 = arith.constant 0 : i32
    return %arg0, %c0_i32, %arg1, %c0_i32_0, %c0_i32_1 : i32, i32, i32, i32, i32
  }
}

</mosaic_0001>

<bundles_post_ra>
// kernel: tpu_custom_call.1
= control target key start
LH: loop header
LB: loop body
LE: loop exit
PB: predicated region body
PF: predicated region fallthrough
CT: control target
= control target key end

     0   :  { %s6900_s0 = inlined_call_operand.vmem [shape: f32[2,5,8,10,4], index: 0, kind: input, shape index: {}]   ;;  %s6901_s1 = inlined_call_operand.vmem [shape: f32[2,5,8,10,4], index: 1, kind: input, shape index: {}]   ;;  %s6902_s2 = inlined_call_operand.vmem [shape: f32[2,5,8,10,4], index: 2, kind: input, shape index: {}]   ;;  %s6903_s3 = inlined_call_operand.vmem [shape: f32[8,32,4], index: 3, kind: input, shape index: {}]   ;;  %s6904_s4 = inlined_call_operand.vmem [shape: f32[1,4], index: 4, kind: input, shape index: {}]   ;;  %s6905_s5 = inlined_call_operand.vmem [shape: f32[2,8,3,48,4], index: 5, kind: output, shape index: {}]  }
   0x1   :  { %6960 = sst [smem:[#allocation18_spill]] %s6900_s0 }
   0x2   :  { %s4565_s18 = smov 0   ;;  %s4567_s19 = smov 0  }
   0x3   :  { %s4569_s20 = smov 0   ;;  %s4571_s21 = smov 0  }
   0x4   :  { %s4573_s22 = smov 0   ;;  %s4575_s23 = smov 0  }
   0x5   :  { %s4577_s24 = smov 0  }
   0x6 LB: > { %s24_s25 = sadd.s32 1, %s4518_s22  ;;  %s27_s26 = sadd.s32 1, %s4522_s23  ;;  %s4526_s24 = sphi %s4577_s24, %s15_s24   ;;  %s4522_s23 = sphi %s4575_s23, %s7028_s23   ;;  %s4518_s22 = sphi %s4573_s22, %s7027_s22   ;;  %s4514_s21 = sphi %s4571_s21, %s7026_s21   ;;  %s4510_s20 = sphi %s4569_s20, %s7025_s20   ;;  %s4506_s19 = sphi %s4567_s19, %s7024_s19   ;;  %s4502_s18 = sphi %s4565_s18, %s7023_s18  }
   0x7   : > { %p25_p0 = scmp.ge.s32.totalorder %s24_s25, 3  ;;  %s3761_s27 = sadd.s32 4294967295, %s4526_s24  }
   0x8   : > { %p176_p1 = scmp.ne.s32.totalorder %s4506_s19, %s4502_s18  ;;  %p177_p2 = scmp.eq.s32.totalorder %s3761_s27, 5 }
   0x9   : > { %s7030_s25 = smov (%p25_p0, %s24_s25), 0  ;;  %s7032_s26 = smov (!%p25_p0, %s27_s26), %s4522_s23 }
   0xa   : > { %s162_s28 = ssub.s32 %s4518_s22, %s7030_s25  ;;  %p29_p3 = scmp.ge.s32.totalorder %s7032_s26, 2 }
   0xb   : > { %p3765_p4 = scmp.ge.s32.totalorder %s4526_s24, 1  ;;  %p4611_p5 = por %p177_p2, %p176_p1 }
   0xc   : > { %p247_p6 = scmp.lt.s32.totalorder %s4526_s24, 7  ;;  %s7034_s26 = smov (%p29_p3, %s7032_s26), 0 }
   0xd   : > { %s161_s30 = ssub.s32 %s4522_s23, %s7034_s26  ;;  %s166_s7 = sadd.s32 1, %s4506_s19 }
   0xe   : > { %p248_p7 = pnand %p3765_p4, %p247_p6  ;;  %s163_s6 = sor.u32 %s162_s28, %s161_s30 }
   0xf   : > { %p164_p8 = scmp.eq.s32.totalorder %s163_s6, 0 }
  0x10   : > { %251 = sbr.rel (%p248_p7) target bundleno = 1022 (0x3fe), region = 40 }
  0x11   : > { %s4622_s8 = scalar_select %p164_p8, %s4506_s19, %s166_s7  }
  0x15   : > { %p298_p9 = scmp.lt.s32.totalorder %s4514_s21, 1  ;;  %p300_p10 = scmp.lt.s32.totalorder %s4510_s20, 4  ;;  %v600_v23 = vld [vmem:[%s6903_s3 + $0x18] sm:$0xff]  ;;  %v599_v26 = vld [vmem:[%s6903_s3 + $0x10] sm:$0xff]  ;;  %v598_v27 = vld [vmem:[%s6903_s3 + $0x8] sm:$0xff]  ;;  %vm548_vm0 = vcmask 31744  }
  0x16   : > { %s6962_s0 = sld [smem:[#allocation18_spill]]  ;;  %s6938_s27 = smov 4   ;;  %4262 = vmatprep.subr.mxu0 %v600_v23  ;;  %v597_v28 = vld [vmem:[%s6903_s3] sm:$0xff]  ;;  %v3830_v54 = vld [vmem:[%s6903_s3 + $0x38] sm:$0xff]  ;;  %v3829_v59 = vld [vmem:[%s6903_s3 + $0x30] sm:$0xff]  ;;  %vm555_vm1 = vcmask 64512  }
  0x17   : > { %s299_s9 = scalar_select %p298_p9, %s4514_s21, 1  ;;  %4263 = vmatpush3.msra.mxu0 %v600_v23  ;;  %4279 = vmatprep.subr.mxu1 %v3830_v54  ;;  %v3828_v60 = vld [vmem:[%s6903_s3 + $0x28] sm:$0xff]  ;;  %v3827_v63 = vld [vmem:[%s6903_s3 + $0x20] sm:$0xff]  ;;  %vm562_vm2 = vcmask 97280   ;;  %vm569_vm3 = vcmask 130048   ;;  %vm576_vm4 = vcmask 162816  }
  0x18   : > { %s301_s10 = scalar_select %p300_p10, %s4510_s20, 4  ;;  %4264 = vmatprep.subr.mxu0 %v599_v26  ;;  %4280 = vmatpush3.msra.mxu1 %v3830_v54  ;;  %vm583_vm5 = vcmask 195584   ;;  %vm590_vm6 = vcmask 228352   ;;  %vm607_vm7 = vcmask 261120  }
  0x19   : > { %s4628_s11 = smul.u32 80, %s299_s9  ;;  %s307_s28 = sadd.s32 1, %s4510_s20  ;;  %4265 = vmatpush3.msra.mxu0 %v599_v26  ;;  %4281 = vmatprep.subr.mxu1 %v3829_v59 }
  0x1a   : > { %s3766_s12 = sshll.u32 %s301_s10, 4  ;;  %s6936_s30 = smov 8   ;;  %4266 = vmatprep.subr.mxu0 %v598_v27  ;;  %4282 = vmatpush3.msra.mxu1 %v3829_v59 }
  0x1b   : > { %s304_s13 = sadd.s32 %s4628_s11, %s3766_s12  ;;  %p310_p11 = scmp.lt.s32.totalorder %s307_s28, 4  ;;  %4267 = vmatpush3.msra.mxu0 %v598_v27  ;;  %4283 = vmatprep.subr.mxu1 %v3828_v60 }
  0x1c   : > { %s3767_s14 = sshll.u32 %s304_s13, 3  ;;  %s6934_s9 = smov 12   ;;  %4268 = vmatprep.subr.mxu0 %v597_v28  ;;  %4284 = vmatpush3.msra.mxu1 %v3828_v60 }
  0x1d   : > { %s4634_s17 = scalar_lea.vmem %s6962_s0, %s3767_s14  ;;  %s7036_s28 = smov (!%p310_p11, %s307_s28), 4  ;;  %4269 = vmatpush3.msra.mxu0 %v597_v28  ;;  %4285 = vmatprep.subr.mxu1 %v3827_v63 }
  0x1e   : > { %v4637_v0 = vld [vmem:[%s4634_s17 + $0x21] sm:$0xff]  ;;  %v4647_v2 = vld [vmem:[%s4634_s17 + $0x31] sm:$0xff]  ;;  %s3768_s6 = sshll.u32 %s7036_s28, 4  ;;  %s6906_s15 = smov 16   ;;  %4286 = vmatpush3.msra.mxu1 %v3827_v63 }
  0x1f   : > { %v4640_v1 = vld [vmem:[%s4634_s17 + $0x1] sm:$0xff]  ;;  %390 = vrot.lane.b32.xlu1 %v4637_v0, %s6938_s27  ;;  %v4650_v3 = vld [vmem:[%s4634_s17 + $0x11] sm:$0xff]  ;;  %s314_s7 = sadd.s32 %s4628_s11, %s3768_s6  ;;  %s6956_s16 = smov 20  }
  0x20   : > { %6963 = vst [vmem:[#allocation3_spill] sm:$0xff] %v4640_v1  ;;  %386 = vrot.lane.b32.xlu0 %v4640_v1, %s6938_s27  ;;  %6964 = vst [vmem:[#allocation4_spill] sm:$0xff] %v4650_v3  ;;  %v4657_v4 = vld [vmem:[%s4634_s17 + $0x51] sm:$0xff]  ;;  %v4660_v5 = vld [vmem:[%s4634_s17 + $0x41] sm:$0xff]  ;;  %s3769_s10 = sshll.u32 %s314_s7, 3  ;;  %s6958_s7 = smov 24  }
  0x21   : > { %v4667_v6 = vld [vmem:[%s4634_s17 + $0x20] sm:$0xff]  ;;  %v4670_v7 = vld [vmem:[%s4634_s17 + $0x10] sm:$0xff]  ;;  %s4712_s14 = scalar_lea.vmem %s6901_s1, %s3769_s10  ;;  %s6940_s10 = smov 28  }
  0x22   : > { %v4678_v8 = vld [vmem:[%s4634_s17 + $0x40] sm:$0xff]  ;;  %v4681_v9 = vld [vmem:[%s4634_s17 + $0x30] sm:$0xff]  ;;  %s318_s13 = sadd.s32 2, %s4510_s20 }
  0x23   : > { %392 = vrot.lane.b32.xlu1 %v4647_v2, %s6938_s27  ;;  %v4688_v10 = vld [vmem:[%s4634_s17 + $0x60] sm:$0xff]  ;;  %v4691_v11 = vld [vmem:[%s4634_s17 + $0x50] sm:$0xff]  ;;  %p5494_p12 = scmp.lt.s32.totalorder %s318_s13, 4 }
  0x24   : > { %388 = vrot.lane.b32.xlu0 %v4650_v3, %s6938_s27  ;;  %v4707_v12 = vld [vmem:[%s4634_s17 + $0x61] sm:$0xff]  ;;  %v4719_v13 = vld [vmem:[%s4712_s14 + $0x10] sm:$0xff] }
  0x25   : > { %v355_v14 = vld [vmem:[%s4712_s14] sm:$0xff]  ;;  %v4726_v15 = vld [vmem:[%s4712_s14 + $0x30] sm:$0xff]  ;;  %s7038_s13 = smov (!%p5494_p12, %s318_s13), 4 }
  0x26   : > { %v4729_v16 = vld [vmem:[%s4712_s14 + $0x20] sm:$0xff]  ;;  %v4736_v17 = vld [vmem:[%s4712_s14 + $0x50] sm:$0xff]  ;;  %s3770_s6 = sshll.u32 %s7038_s13, 4 }
  0x27   : > { %396 = vrot.lane.b32.xlu1 %v4657_v4, %s6938_s27  ;;  %v4739_v18 = vld [vmem:[%s4712_s14 + $0x40] sm:$0xff]  ;;  %v4746_v19 = vld [vmem:[%s4712_s14 + $0x11] sm:$0xff]  ;;  %s325_s12 = sadd.s32 %s4628_s11, %s3770_s6 }
  0x28   : > { %394 = vrot.lane.b32.xlu0 %v4660_v5, %s6938_s27  ;;  %v4749_v20 = vld [vmem:[%s4712_s14 + $0x1] sm:$0xff]  ;;  %v4756_v21 = vld [vmem:[%s4712_s14 + $0x31] sm:$0xff]  ;;  %s3771_s11 = sshll.u32 %s325_s12, 3  ;;  %s295_s12 = sand.u32 1, %s4502_s18  }
  0x29   : > { %v4759_v22 = vld [vmem:[%s4712_s14 + $0x21] sm:$0xff]  ;;  %v4769_v24 = vld [vmem:[%s4712_s14 + $0x51] sm:$0xff]  ;;  %s5602_s6 = scalar_lea.vmem %s6902_s2, %s3771_s11  ;;  %s4398_s11 = smul.u32 384, %s295_s12 }
  0x2a   : > { %6965 = vst [vmem:[#allocation5_spill] sm:$0xff] %v4769_v24  ;;  %v4772_v25 = vld [vmem:[%s4712_s14 + $0x41] sm:$0xff]  ;;  %v4818_v31 = vld [vmem:[%s4634_s17 + $0x12] sm:$0xff]  ;;  %s7015_s12 = smov 24  }
  0x2b   : > { %412 = vrot.lane.b32.xlu1 %v4667_v6, %s6936_s30  ;;  %v4796_v29 = vld [vmem:[%s4712_s14 + $0x60] sm:$0xff]  ;;  %6966 = vst [vmem:[#allocation6_spill] sm:$0xff] %v4818_v31  ;;  %v4825_v33 = vld [vmem:[%s4634_s17 + $0x32] sm:$0xff]  ;;  %s5665_s28 = scalar_lea.vmem [#allocation2], %s4398_s11  ;;  %s7016_s11 = smov 20  }
  0x2c   : > { %410 = vrot.lane.b32.xlu0 %v4670_v7, %s6936_s30  ;;  %v4811_v30 = vld [vmem:[%s4712_s14 + $0x61] sm:$0xff]  ;;  %6967 = vst [vmem:[#allocation7_spill] sm:$0xff] %v4825_v33  ;;  %v4835_v35 = vld [vmem:[%s4634_s17 + $0x52] sm:$0xff] }
  0x2d   : > { %v733_v32 = vld [vmem:[%s4634_s17 + $0x2] sm:$0xff]  ;;  %6969 = vst [vmem:[#allocation9_spill] sm:$0xff] %v4835_v35  ;;  %v4900_v46 = vld [vmem:[%s4712_s14 + $0x12] sm:$0xff] }
  0x2e   : > { %v4828_v34 = vld [vmem:[%s4634_s17 + $0x22] sm:$0xff]  ;;  %6972 = vst [vmem:[#allocation12_spill] sm:$0xff] %v4900_v46  ;;  %v4911_v50 = vld [vmem:[%s4712_s14 + $0x32] sm:$0xff] }
  0x2f   : > { %416 = vrot.lane.b32.xlu1 %v4678_v8, %s6936_s30  ;;  %6968 = vst [vmem:[#allocation8_spill] sm:$0xff] %v4828_v34  ;;  %v4838_v36 = vld [vmem:[%s4634_s17 + $0x42] sm:$0xff]  ;;  %6973 = vst [vmem:[#allocation13_spill] sm:$0xff] %v4911_v50  ;;  %v4928_v55 = vld [vmem:[%s4712_s14 + $0x52] sm:$0xff] }
  0x30   : > { %414 = vrot.lane.b32.xlu0 %v4681_v9, %s6936_s30  ;;  %6970 = vst [vmem:[#allocation10_spill] sm:$0xff] %v4838_v36  ;;  %v4865_v37 = vld [vmem:[%s4634_s17 + $0x62] sm:$0xff]  ;;  %6975 = vst [vmem:[#allocation15_spill] sm:$0xff] %v4928_v55 }
  0x31   : > { %6971 = vst [vmem:[#allocation11_spill] sm:$0xff] %v4865_v37  ;;  %v757_v47 = vld [vmem:[%s4712_s14 + $0x2] sm:$0xff] }
  0x32   : > { %v4914_v51 = vld [vmem:[%s4712_s14 + $0x22] sm:$0xff] }
  0x33   : > { %420 = vrot.lane.b32.xlu1 %v4688_v10, %s6936_s30  ;;  %6974 = vst [vmem:[#allocation14_spill] sm:$0xff] %v4914_v51  ;;  %v4931_v56 = vld [vmem:[%s4712_s14 + $0x42] sm:$0xff] }
  0x34   : > { %418 = vrot.lane.b32.xlu0 %v4691_v11, %s6936_s30  ;;  %6976 = vst [vmem:[#allocation16_spill] sm:$0xff] %v4931_v56  ;;  %v4987_v54 = vld [vmem:[%s4712_s14 + $0x62] sm:$0xff] }
  0x35   : > { %6977 = vst [vmem:[#allocation17_spill] sm:$0xff] %v4987_v54 }
  0x37   : > { %436 = vrot.lane.b32.xlu1 %v4637_v0, %s6934_s9 }
  0x38   : > { %434 = vrot.lane.b32.xlu0 %v4650_v3, %s6934_s9 }
  0x3b   : > { %440 = vrot.lane.b32.xlu1 %v4660_v5, %s6934_s9 }
  0x3c   : > { %438 = vrot.lane.b32.xlu0 %v4647_v2, %s6934_s9 }
  0x3f   : > { %444 = vrot.lane.b32.xlu1 %v4707_v12, %s6934_s9 }
  0x40   : > { %442 = vrot.lane.b32.xlu0 %v4657_v4, %s6934_s9 }
  0x43   : > { %460 = vrot.lane.b32.xlu1 %v4719_v13, %s6906_s15 }
  0x44   : > { %458 = vrot.lane.b32.xlu0 %v355_v14, %s6906_s15 }
  0x47   : > { %464 = vrot.lane.b32.xlu1 %v4726_v15, %s6906_s15 }
  0x48   : > { %462 = vrot.lane.b32.xlu0 %v4729_v16, %s6906_s15 }
  0x4b   : > { %468 = vrot.lane.b32.xlu1 %v4736_v17, %s6906_s15 }
  0x4c   : > { %466 = vrot.lane.b32.xlu0 %v4739_v18, %s6906_s15 }
  0x4f   : > { %484 = vrot.lane.b32.xlu1 %v4746_v19, %s6956_s16 }
  0x50   : > { %482 = vrot.lane.b32.xlu0 %v4749_v20, %s6956_s16 }
  0x53   : > { %488 = vrot.lane.b32.xlu1 %v4756_v21, %s6956_s16 }
  0x54   : > { %486 = vrot.lane.b32.xlu0 %v4759_v22, %s6956_s16 }
  0x57   : > { %492 = vrot.lane.b32.xlu1 %v4769_v24, %s6956_s16 }
  0x58   : > { %490 = vrot.lane.b32.xlu0 %v4772_v25, %s6956_s16 }
  0x5b   : > { %508 = vrot.lane.b32.xlu1 %v4729_v16, %s6958_s7 }
  0x5c   : > { %506 = vrot.lane.b32.xlu0 %v4719_v13, %s6958_s7 }
  0x5f   : > { %512 = vrot.lane.b32.xlu1 %v4739_v18, %s6958_s7 }
  0x60   : > { %510 = vrot.lane.b32.xlu0 %v4726_v15, %s6958_s7 }
  0x63   : > { %516 = vrot.lane.b32.xlu1 %v4796_v29, %s6958_s7 }
  0x64   : > { %514 = vrot.lane.b32.xlu0 %v4736_v17, %s6958_s7 }
  0x67   : > { %532 = vrot.lane.b32.xlu1 %v4759_v22, %s6940_s10 }
  0x68   : > { %530 = vrot.lane.b32.xlu0 %v4746_v19, %s6940_s10 }
  0x6b   : > { %536 = vrot.lane.b32.xlu1 %v4772_v25, %s6940_s10 }
  0x6c   : > { %534 = vrot.lane.b32.xlu0 %v4756_v21, %s6940_s10 }
  0x6f   : > { %540 = vrot.lane.b32.xlu1 %v4811_v30, %s6940_s10 }
  0x70   : > { %538 = vrot.lane.b32.xlu0 %v4769_v24, %s6940_s10 }
  0x73   : > { %783 = vrot.lane.b32.xlu1 %v4818_v31, %s6938_s27 }
  0x74   : > { %781 = vrot.lane.b32.xlu0 %v733_v32, %s6938_s27 }
  0x77   : > { %787 = vrot.lane.b32.xlu1 %v4825_v33, %s6938_s27 }
  0x78   : > { %785 = vrot.lane.b32.xlu0 %v4828_v34, %s6938_s27 }
  0x7b   : > { %791 = vrot.lane.b32.xlu1 %v4835_v35, %s6938_s27 }
  0x7c   : > { %789 = vrot.lane.b32.xlu0 %v4838_v36, %s6938_s27 }
  0x7f   : > { %807 = vrot.lane.b32.xlu1 %v4637_v0, %s6936_s30 }
  0x80   : > { %805 = vrot.lane.b32.xlu0 %v4650_v3, %s6936_s30 }
  0x83   : > { %811 = vrot.lane.b32.xlu1 %v4660_v5, %s6936_s30 }
  0x84   : > { %809 = vrot.lane.b32.xlu0 %v4647_v2, %s6936_s30 }
  0x87   : > { %815 = vrot.lane.b32.xlu1 %v4707_v12, %s6936_s30 }
  0x88   : > { %813 = vrot.lane.b32.xlu0 %v4657_v4, %s6936_s30 }
  0x8b   : > { %831 = vrot.lane.b32.xlu1 %v4828_v34, %s6934_s9 }
  0x8c   : > { %829 = vrot.lane.b32.xlu0 %v4818_v31, %s6934_s9 }
  0x8f   : > { %835 = vrot.lane.b32.xlu1 %v4838_v36, %s6934_s9 }
  0x90   : > { %833 = vrot.lane.b32.xlu0 %v4825_v33, %s6934_s9 }
  0x91   : > { %v4867_v38 = vpop.permute.xlu1 %390 }
  0x92   : > { %v4869_v39 = vpop.permute.xlu0 %386 }
  0x93   : > { %839 = vrot.lane.b32.xlu1 %v4865_v37, %s6934_s9 }
  0x94   : > { %837 = vrot.lane.b32.xlu0 %v4835_v35, %s6934_s9 }
  0x95   : > { %v4875_v40 = vpop.permute.xlu1 %392 }
  0x96   : > { %v4877_v41 = vpop.permute.xlu0 %388 }
  0x97   : > { %855 = vrot.lane.b32.xlu1 %v4746_v19, %s6906_s15  ;;  %v550_v37 = vsel %vm548_vm0, %v4670_v7, %v4877_v41 }
  0x98   : > { %853 = vrot.lane.b32.xlu0 %v4749_v20, %s6906_s15 }
  0x99   : > { %v4883_v42 = vpop.permute.xlu1 %396 }
  0x9a   : > { %v4885_v43 = vpop.permute.xlu0 %394 }
  0x9b   : > { %859 = vrot.lane.b32.xlu1 %v4756_v21, %s6906_s15 }
  0x9c   : > { %857 = vrot.lane.b32.xlu0 %v4759_v22, %s6906_s15 }
  0x9d   : > { %v4891_v44 = vpop.permute.xlu1 %412 }
  0x9e   : > { %v4893_v45 = vpop.permute.xlu0 %410  ;;  %v557_v33 = vsel %vm555_vm1, %v550_v37, %v4891_v44  ;;  %v3860_v37 = vld [vmem:[%s4634_s17 + $0x70] sm:$0xff] }
  0x9f   : > { %863 = vrot.lane.b32.xlu1 %v4769_v24, %s6906_s15 }
  0xa0   : > { %861 = vrot.lane.b32.xlu0 %v4772_v25, %s6906_s15  ;;  %s6978_s15 = smov 16  }
  0xa1   : > { %v4903_v48 = vpop.permute.xlu1 %416 }
  0xa2   : > { %v4905_v49 = vpop.permute.xlu0 %414 }
  0xa3   : > { %879 = vrot.lane.b32.xlu1 %v4900_v46, %s6956_s16 }
  0xa4   : > { %877 = vrot.lane.b32.xlu0 %v757_v47, %s6956_s16 }
  0xa5   : > { %v4916_v52 = vpop.permute.xlu1 %420 }
  0xa6   : > { %v4918_v53 = vpop.permute.xlu0 %418 }
  0xa7   : > { %883 = vrot.lane.b32.xlu1 %v4911_v50, %s6956_s16 }
  0xa8   : > { %881 = vrot.lane.b32.xlu0 %v4914_v51, %s6956_s16 }
  0xa9   : > { %v4933_v57 = vpop.permute.xlu1 %436 }
  0xaa   : > { %v4935_v58 = vpop.permute.xlu0 %434 }
  0xab   : > { %887 = vrot.lane.b32.xlu1 %v4928_v55, %s6956_s16 }
  0xac   : > { %885 = vrot.lane.b32.xlu0 %v4931_v56, %s6956_s16 }
  0xad   : > { %v4947_v61 = vpop.permute.xlu1 %440 }
  0xae   : > { %v4949_v62 = vpop.permute.xlu0 %438 }
  0xaf   : > { %903 = vrot.lane.b32.xlu1 %v4759_v22, %s6958_s7 }
  0xb0   : > { %901 = vrot.lane.b32.xlu0 %v4746_v19, %s6958_s7 }
  0xb1   : > { %v4958_v14 = vpop.permute.xlu1 %444 }
  0xb2   : > { %v4960_v20 = vpop.permute.xlu0 %442 }
  0xb3   : > { %907 = vrot.lane.b32.xlu1 %v4772_v25, %s6958_s7 }
  0xb4   : > { %905 = vrot.lane.b32.xlu0 %v4756_v21, %s6958_s7 }
  0xb5   : > { %v461_v23 = vpop.permute.xlu1 %460 }
  0xb6   : > { %v459_v26 = vpop.permute.xlu0 %458 }
  0xb7   : > { %911 = vrot.lane.b32.xlu1 %v4811_v30, %s6958_s7 }
  0xb8   : > { %909 = vrot.lane.b32.xlu0 %v4769_v24, %s6958_s7  ;;  %v564_v24 = vsel %vm562_vm2, %v557_v33, %v4933_v57  ;;  %v551_v33 = vsel %vm548_vm0, %v4667_v6, %v4867_v38 }
  0xb9   : > { %v4970_v27 = vpop.permute.xlu1 %464  ;;  %v571_v41 = vsel %vm569_vm3, %v564_v24, %v461_v23 }
  0xba   : > { %v4972_v28 = vpop.permute.xlu0 %462 }
  0xbb   : > { %927 = vrot.lane.b32.xlu1 %v4914_v51, %s6940_s10  ;;  %v330_v51 = vld [vmem:[%s4634_s17] sm:$0xff] }
  0xbc   : > { %925 = vrot.lane.b32.xlu0 %v4900_v46, %s6940_s10  ;;  %v549_v35 = vsel %vm548_vm0, %v330_v51, %v4869_v39 }
  0xbd   : > { %v4978_v32 = vpop.permute.xlu1 %468  ;;  %v556_v36 = vsel %vm555_vm1, %v549_v35, %v4893_v45  ;;  %v552_v35 = vsel %vm548_vm0, %v4681_v9, %v4875_v40  ;;  %v558_v45 = vsel %vm555_vm1, %v551_v33, %v4905_v49 }
  0xbe   : > { %v4980_v47 = vpop.permute.xlu0 %466  ;;  %v563_v39 = vsel %vm562_vm2, %v556_v36, %v4935_v58  ;;  %v559_v44 = vsel %vm555_vm1, %v552_v35, %v4903_v48  ;;  %v565_v40 = vsel %vm562_vm2, %v558_v45, %v4949_v62 }
  0xbf   : > { %931 = vrot.lane.b32.xlu1 %v4931_v56, %s6940_s10  ;;  %v570_v51 = vsel %vm569_vm3, %v563_v39, %v459_v26  ;;  %v572_v49 = vsel %vm569_vm3, %v565_v40, %v4972_v28  ;;  %v3892_v40 = vld [vmem:[%s6903_s3 + $0x48] sm:$0xff] }
  0xc0   : > { %929 = vrot.lane.b32.xlu0 %v4911_v50, %s6940_s10 }
  0xc1   : > { %v485_v59 = vpop.permute.xlu1 %484 }
  0xc2   : > { %v483_v60 = vpop.permute.xlu0 %482  ;;  %v578_v24 = vsel %vm576_vm4, %v571_v41, %v485_v59 }
  0xc3   : > { %935 = vrot.lane.b32.xlu1 %v4987_v54, %s6940_s10  ;;  %v577_v36 = vsel %vm576_vm4, %v570_v51, %v483_v60 }
  0xc4   : > { %933 = vrot.lane.b32.xlu0 %v4928_v55, %s6940_s10 }
  0xc5   : > { %v489_v63 = vpop.permute.xlu1 %488 }
  0xc6   : > { %v487_v46 = vpop.permute.xlu0 %486 }
  0xc7   : > { %1168 = vrot.lane.b32.xlu1 %v4637_v0, %s6938_s27 }
  0xc8   : > { %1166 = vrot.lane.b32.xlu0 %v4650_v3, %s6938_s27 }
  0xc9   : > { %v4997_v50 = vpop.permute.xlu1 %492 }
  0xca   : > { %v4999_v56 = vpop.permute.xlu0 %490 }
  0xcb   : > { %1172 = vrot.lane.b32.xlu1 %v4660_v5, %s6938_s27 }
  0xcc   : > { %1170 = vrot.lane.b32.xlu0 %v4647_v2, %s6938_s27 }
  0xcd   : > { %v509_v54 = vpop.permute.xlu1 %508 }
  0xce   : > { %v507_v55 = vpop.permute.xlu0 %506  ;;  %v585_v57 = vsel %vm583_vm5, %v578_v24, %v509_v54 }
  0xcf   : > { %1176 = vrot.lane.b32.xlu1 %v4707_v12, %s6938_s27  ;;  %v584_v58 = vsel %vm583_vm5, %v577_v36, %v507_v55  ;;  %v554_v55 = vsel %vm548_vm0, %v4691_v11, %v4883_v42 }
  0xd0   : > { %1174 = vrot.lane.b32.xlu0 %v4657_v4, %s6938_s27  ;;  %v561_v28 = vsel %vm555_vm1, %v554_v55, %v4916_v52 }
  0xd1   : > { %v513_v1 = vpop.permute.xlu1 %512 }
  0xd2   : > { %v511_v3 = vpop.permute.xlu0 %510 }
  0xd3   : > { %1192 = vrot.lane.b32.xlu1 %v4681_v9, %s6936_s30  ;;  %v566_v9 = vsel %vm562_vm2, %v559_v44, %v4947_v61  ;;  %v553_v61 = vsel %vm548_vm0, %v4678_v8, %v4885_v43  ;;  %v568_v43 = vsel %vm562_vm2, %v561_v28, %v4958_v14 }
  0xd4   : > { %1190 = vrot.lane.b32.xlu0 %v4667_v6, %s6936_s30  ;;  %v573_v48 = vsel %vm569_vm3, %v566_v9, %v4970_v27  ;;  %v579_v27 = vsel %vm576_vm4, %v572_v49, %v487_v46  ;;  %v6979_v9 = vld [vmem:[#allocation5_spill] sm:$0xff] }
  0xd5   : > { %v517_v31 = vpop.permute.xlu1 %516  ;;  %v580_v62 = vsel %vm576_vm4, %v573_v48, %v489_v63  ;;  %v3891_v48 = vld [vmem:[%s6903_s3 + $0x40] sm:$0xff] }
  0xd6   : > { %v515_v34 = vpop.permute.xlu0 %514  ;;  %v587_v54 = vsel %vm583_vm5, %v580_v62, %v513_v1 }
  0xd7   : > { %1196 = vrot.lane.b32.xlu1 %v4691_v11, %s6936_s30  ;;  %v586_v11 = vsel %vm583_vm5, %v579_v27, %v511_v3 }
  0xd8   : > { %1194 = vrot.lane.b32.xlu0 %v4678_v8, %s6936_s30 }
  0xd9   : > { %v533_v38 = vpop.permute.xlu1 %532 }
  0xda   : > { %v531_v23 = vpop.permute.xlu0 %530  ;;  %v592_v26 = vsel %vm590_vm6, %v585_v57, %v533_v38  ;;  %v3894_v57 = vld [vmem:[%s6903_s3 + $0x58] sm:$0xff] }
  0xdb   : > { %v591_v59 = vsel %vm590_vm6, %v584_v58, %v531_v23  ;;  %1200 = vrot.lane.b32.xlu1 %v3860_v37, %s6936_s30  ;;  %4296 = vmatprep.subr.mxu0 %v3894_v57  ;;  %v3893_v23 = vld [vmem:[%s6903_s3 + $0x50] sm:$0xff] }
  0xdc   : > { %1198 = vrot.lane.b32.xlu0 %v4688_v10, %s6936_s30  ;;  %4270 = vmatprep.mubr.msk.f32.mxu0 %vm607_vm7, %v591_v59  ;;  %v560_v10 = vsel %vm555_vm1, %v553_v61, %v4918_v53  ;;  %v575_v53 = vsel %vm569_vm3, %v568_v43, %v4978_v32  ;;  %v3884_v61 = vld [vmem:[%s4712_s14 + $0x70] sm:$0xff]  ;;  %s6986_s30 = smov 8  }
  0xdd   : > { %4271 = vmatmul.mubr.msk.f32.vlgmr.msra.gmra.mxu0 %vm607_vm7, %v592_v26  ;;  %v537_v42 = vpop.permute.xlu1 %536  ;;  %v567_v46 = vsel %vm562_vm2, %v560_v10, %v4960_v20  ;;  %v582_v3 = vsel %vm576_vm4, %v575_v53, %v4997_v50  ;;  %v5107_v50 = vld [vmem:[%s4634_s17 + $0x71] sm:$0xff] }
  0xde   : > { %v535_v8 = vpop.permute.xlu0 %534  ;;  %v594_v60 = vsel %vm590_vm6, %v587_v54, %v537_v42  ;;  %v574_v1 = vsel %vm569_vm3, %v567_v46, %v4980_v47  ;;  %v589_v20 = vsel %vm583_vm5, %v582_v3, %v517_v31  ;;  %4297 = vmatpush3.msra.mxu0 %v3894_v57  ;;  %v6980_v42 = vld [vmem:[#allocation8_spill] sm:$0xff]  ;;  %v6984_v3 = vld [vmem:[#allocation11_spill] sm:$0xff] }
  0xdf   : > { %v593_v52 = vsel %vm590_vm6, %v586_v11, %v535_v8  ;;  %1216 = vrot.lane.b32.xlu1 %v4647_v2, %s6934_s9  ;;  %v581_v14 = vsel %vm576_vm4, %v574_v1, %v4999_v56  ;;  %4298 = vmatprep.subr.mxu0 %v3893_v23  ;;  %v6981_v8 = vld [vmem:[#allocation6_spill] sm:$0xff] }
  0xe0   : > { %1214 = vrot.lane.b32.xlu0 %v4637_v0, %s6934_s9  ;;  %4273 = vmatprep.mubr.msk.f32.mxu0 %vm607_vm7, %v593_v52  ;;  %v588_v32 = vsel %vm583_vm5, %v581_v14, %v515_v34  ;;  %v6983_v52 = vld [vmem:[#allocation7_spill] sm:$0xff]  ;;  %v6985_v14 = vld [vmem:[#allocation9_spill] sm:$0xff] }
  0xe1   : > { %4274 = vmatmul.mubr.msk.f32.gmra.mxu0 %vm607_vm7, %v594_v60  ;;  %v541_v47 = vpop.permute.xlu1 %540  ;;  %v6982_v60 = vld [vmem:[#allocation10_spill] sm:$0xff] }
  0xe2   : > { %v539_v63 = vpop.permute.xlu0 %538  ;;  %v596_v39 = vsel %vm590_vm6, %v589_v20, %v541_v47  ;;  %4299 = vmatpush3.msra.mxu0 %v3893_v23  ;;  %v6987_v47 = vld [vmem:[#allocation4_spill] sm:$0xff] }
  0xe3   : > { %v595_v41 = vsel %vm590_vm6, %v588_v32, %v539_v63  ;;  %1220 = vrot.lane.b32.xlu1 %v4657_v4, %s6934_s9  ;;  %4300 = vmatprep.subr.mxu0 %v3892_v40 }
  0xe4   : > { %1218 = vrot.lane.b32.xlu0 %v4660_v5, %s6934_s9  ;;  %4276 = vmatprep.mubr.msk.f32.mxu0 %vm607_vm7, %v595_v41 }
  0xe5   : > { %4277 = vmatmul.mubr.msk.f32.gmra.mxu0 %vm607_vm7, %v596_v39  ;;  %v5110_v31 = vpop.permute.xlu1 %783  ;;  %v6988_v39 = vld [vmem:[#allocation3_spill] sm:$0xff] }
  0xe6   : > { %v5112_v34 = vpop.permute.xlu0 %781  ;;  %4301 = vmatpush3.msra.mxu0 %v3892_v40  ;;  %v944_v63 = vsel %vm548_vm0, %v6987_v47, %v5110_v31 }
  0xe7   : > { %1224 = vrot.lane.b32.xlu1 %v5107_v50, %s6934_s9  ;;  %4302 = vmatprep.subr.mxu0 %v3891_v48  ;;  %v943_v41 = vsel %vm548_vm0, %v6988_v39, %v5112_v34 }
  0xe8   : > { %1222 = vrot.lane.b32.xlu0 %v4707_v12, %s6934_s9  ;;  %4303 = vmatpush3.msra.mxu0 %v3891_v48  ;;  %s6989_s9 = smov 12  }
  0xe9   : > { %v5118_v56 = vpop.permute.xlu1 %787 }
  0xea   : > { %v5120_v51 = vpop.permute.xlu0 %785  ;;  %v946_v34 = vsel %vm548_vm0, %v4647_v2, %v5118_v56 }
  0xeb   : > { %1240 = vrot.lane.b32.xlu1 %v4729_v16, %s6978_s15 }
  0xec   : > { %1238 = vrot.lane.b32.xlu0 %v4719_v13, %s6978_s15 }
  0xed   : > { %v5126_v33 = vpop.permute.xlu1 %791 }
  0xee   : > { %v5128_v35 = vpop.permute.xlu0 %789 }
  0xef   : > { %1244 = vrot.lane.b32.xlu1 %v4739_v18, %s6978_s15 }
  0xf0   : > { %1242 = vrot.lane.b32.xlu0 %v4726_v15, %s6978_s15 }
  0xf1   : > { %v5134_v24 = vpop.permute.xlu1 %807 }
  0xf2   : > { %v5136_v36 = vpop.permute.xlu0 %805  ;;  %v950_v57 = vsel %vm555_vm1, %v944_v63, %v5134_v24  ;;  %v945_v24 = vsel %vm548_vm0, %v4637_v0, %v5120_v51 }
  0xf3   : > { %1248 = vrot.lane.b32.xlu1 %v4796_v29, %s6978_s15  ;;  %v949_v23 = vsel %vm555_vm1, %v943_v41, %v5136_v36 }
  0xf4   : > { %1246 = vrot.lane.b32.xlu0 %v4736_v17, %s6978_s15 }
  0xf5   : > { %v5142_v13 = vpop.permute.xlu1 %811 }
  0xf6   : > { %v5144_v37 = vpop.permute.xlu0 %809 }
  0xf7   : > { %1264 = vrot.lane.b32.xlu1 %v4759_v22, %s6956_s16 }
  0xf8   : > { %1262 = vrot.lane.b32.xlu0 %v4746_v19, %s6956_s16 }
  0xf9   : > { %v5150_v44 = vpop.permute.xlu1 %815 }
  0xfa   : > { %v5152_v45 = vpop.permute.xlu0 %813 }
  0xfb   : > { %1268 = vrot.lane.b32.xlu1 %v4772_v25, %s6956_s16 }
  0xfc   : > { %1266 = vrot.lane.b32.xlu0 %v4756_v21, %s6956_s16 }
  0xfd   : > { %v5161_v58 = vpop.permute.xlu1 %831 }
  0xfe   : > { %v5163_v38 = vpop.permute.xlu0 %829 }
  0xff   : > { %1272 = vrot.lane.b32.xlu1 %v4811_v30, %s6956_s16 }
 0x100   : > { %1270 = vrot.lane.b32.xlu0 %v6979_v9, %s6956_s16 }
 0x101   : > { %v5175_v26 = vpop.permute.xlu1 %835 }
 0x102   : > { %v5177_v59 = vpop.permute.xlu0 %833 }
 0x103   : > { %1288 = vrot.lane.b32.xlu1 %v4726_v15, %s6958_s7 }
 0x104   : > { %1286 = vrot.lane.b32.xlu0 %v4729_v16, %s6958_s7 }
 0x105   : > { %v5186_v49 = vpop.permute.xlu1 %839 }
 0x106   : > { %v5188_v55 = vpop.permute.xlu0 %837 }
 0x107   : > { %1292 = vrot.lane.b32.xlu1 %v4736_v17, %s6958_s7 }
 0x108   : > { %1290 = vrot.lane.b32.xlu0 %v4739_v18, %s6958_s7  ;;  %v5211_v18 = vld [vmem:[%s4712_s14 + $0x71] sm:$0xff] }
 0x109   : > { %v856_v62 = vpop.permute.xlu1 %855 }
 0x10a   : > { %v854_v15 = vpop.permute.xlu0 %853 }
 0x10b   : > { %1296 = vrot.lane.b32.xlu1 %v3884_v61, %s6958_s7  ;;  %v956_v61 = vsel %vm562_vm2, %v950_v57, %v5161_v58 }
 0x10c   : > { %1294 = vrot.lane.b32.xlu0 %v4796_v29, %s6958_s7  ;;  %v962_v31 = vsel %vm569_vm3, %v956_v61, %v856_v62  ;;  %v951_v62 = vsel %vm555_vm1, %v945_v24, %v5144_v37  ;;  %v6992_v61 = vld [vmem:[#allocation16_spill] sm:$0xff]  ;;  %v6994_v24 = vld [vmem:[#allocation17_spill] sm:$0xff] }
 0x10d   : > { %v860_v16 = vpop.permute.xlu1 %859 }
 0x10e   : > { %v858_v27 = vpop.permute.xlu0 %857 }
 0x10f   : > { %1312 = vrot.lane.b32.xlu1 %v4756_v21, %s6940_s10 }
 0x110   : > { %1310 = vrot.lane.b32.xlu0 %v4759_v22, %s6940_s10 }
 0x111   : > { %v5202_v17 = vpop.permute.xlu1 %863 }
 0x112   : > { %v5204_v28 = vpop.permute.xlu0 %861 }
 0x113   : > { %1316 = vrot.lane.b32.xlu1 %v6979_v9, %s6940_s10 }
 0x114   : > { %1314 = vrot.lane.b32.xlu0 %v4772_v25, %s6940_s10 }
 0x115   : > { %v880_v29 = vpop.permute.xlu1 %879 }
 0x116   : > { %v878_v10 = vpop.permute.xlu0 %877  ;;  %v968_v36 = vsel %vm576_vm4, %v962_v31, %v880_v29 }
 0x117   : > { %1320 = vrot.lane.b32.xlu1 %v5211_v18, %s6940_s10 }
 0x118   : > { %1318 = vrot.lane.b32.xlu0 %v4811_v30, %s6940_s10 }
 0x119   : > { %v884_v54 = vpop.permute.xlu1 %883 }
 0x11a   : > { %v882_v11 = vpop.permute.xlu0 %881 }
 0x11b   : > { %1551 = vrot.lane.b32.xlu1 %v6980_v42, %s6938_s27 }
 0x11c   : > { %1549 = vrot.lane.b32.xlu0 %v6981_v8, %s6938_s27  ;;  %v955_v8 = vsel %vm562_vm2, %v949_v23, %v5163_v38  ;;  %v952_v38 = vsel %vm555_vm1, %v946_v34, %v5142_v13  ;;  %v3957_v34 = vld [vmem:[%s6903_s3 + $0x70] sm:$0xff] }
 0x11d   : > { %v5221_v43 = vpop.permute.xlu1 %887  ;;  %v961_v47 = vsel %vm569_vm3, %v955_v8, %v854_v15  ;;  %v958_v56 = vsel %vm562_vm2, %v952_v38, %v5175_v26  ;;  %v948_v26 = vsel %vm548_vm0, %v4657_v4, %v5126_v33  ;;  %v3958_v8 = vld [vmem:[%s6903_s3 + $0x78] sm:$0xff] }
 0x11e   : > { %v5223_v46 = vpop.permute.xlu0 %885  ;;  %v967_v58 = vsel %vm576_vm4, %v961_v47, %v878_v10  ;;  %v964_v13 = vsel %vm569_vm3, %v958_v56, %v860_v16  ;;  %4313 = vmatprep.subr.mxu1 %v3958_v8  ;;  %v5395_v38 = vld [vmem:[%s4712_s14 + $0x31] sm:$0xff]  ;;  %v5415_v56 = vld [vmem:[%s4712_s14 + $0x41] sm:$0xff] }
 0x11f   : > { %1555 = vrot.lane.b32.xlu1 %v6982_v60, %s6938_s27  ;;  %v970_v10 = vsel %vm576_vm4, %v964_v13, %v884_v54 }
 0x120   : > { %1553 = vrot.lane.b32.xlu0 %v6983_v52, %s6938_s27 }
 0x121   : > { %v904_v53 = vpop.permute.xlu1 %903 }
 0x122   : > { %v902_v1 = vpop.permute.xlu0 %901  ;;  %v974_v15 = vsel %vm583_vm5, %v968_v36, %v904_v53  ;;  %v6995_v36 = vld [vmem:[#allocation15_spill] sm:$0xff] }
 0x123   : > { %1559 = vrot.lane.b32.xlu1 %v6984_v3, %s6938_s27  ;;  %v973_v63 = vsel %vm583_vm5, %v967_v58, %v902_v1  ;;  %v3956_v58 = vld [vmem:[%s6903_s3 + $0x68] sm:$0xff] }
 0x124   : > { %1557 = vrot.lane.b32.xlu0 %v6985_v14, %s6938_s27 }
 0x125   : > { %v908_v20 = vpop.permute.xlu1 %907 }
 0x126   : > { %v906_v32 = vpop.permute.xlu0 %905 }
 0x127   : > { %1575 = vrot.lane.b32.xlu1 %v4647_v2, %s6986_s30 }
 0x128   : > { %1573 = vrot.lane.b32.xlu0 %v4637_v0, %s6986_s30  ;;  %v957_v0 = vsel %vm562_vm2, %v951_v62, %v5177_v59  ;;  %v947_v59 = vsel %vm548_vm0, %v4660_v5, %v5128_v35  ;;  %v5398_v62 = vld [vmem:[%s4712_s14 + $0x21] sm:$0xff] }
 0x129   : > { %v912_v40 = vpop.permute.xlu1 %911  ;;  %v963_v37 = vsel %vm569_vm3, %v957_v0, %v858_v27  ;;  %v976_v27 = vsel %vm583_vm5, %v970_v10, %v908_v20 }
 0x12a   : > { %v910_v48 = vpop.permute.xlu0 %909  ;;  %v969_v16 = vsel %vm576_vm4, %v963_v37, %v882_v11 }
 0x12b   : > { %1579 = vrot.lane.b32.xlu1 %v4657_v4, %s6986_s30  ;;  %v975_v4 = vsel %vm583_vm5, %v969_v16, %v906_v32 }
 0x12c   : > { %1577 = vrot.lane.b32.xlu0 %v4660_v5, %s6986_s30 }
 0x12d   : > { %v928_v39 = vpop.permute.xlu1 %927 }
 0x12e   : > { %v926_v2 = vpop.permute.xlu0 %925  ;;  %v980_v51 = vsel %vm590_vm6, %v974_v15, %v928_v39  ;;  %v3955_v39 = vld [vmem:[%s6903_s3 + $0x60] sm:$0xff] }
 0x12f   : > { %v979_v29 = vsel %vm590_vm6, %v973_v63, %v926_v2  ;;  %1583 = vrot.lane.b32.xlu1 %v5107_v50, %s6986_s30  ;;  %v954_v50 = vsel %vm555_vm1, %v948_v26, %v5150_v44  ;;  %v5412_v2 = vld [vmem:[%s4712_s14 + $0x51] sm:$0xff] }
 0x130   : > { %1581 = vrot.lane.b32.xlu0 %v4707_v12, %s6986_s30  ;;  %4287 = vmatprep.mubr.msk.f32.mxu1 %vm607_vm7, %v979_v29  ;;  %v953_v12 = vsel %vm555_vm1, %v947_v59, %v5152_v45  ;;  %v960_v35 = vsel %vm562_vm2, %v954_v50, %v5186_v49  ;;  %v5450_v50 = vld [vmem:[%s4712_s14 + $0x11] sm:$0xff] }
 0x131   : > { %4288 = vmatmul.mubr.msk.f32.vlgmr.msra.gmra.mxu1 %vm607_vm7, %v980_v51  ;;  %v932_v33 = vpop.permute.xlu1 %931  ;;  %v959_v54 = vsel %vm562_vm2, %v953_v12, %v5188_v55  ;;  %v966_v45 = vsel %vm569_vm3, %v960_v35, %v5202_v17  ;;  %v5453_v12 = vld [vmem:[%s4712_s14 + $0x1] sm:$0xff] }
 0x132   : > { %v930_v5 = vpop.permute.xlu0 %929  ;;  %v982_v11 = vsel %vm590_vm6, %v976_v27, %v932_v33  ;;  %v965_v53 = vsel %vm569_vm3, %v959_v54, %v5204_v28  ;;  %v972_v49 = vsel %vm576_vm4, %v966_v45, %v5221_v43  ;;  %v3930_v43 = vld [vmem:[%s4634_s17 + $0x72] sm:$0xff]  ;;  %4314 = vmatpush3.msra.mxu1 %v3958_v8  ;;  %6996 = vst [vmem:[#allocation5_spill] sm:$0xff] %v5453_v12 }
 0x133   : > { %v981_v44 = vsel %vm590_vm6, %v975_v4, %v930_v5  ;;  %1599 = vrot.lane.b32.xlu1 %v6983_v52, %s6989_s9  ;;  %v971_v55 = vsel %vm576_vm4, %v965_v53, %v5223_v46  ;;  %v978_v17 = vsel %vm583_vm5, %v972_v49, %v912_v40  ;;  %v6990_v40 = vld [vmem:[#allocation14_spill] sm:$0xff]  ;;  %4315 = vmatprep.subr.mxu1 %v3957_v34  ;;  %v3975_v8 = vld [vmem:[%s4712_s14 + $0x50] sm:$0xff] }
 0x134   : > { %1597 = vrot.lane.b32.xlu0 %v6980_v42, %s6989_s9  ;;  %4290 = vmatprep.mubr.msk.f32.mxu1 %vm607_vm7, %v981_v44  ;;  %v977_v1 = vsel %vm583_vm5, %v971_v55, %v910_v48  ;;  %v5475_v44 = vld [vmem:[%s4712_s14 + $0x10] sm:$0xff] }
 0x135   : > { %4291 = vmatmul.mubr.msk.f32.gmra.mxu1 %vm607_vm7, %v982_v11  ;;  %v936_v28 = vpop.permute.xlu1 %935  ;;  %v5472_v11 = vld [vmem:[%s4712_s14 + $0x20] sm:$0xff]  ;;  %6997 = vst [vmem:[#allocation8_spill] sm:$0xff] %v5475_v44 }
 0x136   : > { %v934_v20 = vpop.permute.xlu0 %933  ;;  %v984_v52 = vsel %vm590_vm6, %v978_v17, %v936_v28  ;;  %4316 = vmatpush3.msra.mxu1 %v3957_v34  ;;  %v5489_v17 = vld [vmem:[%s4712_s14 + $0x40] sm:$0xff] }
 0x137   : > { %v983_v42 = vsel %vm590_vm6, %v977_v1, %v934_v20  ;;  %1603 = vrot.lane.b32.xlu1 %v6985_v14, %s6989_s9  ;;  %4317 = vmatprep.subr.mxu1 %v3956_v58  ;;  %6998 = vst [vmem:[#allocation6_spill] sm:$0xff] %v5489_v17  ;;  %v5492_v1 = vld [vmem:[%s4712_s14 + $0x30] sm:$0xff] }
 0x138   : > { %1601 = vrot.lane.b32.xlu0 %v6982_v60, %s6989_s9  ;;  %4293 = vmatprep.mubr.msk.f32.mxu1 %vm607_vm7, %v983_v42 }
 0x139   : > { %4294 = vmatmul.mubr.msk.f32.gmra.mxu1 %vm607_vm7, %v984_v52  ;;  %v5330_v46 = vpop.permute.xlu1 %1168 }
 0x13a   : > { %v5332_v32 = vpop.permute.xlu0 %1166  ;;  %4318 = vmatpush3.msra.mxu1 %v3956_v58  ;;  %v1329_v49 = vsel %vm548_vm0, %v4667_v6, %v5330_v46 }
 0x13b   : > { %1607 = vrot.lane.b32.xlu1 %v3930_v43, %s6989_s9  ;;  %4319 = vmatprep.subr.mxu1 %v3955_v39  ;;  %v1328_v55 = vsel %vm548_vm0, %v4670_v7, %v5332_v32  ;;  %v4465_v32 = vld [vmem:[%s4634_s17 + $0x40] sm:$0xff] }
 0x13c   : > { %1605 = vrot.lane.b32.xlu0 %v6984_v3, %s6989_s9  ;;  %4320 = vmatpush3.msra.mxu1 %v3955_v39 }
 0x13d   : > { %v5337_v41 = vpop.permute.xlu1 %1172 }
 0x13e   : > { %v5339_v14 = vpop.permute.xlu0 %1170 }
 0x13f   : > { %1623 = vrot.lane.b32.xlu1 %v4759_v22, %s6978_s15 }
 0x140   : > { %1621 = vrot.lane.b32.xlu0 %v4746_v19, %s6978_s15 }
 0x141   : > { %v5345_v60 = vpop.permute.xlu1 %1176 }
 0x142   : > { %v5347_v57 = vpop.permute.xlu0 %1174 }
 0x143   : > { %1627 = vrot.lane.b32.xlu1 %v4772_v25, %s6978_s15 }
 0x144   : > { %1625 = vrot.lane.b32.xlu0 %v4756_v21, %s6978_s15  ;;  %v6991_v21 = vld [vmem:[#allocation12_spill] sm:$0xff] }
 0x145   : > { %v5353_v3 = vpop.permute.xlu1 %1192 }
 0x146   : > { %v5355_v23 = vpop.permute.xlu0 %1190  ;;  %v1335_v28 = vsel %vm555_vm1, %v1329_v49, %v5353_v3  ;;  %v1331_v3 = vsel %vm548_vm0, %v4465_v32, %v5337_v41  ;;  %v5623_v32 = vld [vmem:[%s5602_s6 + $0x20] sm:$0xff] }
 0x147   : > { %1631 = vrot.lane.b32.xlu1 %v4811_v30, %s6978_s15  ;;  %v1334_v6 = vsel %vm555_vm1, %v1328_v55, %v5355_v23  ;;  %v4466_v23 = vld [vmem:[%s4634_s17 + $0x30] sm:$0xff]  ;;  %7000 = vst [vmem:[#allocation10_spill] sm:$0xff] %v5623_v32 }
 0x148   : > { %1629 = vrot.lane.b32.xlu0 %v6979_v9, %s6978_s15  ;;  %v6993_v9 = vld [vmem:[#allocation13_spill] sm:$0xff] }
 0x149   : > { %v5361_v19 = vpop.permute.xlu1 %1196 }
 0x14a   : > { %v5363_v22 = vpop.permute.xlu0 %1194  ;;  %v1337_v34 = vsel %vm555_vm1, %v1331_v3, %v5361_v19 }
 0x14b   : > { %1647 = vrot.lane.b32.xlu1 %v6990_v40, %s6956_s16 }
 0x14c   : > { %1645 = vrot.lane.b32.xlu0 %v6991_v21, %s6956_s16 }
 0x14d   : > { %v5369_v25 = vpop.permute.xlu1 %1200 }
 0x14e   : > { %v5371_v48 = vpop.permute.xlu0 %1198 }
 0x14f   : > { %1651 = vrot.lane.b32.xlu1 %v6992_v61, %s6956_s16 }
 0x150   : > { %1649 = vrot.lane.b32.xlu0 %v6993_v9, %s6956_s16 }
 0x151   : > { %v5380_v31 = vpop.permute.xlu1 %1216 }
 0x152   : > { %v5382_v47 = vpop.permute.xlu0 %1214  ;;  %v1341_v52 = vsel %vm562_vm2, %v1335_v28, %v5380_v31  ;;  %v3848_v31 = vld [vmem:[%s4634_s17 + $0x60] sm:$0xff] }
 0x153   : > { %1655 = vrot.lane.b32.xlu1 %v6994_v24, %s6956_s16  ;;  %v1340_v42 = vsel %vm562_vm2, %v1334_v6, %v5382_v47  ;;  %v3847_v47 = vld [vmem:[%s4634_s17 + $0x50] sm:$0xff] }
 0x154   : > { %1653 = vrot.lane.b32.xlu0 %v6995_v36, %s6956_s16 }
 0x155   : > { %v5400_v15 = vpop.permute.xlu1 %1220 }
 0x156   : > { %v5402_v63 = vpop.permute.xlu0 %1218  ;;  %v1343_v39 = vsel %vm562_vm2, %v1337_v34, %v5400_v15  ;;  %v1333_v15 = vsel %vm548_vm0, %v3848_v31, %v5345_v60  ;;  %v5654_v31 = vld [vmem:[%s5602_s6 + $0x11] sm:$0xff] }
 0x157   : > { %1671 = vrot.lane.b32.xlu1 %v5395_v38, %s6958_s7 }
 0x158   : > { %1669 = vrot.lane.b32.xlu0 %v5398_v62, %s6958_s7 }
 0x159   : > { %v5417_v0 = vpop.permute.xlu1 %1224 }
 0x15a   : > { %v5419_v51 = vpop.permute.xlu0 %1222 }
 0x15b   : > { %1675 = vrot.lane.b32.xlu1 %v5412_v2, %s6958_s7 }
 0x15c   : > { %1673 = vrot.lane.b32.xlu0 %v5415_v56, %s6958_s7 }
 0x15d   : > { %v1241_v29 = vpop.permute.xlu1 %1240 }
 0x15e   : > { %v1239_v13 = vpop.permute.xlu0 %1238  ;;  %v1347_v43 = vsel %vm569_vm3, %v1341_v52, %v1241_v29  ;;  %v1902_v52 = vld [vmem:[%s5602_s6] sm:$0xff] }
 0x15f   : > { %1679 = vrot.lane.b32.xlu1 %v5211_v18, %s6958_s7  ;;  %v1346_v46 = vsel %vm569_vm3, %v1340_v42, %v1239_v13 }
 0x160   : > { %1677 = vrot.lane.b32.xlu0 %v4811_v30, %s6958_s7  ;;  %v3954_v30 = vld [vmem:[%s4712_s14 + $0x72] sm:$0xff] }
 0x161   : > { %v5429_v37 = vpop.permute.xlu1 %1244 }
 0x162   : > { %v5431_v26 = vpop.permute.xlu0 %1242 }
 0x163   : > { %1695 = vrot.lane.b32.xlu1 %v6993_v9, %s6940_s10  ;;  %v3976_v9 = vld [vmem:[%s4712_s14 + $0x60] sm:$0xff] }
 0x164   : > { %1693 = vrot.lane.b32.xlu0 %v6990_v40, %s6940_s10  ;;  %v1330_v40 = vsel %vm548_vm0, %v4466_v23, %v5339_v14 }
 0x165   : > { %v5437_v59 = vpop.permute.xlu1 %1248  ;;  %v1336_v41 = vsel %vm555_vm1, %v1330_v40, %v5363_v22  ;;  %v1349_v22 = vsel %vm569_vm3, %v1343_v39, %v5429_v37  ;;  %v1339_v37 = vsel %vm555_vm1, %v1333_v15, %v5369_v25  ;;  %v5635_v40 = vld [vmem:[%s5602_s6 + $0x50] sm:$0xff]  ;;  %v2268_v39 = vld [vmem:[%s4712_s14 + $0x2] sm:$0xff] }
 0x166   : > { %v5439_v10 = vpop.permute.xlu0 %1246  ;;  %v1342_v29 = vsel %vm562_vm2, %v1336_v41, %v5402_v63  ;;  %v1332_v63 = vsel %vm548_vm0, %v3847_v47, %v5347_v57  ;;  %v1908_v47 = vld [vmem:[%s5602_s6 + $0x1] sm:$0xff] }
 0x167   : > { %1699 = vrot.lane.b32.xlu1 %v6995_v36, %s6940_s10 }
 0x168   : > { %1697 = vrot.lane.b32.xlu0 %v6992_v61, %s6940_s10 }
 0x169   : > { %v1265_v18 = vpop.permute.xlu1 %1264 }
 0x16a   : > { %v1263_v16 = vpop.permute.xlu0 %1262  ;;  %v1353_v21 = vsel %vm576_vm4, %v1347_v43, %v1265_v18 }
 0x16b   : > { %1703 = vrot.lane.b32.xlu1 %v3954_v30, %s6940_s10  ;;  %v1352_v61 = vsel %vm576_vm4, %v1346_v46, %v1263_v16  ;;  %v1348_v30 = vsel %vm569_vm3, %v1342_v29, %v5431_v26  ;;  %v1338_v26 = vsel %vm555_vm1, %v1332_v63, %v5371_v48  ;;  %v5620_v46 = vld [vmem:[%s5602_s6 + $0x30] sm:$0xff]  ;;  %v5672_v29 = vld [vmem:[%s5602_s6 + $0x21] sm:$0xff] }
 0x16c   : > { %1701 = vrot.lane.b32.xlu0 %v6994_v24, %s6940_s10 }
 0x16d   : > { %v1269_v27 = vpop.permute.xlu1 %1268 }
 0x16e   : > { %v1267_v4 = vpop.permute.xlu0 %1266  ;;  %v1355_v18 = vsel %vm576_vm4, %v1349_v22, %v1269_v27 }
 0x16f   : > { %1935 = vrot.lane.b32.xlu1 %v5450_v50, %s6938_s27  ;;  %v1354_v16 = vsel %vm576_vm4, %v1348_v30, %v1267_v4  ;;  %v1345_v4 = vsel %vm562_vm2, %v1339_v37, %v5417_v0 }
 0x170   : > { %1933 = vrot.lane.b32.xlu0 %v5453_v12, %s6938_s27  ;;  %v1351_v48 = vsel %vm569_vm3, %v1345_v4, %v5437_v59 }
 0x171   : > { %v5459_v33 = vpop.permute.xlu1 %1272 }
 0x172   : > { %v5461_v5 = vpop.permute.xlu0 %1270  ;;  %v1357_v0 = vsel %vm576_vm4, %v1351_v48, %v5459_v33  ;;  %v5592_v33 = vld [vmem:[%s4712_s14 + $0x61] sm:$0xff] }
 0x173   : > { %1939 = vrot.lane.b32.xlu1 %v5395_v38, %s6938_s27 }
 0x174   : > { %1937 = vrot.lane.b32.xlu0 %v5398_v62, %s6938_s27 }
 0x175   : > { %v1289_v35 = vpop.permute.xlu1 %1288 }
 0x176   : > { %v1287_v54 = vpop.permute.xlu0 %1286  ;;  %v1359_v24 = vsel %vm583_vm5, %v1353_v21, %v1289_v35  ;;  %v5638_v21 = vld [vmem:[%s5602_s6 + $0x40] sm:$0xff] }
 0x177   : > { %1943 = vrot.lane.b32.xlu1 %v5412_v2, %s6938_s27  ;;  %v1358_v14 = vsel %vm583_vm5, %v1352_v61, %v1287_v54  ;;  %v1344_v54 = vsel %vm562_vm2, %v1338_v26, %v5419_v51 }
 0x178   : > { %1941 = vrot.lane.b32.xlu0 %v5415_v56, %s6938_s27 }
 0x179   : > { %v1293_v45 = vpop.permute.xlu1 %1292 }
 0x17a   : > { %v1291_v53 = vpop.permute.xlu0 %1290  ;;  %v1361_v35 = vsel %vm583_vm5, %v1355_v18, %v1293_v45  ;;  %v1350_v45 = vsel %vm569_vm3, %v1344_v54, %v5439_v10  ;;  %v5688_v18 = vld [vmem:[%s4712_s14 + $0x12] sm:$0xff]  ;;  %v5715_v54 = vld [vmem:[%s4712_s14 + $0x22] sm:$0xff] }
 0x17b   : > { %1959 = vrot.lane.b32.xlu1 %v5472_v11, %s6986_s30  ;;  %v1360_v60 = vsel %vm583_vm5, %v1354_v16, %v1291_v53  ;;  %v1356_v51 = vsel %vm576_vm4, %v1350_v45, %v5461_v5 }
 0x17c   : > { %1957 = vrot.lane.b32.xlu0 %v5475_v44, %s6986_s30 }
 0x17d   : > { %v1297_v20 = vpop.permute.xlu1 %1296 }
 0x17e   : > { %v1295_v7 = vpop.permute.xlu0 %1294  ;;  %v1363_v59 = vsel %vm583_vm5, %v1357_v0, %v1297_v20  ;;  %v2292_v0 = vld [vmem:[%s5602_s6 + $0x2] sm:$0xff] }
 0x17f   : > { %1963 = vrot.lane.b32.xlu1 %v5489_v17, %s6986_s30  ;;  %v1362_v10 = vsel %vm583_vm5, %v1356_v51, %v1295_v7  ;;  %v5609_v7 = vld [vmem:[%s5602_s6 + $0x10] sm:$0xff] }
 0x180   : > { %1961 = vrot.lane.b32.xlu0 %v5492_v1, %s6986_s30 }
 0x181   : > { %v1313_v36 = vpop.permute.xlu1 %1312 }
 0x182   : > { %v1311_v58 = vpop.permute.xlu0 %1310  ;;  %v1365_v13 = vsel %vm590_vm6, %v1359_v24, %v1313_v36 }
 0x183   : > { %v1364_v19 = vsel %vm590_vm6, %v1358_v14, %v1311_v58  ;;  %1967 = vrot.lane.b32.xlu1 %v3976_v9, %s6986_s30 }
 0x184   : > { %1965 = vrot.lane.b32.xlu0 %v3975_v8, %s6986_s30  ;;  %4304 = vmatprep.mubr.msk.f32.mxu0 %vm607_vm7, %v1364_v19  ;;  %v5651_v8 = vld [vmem:[%s6904_s4] ss:$0 sm:$0xff] }
 0x185   : > { %4305 = vmatmul.mubr.msk.f32.vlgmr.msra.gmra.mxu0 %vm607_vm7, %v1365_v13  ;;  %v1317_v57 = vpop.permute.xlu1 %1316 }
 0x186   : > { %v1315_v27 = vpop.permute.xlu0 %1314  ;;  %v1367_v49 = vsel %vm590_vm6, %v1361_v35, %v1317_v57 }
 0x187   : > { %v1366_v25 = vsel %vm590_vm6, %v1360_v60, %v1315_v27  ;;  %1983 = vrot.lane.b32.xlu1 %v5398_v62, %s6989_s9 }
 0x188   : > { %1981 = vrot.lane.b32.xlu0 %v5450_v50, %s6989_s9  ;;  %4307 = vmatprep.mubr.msk.f32.mxu0 %vm607_vm7, %v1366_v25 }
 0x189   : > { %4308 = vmatmul.mubr.msk.f32.gmra.mxu0 %vm607_vm7, %v1367_v49  ;;  %v1321_v53 = vpop.permute.xlu1 %1320 }
 0x18a   : > { %v1319_v55 = vpop.permute.xlu0 %1318  ;;  %v1369_v28 = vsel %vm590_vm6, %v1363_v59, %v1321_v53 }
 0x18b   : > { %v1368_v6 = vsel %vm590_vm6, %v1362_v10, %v1319_v55  ;;  %1987 = vrot.lane.b32.xlu1 %v5415_v56, %s6989_s9  ;;  %v5741_v10 = vld [vmem:[%s4712_s14 + $0x32] sm:$0xff] }
 0x18c   : > { %1985 = vrot.lane.b32.xlu0 %v5395_v38, %s6989_s9  ;;  %4310 = vmatprep.mubr.msk.f32.mxu0 %vm607_vm7, %v1368_v6  ;;  %v5755_v6 = vld [vmem:[%s5602_s6 + $0x12] sm:$0xff] }
 0x18d   : > { %4311 = vmatmul.mubr.msk.f32.gmra.mxu0 %vm607_vm7, %v1369_v28  ;;  %v5595_v5 = vpop.permute.xlu1 %1551  ;;  %v3998_v28 = vld [vmem:[%s6903_s3 + $0x98] sm:$0xff]  ;;  %7001 = vst [vmem:[#allocation7_spill] sm:$0xff] %v5755_v6 }
 0x18e   : > { %v5597_v20 = vpop.permute.xlu0 %1549  ;;  %4330 = vmatprep.subr.mxu0 %v3998_v28 }
 0x18f   : > { %1991 = vrot.lane.b32.xlu1 %v5592_v33, %s6989_s9  ;;  %4331 = vmatpush3.msra.mxu0 %v3998_v28 }
 0x190   : > { %1989 = vrot.lane.b32.xlu0 %v5412_v2, %s6989_s9 }
 0x191   : > { %v5612_v42 = vpop.permute.xlu1 %1555 }
 0x192   : > { %v5614_v43 = vpop.permute.xlu0 %1553 }
 0x193   : > { %2007 = vrot.lane.b32.xlu1 %v5609_v7, %s6978_s15 }
 0x194   : > { %2005 = vrot.lane.b32.xlu0 %v1902_v52, %s6978_s15 }
 0x195   : > { %v5625_v3 = vpop.permute.xlu1 %1559 }
 0x196   : > { %v5627_v23 = vpop.permute.xlu0 %1557 }
 0x197   : > { %2011 = vrot.lane.b32.xlu1 %v5620_v46, %s6978_s15 }
 0x198   : > { %2009 = vrot.lane.b32.xlu0 %v5623_v32, %s6978_s15 }
 0x199   : > { %v5640_v61 = vpop.permute.xlu1 %1575 }
 0x19a   : > { %v5642_v9 = vpop.permute.xlu0 %1573 }
 0x19b   : > { %2015 = vrot.lane.b32.xlu1 %v5635_v40, %s6978_s15 }
 0x19c   : > { %2013 = vrot.lane.b32.xlu0 %v5638_v21, %s6978_s15 }
 0x19d   : > { %v4272_v34 = vpop.f32.mrf.mxu0  ;;  %v5657_v41 = vpop.permute.xlu1 %1579 }
 0x19e   : > { %v698_v24 = vadd.f32 %v4272_v34, %v5651_v8  ;;  %v5660_v14 = vpop.permute.xlu0 %1577 }
 0x19f   : > { %v692_v36 = vpop.f32.mrf.mxu0  ;;  %2031 = vrot.lane.b32.xlu1 %v5654_v31, %s6956_s16 }
 0x1a0   : > { %2029 = vrot.lane.b32.xlu0 %v1908_v47, %s6956_s16  ;;  %722 = vst.msk [vmem:[%s5665_s28 + $0x8] sm:$0xff] %vm548_vm0, %v698_v24  ;;  %v693_v58 = vadd.f32 %v5651_v8, %v692_v36  ;;  %v5767_v24 = vld [vmem:[%s6903_s3 + $0xb8] sm:$0xff]  ;;  %v3996_v36 = vld [vmem:[%s6903_s3 + $0x88] sm:$0xff] }
 0x1a1   : > { %v4275_v13 = vpop.f32.mrf.mxu0  ;;  %v5674_v19 = vpop.permute.xlu1 %1583  ;;  %4347 = vmatprep.subr.mxu1 %v5767_v24 }
 0x1a2   : > { %721 = vst.msk [vmem:[%s5665_s28] sm:$0xff] %vm548_vm0, %v693_v58  ;;  %v708_v22 = vadd.f32 %v4275_v13, %v5651_v8  ;;  %v5679_v30 = vpop.permute.xlu0 %1581 }
 0x1a3   : > { %v702_v15 = vpop.f32.mrf.mxu0  ;;  %2316 = vrot.lane.b32.xlu1 %v2268_v39, %s6938_s27  ;;  %v3995_v39 = vld [vmem:[%s6903_s3 + $0x80] sm:$0xff] }
 0x1a4   : > { %2033 = vrot.lane.b32.xlu0 %v5672_v29, %s6956_s16  ;;  %724 = vst.msk [vmem:[%s5665_s28 + $0x18] sm:$0xff] %vm548_vm0, %v708_v22  ;;  %v703_v63 = vadd.f32 %v5651_v8, %v702_v15 }
 0x1a5   : > { %v4278_v16 = vpop.f32.mrf.mxu0  ;;  %v5690_v37 = vpop.permute.xlu1 %1599 }
 0x1a6   : > { %723 = vst.msk [vmem:[%s5665_s28 + $0x10] sm:$0xff] %vm548_vm0, %v703_v63  ;;  %v718_v26 = vadd.f32 %v4278_v16, %v5651_v8  ;;  %v5695_v35 = vpop.permute.xlu0 %1597 }
 0x1a7   : > { %v712_v60 = vpop.f32.mrf.mxu0  ;;  %2340 = vrot.lane.b32.xlu1 %v5450_v50, %s6986_s30 }
 0x1a8   : > { %2318 = vrot.lane.b32.xlu0 %v5688_v18, %s6938_s27  ;;  %726 = vst.msk [vmem:[%s5665_s28 + $0x28] sm:$0xff] %vm548_vm0, %v718_v26  ;;  %v713_v57 = vadd.f32 %v5651_v8, %v712_v60  ;;  %v5795_v26 = vld [vmem:[%s4712_s14 + $0x42] sm:$0xff] }
 0x1a9   : > { %v5704_v27 = vpop.permute.xlu1 %1603  ;;  %v3908_v60 = vld [vmem:[%s4634_s17 + $0x21] sm:$0xff] }
 0x1aa   : > { %725 = vst.msk [vmem:[%s5665_s28 + $0x20] sm:$0xff] %vm548_vm0, %v713_v57  ;;  %v5708_v4 = vpop.permute.xlu0 %1601 }
 0x1ab   : > { %2364 = vrot.lane.b32.xlu1 %v5688_v18, %s6989_s9 }
 0x1ac   : > { %2342 = vrot.lane.b32.xlu0 %v5398_v62, %s6986_s30 }
 0x1ad   : > { %v5717_v49 = vpop.permute.xlu1 %1607 }
 0x1ae   : > { %v5719_v25 = vpop.permute.xlu0 %1605 }
 0x1af   : > { %2388 = vrot.lane.b32.xlu1 %v1908_v47, %s6978_s15  ;;  %v3997_v47 = vld [vmem:[%s6903_s3 + $0x90] sm:$0xff] }
 0x1b0   : > { %2366 = vrot.lane.b32.xlu0 %v5715_v54, %s6989_s9  ;;  %4332 = vmatprep.subr.mxu0 %v3997_v47 }
 0x1b1   : > { %v5724_v48 = vpop.permute.xlu1 %1623  ;;  %4333 = vmatpush3.msra.mxu0 %v3997_v47  ;;  %v5806_v47 = vld [vmem:[%s5602_s6 + $0x22] sm:$0xff] }
 0x1b2   : > { %v5726_v45 = vpop.permute.xlu0 %1621  ;;  %4334 = vmatprep.subr.mxu0 %v3996_v36 }
 0x1b3   : > { %2390 = vrot.lane.b32.xlu1 %v5654_v31, %s6978_s15  ;;  %4335 = vmatpush3.msra.mxu0 %v3996_v36 }
 0x1b4   : > { %2320 = vrot.lane.b32.xlu0 %v5715_v54, %s6938_s27  ;;  %4336 = vmatprep.subr.mxu0 %v3995_v39 }
 0x1b5   : > { %v5733_v51 = vpop.permute.xlu1 %1627  ;;  %4337 = vmatpush3.msra.mxu0 %v3995_v39  ;;  %v3910_v39 = vld [vmem:[%s4634_s17 + $0x41] sm:$0xff] }
 0x1b6   : > { %v5735_v59 = vpop.permute.xlu0 %1625 }
 0x1b7   : > { %2053 = vrot.lane.b32.xlu1 %v5609_v7, %s6958_s7 }
 0x1b8   : > { %2412 = vrot.lane.b32.xlu0 %v2292_v0, %s6956_s16  ;;  %v3907_v0 = vld [vmem:[%s4634_s17 + $0x11] sm:$0xff] }
 0x1b9   : > { %v5743_v53 = vpop.permute.xlu1 %1631  ;;  %v1711_v36 = vsel %vm548_vm0, %v3907_v0, %v5597_v20 }
 0x1ba   : > { %v5745_v55 = vpop.permute.xlu0 %1629  ;;  %v1717_v12 = vsel %vm555_vm1, %v1711_v36, %v5642_v9 }
 0x1bb   : > { %2344 = vrot.lane.b32.xlu1 %v5395_v38, %s6986_s30 }
 0x1bc   : > { %2322 = vrot.lane.b32.xlu0 %v5741_v10, %s6938_s27  ;;  %s7002_s27 = smov 28  }
 0x1bd   : > { %v1648_v52 = vpop.permute.xlu1 %1647 }
 0x1be   : > { %v1646_v34 = vpop.permute.xlu0 %1645 }
 0x1bf   : > { %2436 = vrot.lane.b32.xlu1 %v5654_v31, %s6958_s7 }
 0x1c0   : > { %2414 = vrot.lane.b32.xlu0 %v5755_v6, %s6956_s16 }
 0x1c1   : > { %v1652_v58 = vpop.permute.xlu1 %1651 }
 0x1c2   : > { %v5776_v13 = vpop.permute.xlu0 %1649 }
 0x1c3   : > { %2077 = vrot.lane.b32.xlu1 %v5654_v31, %s7002_s27 }
 0x1c4   : > { %2055 = vrot.lane.b32.xlu0 %v5623_v32, %s6958_s7 }
 0x1c5   : > { %v5782_v22 = vpop.permute.xlu1 %1655 }
 0x1c6   : > { %v5784_v15 = vpop.permute.xlu0 %1653 }
 0x1c7   : > { %2368 = vrot.lane.b32.xlu1 %v5741_v10, %s6989_s9 }
 0x1c8   : > { %2346 = vrot.lane.b32.xlu0 %v5415_v56, %s6986_s30  ;;  %v1712_v56 = vsel %vm548_vm0, %v3908_v60, %v5595_v5  ;;  %v1723_v60 = vsel %vm562_vm2, %v1717_v12, %v5695_v35 }
 0x1c9   : > { %v1672_v63 = vpop.permute.xlu1 %1671  ;;  %v1718_v17 = vsel %vm555_vm1, %v1712_v56, %v5640_v61  ;;  %v1714_v61 = vsel %vm548_vm0, %v3910_v39, %v5612_v42  ;;  %v3911_v42 = vld [vmem:[%s4634_s17 + $0x51] sm:$0xff] }
 0x1ca   : > { %v1670_v16 = vpop.permute.xlu0 %1669  ;;  %v1724_v32 = vsel %vm562_vm2, %v1718_v17, %v5690_v37  ;;  %v1729_v17 = vsel %vm569_vm3, %v1723_v60, %v5726_v45  ;;  %v5832_v37 = vld [vmem:[%s5602_s6 + $0x31] sm:$0xff]  ;;  %v1720_v35 = vsel %vm555_vm1, %v1714_v61, %v5657_v41 }
 0x1cb   : > { %2460 = vrot.lane.b32.xlu1 %v5755_v6, %s7002_s27  ;;  %v3909_v6 = vld [vmem:[%s4634_s17 + $0x31] sm:$0xff]  ;;  %v1730_v20 = vsel %vm569_vm3, %v1724_v32, %v5724_v48  ;;  %v3912_v32 = vld [vmem:[%s4634_s17 + $0x61] sm:$0xff]  ;;  %v1735_v48 = vsel %vm576_vm4, %v1729_v17, %v1646_v34  ;;  %s7003_s17 = smov 4  }
 0x1cc   : > { %2438 = vrot.lane.b32.xlu0 %v5672_v29, %s6958_s7  ;;  %v1736_v9 = vsel %vm576_vm4, %v1730_v20, %v1648_v52  ;;  %v1713_v12 = vsel %vm548_vm0, %v3909_v6, %v5614_v43  ;;  %v1726_v52 = vsel %vm562_vm2, %v1720_v35, %v5704_v27  ;;  %v1741_v36 = vsel %vm583_vm5, %v1735_v48, %v1670_v16 }
 0x1cd   : > { %v1676_v57 = vpop.permute.xlu1 %1675  ;;  %v1742_v0 = vsel %vm583_vm5, %v1736_v9, %v1672_v63  ;;  %v1719_v45 = vsel %vm555_vm1, %v1713_v12, %v5660_v14  ;;  %v1732_v34 = vsel %vm569_vm3, %v1726_v52, %v5733_v51  ;;  %v1716_v14 = vsel %vm548_vm0, %v3912_v32, %v5625_v3 }
 0x1ce   : > { %v1674_v28 = vpop.permute.xlu0 %1673  ;;  %v1725_v41 = vsel %vm562_vm2, %v1719_v45, %v5708_v4  ;;  %v1738_v16 = vsel %vm576_vm4, %v1732_v34, %v1652_v58  ;;  %v1715_v4 = vsel %vm548_vm0, %v3911_v42, %v5627_v23  ;;  %v1722_v51 = vsel %vm555_vm1, %v1716_v14, %v5674_v19  ;;  %v5968_v34 = vld [vmem:[%s4712_s14 + $0x62] sm:$0xff] }
 0x1cf   : > { %2370 = vrot.lane.b32.xlu1 %v5795_v26, %s6989_s9  ;;  %v1731_v27 = vsel %vm569_vm3, %v1725_v41, %v5735_v59  ;;  %v1744_v60 = vsel %vm583_vm5, %v1738_v16, %v1676_v57  ;;  %v4037_v59 = vld [vmem:[%s6903_s3 + $0xb0] sm:$0xff]  ;;  %v1721_v58 = vsel %vm555_vm1, %v1715_v4, %v5679_v30  ;;  %v1728_v23 = vsel %vm562_vm2, %v1722_v51, %v5717_v49 }
 0x1d0   : > { %2079 = vrot.lane.b32.xlu0 %v5672_v29, %s7002_s27  ;;  %v1737_v39 = vsel %vm576_vm4, %v1731_v27, %v5776_v13  ;;  %v1727_v57 = vsel %vm562_vm2, %v1721_v58, %v5719_v25  ;;  %v1734_v61 = vsel %vm569_vm3, %v1728_v23, %v5743_v53  ;;  %v5896_v25 = vld [vmem:[%s4712_s14 + $0x52] sm:$0xff] }
 0x1d1   : > { %v1680_v44 = vpop.permute.xlu1 %1679  ;;  %v1743_v19 = vsel %vm583_vm5, %v1737_v39, %v1674_v28  ;;  %v1733_v30 = vsel %vm569_vm3, %v1727_v57, %v5745_v55  ;;  %v1740_v49 = vsel %vm576_vm4, %v1734_v61, %v5782_v22  ;;  %v4036_v55 = vld [vmem:[%s6903_s3 + $0xa8] sm:$0xff] }
 0x1d2   : > { %v1678_v5 = vpop.permute.xlu0 %1677  ;;  %v1739_v53 = vsel %vm576_vm4, %v1733_v30, %v5784_v15  ;;  %v5985_v39 = vld [vmem:[%s5602_s6 + $0x42] sm:$0xff] }
 0x1d3   : > { %2462 = vrot.lane.b32.xlu1 %v5806_v47, %s7002_s27  ;;  %v1745_v22 = vsel %vm583_vm5, %v1739_v53, %v1678_v5  ;;  %v4035_v5 = vld [vmem:[%s6903_s3 + $0xa0] sm:$0xff]  ;;  %v6029_v53 = vld [vmem:[%s5602_s6 + $0x52] sm:$0xff] }
 0x1d4   : > { %2392 = vrot.lane.b32.xlu0 %v5672_v29, %s6978_s15  ;;  %7005 = vst [vmem:[#allocation9_spill] sm:$0xff] %v6029_v53 }
 0x1d5   : > { %v1696_v56 = vpop.permute.xlu1 %1695 }
 0x1d6   : > { %v1748_v43 = vsel %vm590_vm6, %v1742_v0, %v1696_v56  ;;  %v1694_v6 = vpop.permute.xlu0 %1693 }
 0x1d7   : > { %v1747_v63 = vsel %vm590_vm6, %v1741_v36, %v1694_v6  ;;  %2394 = vrot.lane.b32.xlu1 %v5832_v37, %s6978_s15 }
 0x1d8   : > { %2324 = vrot.lane.b32.xlu0 %v5795_v26, %s7003_s17  ;;  %4321 = vmatprep.mubr.msk.f32.mxu1 %vm607_vm7, %v1747_v63 }
 0x1d9   : > { %4322 = vmatmul.mubr.msk.f32.vlgmr.msra.gmra.mxu1 %vm607_vm7, %v1748_v43  ;;  %v1700_v3 = vpop.permute.xlu1 %1699 }
 0x1da   : > { %v1750_v13 = vsel %vm590_vm6, %v1744_v60, %v1700_v3  ;;  %v1698_v20 = vpop.permute.xlu0 %1697  ;;  %4348 = vmatpush3.msra.mxu1 %v5767_v24  ;;  %v1746_v24 = vsel %vm583_vm5, %v1740_v49, %v1680_v44  ;;  %v5914_v44 = vld [vmem:[%s5602_s6 + $0x32] sm:$0xff] }
 0x1db   : > { %v1749_v17 = vsel %vm590_vm6, %v1743_v19, %v1698_v20  ;;  %2035 = vrot.lane.b32.xlu1 %v5832_v37, %s6956_s16  ;;  %4349 = vmatprep.subr.mxu1 %v4037_v59 }
 0x1dc   : > { %2416 = vrot.lane.b32.xlu0 %v5806_v47, %s6956_s16  ;;  %4324 = vmatprep.mubr.msk.f32.mxu1 %vm607_vm7, %v1749_v17 }
 0x1dd   : > { %4325 = vmatmul.mubr.msk.f32.gmra.mxu1 %vm607_vm7, %v1750_v13  ;;  %v1704_v28 = vpop.permute.xlu1 %1703  ;;  %v6002_v13 = vld [vmem:[%s5602_s6 + $0x51] sm:$0xff] }
 0x1de   : > { %v1752_v9 = vsel %vm590_vm6, %v1746_v24, %v1704_v28  ;;  %v1702_v12 = vpop.permute.xlu0 %1701  ;;  %4350 = vmatpush3.msra.mxu1 %v4037_v59 }
 0x1df   : > { %v1751_v32 = vsel %vm590_vm6, %v1745_v22, %v1702_v12  ;;  %2326 = vrot.lane.b32.xlu1 %v5896_v25, %s7003_s17  ;;  %4351 = vmatprep.subr.mxu1 %v4036_v55 }
 0x1e0   : > { %2057 = vrot.lane.b32.xlu0 %v5620_v46, %s6958_s7  ;;  %4327 = vmatprep.mubr.msk.f32.mxu1 %vm607_vm7, %v1751_v32 }
 0x1e1   : > { %4328 = vmatmul.mubr.msk.f32.gmra.mxu1 %vm607_vm7, %v1752_v9  ;;  %v5917_v15 = vpop.permute.xlu1 %1935  ;;  %v6054_v9 = vld [vmem:[%s5602_s6 + $0x60] sm:$0xff] }
 0x1e2   : > { %v5922_v35 = vpop.permute.xlu0 %1933  ;;  %4352 = vmatpush3.msra.mxu1 %v4036_v55  ;;  %7007 = vst [vmem:[#allocation3_spill] sm:$0xff] %v6054_v9 }
 0x1e3   : > { %2418 = vrot.lane.b32.xlu1 %v5914_v44, %s6956_s16  ;;  %4353 = vmatprep.subr.mxu1 %v4035_v5 }
 0x1e4   : > { %2348 = vrot.lane.b32.xlu0 %v5412_v2, %s6986_s30  ;;  %4354 = vmatpush3.msra.mxu1 %v4035_v5  ;;  %v5945_v2 = vld [vmem:[%s5602_s6 + $0x41] sm:$0xff] }
 0x1e5   : > { %v5928_v48 = vpop.permute.xlu1 %1939  ;;  %v6063_v5 = vld [vmem:[%s5602_s6 + $0x61] sm:$0xff] }
 0x1e6   : > { %v5930_v0 = vpop.permute.xlu0 %1937  ;;  %7008 = vst [vmem:[#allocation14_spill] sm:$0xff] %v6063_v5 }
 0x1e7   : > { %2059 = vrot.lane.b32.xlu1 %v5638_v21, %s6958_s7 }
 0x1e8   : > { %2440 = vrot.lane.b32.xlu0 %v5832_v37, %s6958_s7 }
 0x1e9   : > { %v5936_v56 = vpop.permute.xlu1 %1943 }
 0x1ea   : > { %v5938_v42 = vpop.permute.xlu0 %1941 }
 0x1eb   : > { %2350 = vrot.lane.b32.xlu1 %v5592_v33, %s6986_s30 }
 0x1ec   : > { %2081 = vrot.lane.b32.xlu0 %v5832_v37, %s7002_s27 }
 0x1ed   : > { %v5947_v45 = vpop.permute.xlu1 %1959 }
 0x1ee   : > { %v5949_v21 = vpop.permute.xlu0 %1957 }
 0x1ef   : > { %2442 = vrot.lane.b32.xlu1 %v5945_v2, %s6958_s7 }
 0x1f0   : > { %2372 = vrot.lane.b32.xlu0 %v5896_v25, %s6989_s9 }
 0x1f1   : > { %v4289_v52 = vpop.f32.mrf.mxu1  ;;  %v5955_v36 = vpop.permute.xlu1 %1963 }
 0x1f2   : > { %v1080_v33 = vadd.f32 %v4289_v52, %v5651_v8  ;;  %v5958_v43 = vpop.permute.xlu0 %1961 }
 0x1f3   : > { %v1074_v6 = vpop.f32.mrf.mxu1  ;;  %2083 = vrot.lane.b32.xlu1 %v5945_v2, %s7002_s27 }
 0x1f4   : > { %2464 = vrot.lane.b32.xlu0 %v5914_v44, %s7002_s27  ;;  %3838 = vst.msk [vmem:[%s5665_s28 + $0x38] sm:$0xff] %vm548_vm0, %v1080_v33  ;;  %v1075_v41 = vadd.f32 %v5651_v8, %v1074_v6 }
 0x1f5   : > { %v4292_v63 = vpop.f32.mrf.mxu1  ;;  %v5970_v14 = vpop.permute.xlu1 %1967 }
 0x1f6   : > { %3837 = vst.msk [vmem:[%s5665_s28 + $0x30] sm:$0xff] %vm548_vm0, %v1075_v41  ;;  %v1090_v27 = vadd.f32 %v4292_v63, %v5651_v8  ;;  %v5975_v16 = vpop.permute.xlu0 %1965 }
 0x1f7   : > { %v1084_v4 = vpop.f32.mrf.mxu1  ;;  %2396 = vrot.lane.b32.xlu1 %v5945_v2, %s6978_s15 }
 0x1f8   : > { %2374 = vrot.lane.b32.xlu0 %v5968_v34, %s6989_s9  ;;  %3840 = vst.msk [vmem:[%s5665_s28 + $0x48] sm:$0xff] %vm548_vm0, %v1090_v27  ;;  %v1085_v51 = vadd.f32 %v5651_v8, %v1084_v4  ;;  %v6080_v4 = vld [vmem:[%s5602_s6 + $0x62] sm:$0xff] }
 0x1f9   : > { %v4295_v60 = vpop.f32.mrf.mxu1  ;;  %v5987_v3 = vpop.permute.xlu1 %1983  ;;  %7009 = vst [vmem:[#allocation12_spill] sm:$0xff] %v6080_v4 }
 0x1fa   : > { %3839 = vst.msk [vmem:[%s5665_s28 + $0x40] sm:$0xff] %vm548_vm0, %v1085_v51  ;;  %v1100_v59 = vadd.f32 %v4295_v60, %v5651_v8  ;;  %v5992_v58 = vpop.permute.xlu0 %1981 }
 0x1fb   : > { %v1094_v23 = vpop.f32.mrf.mxu1  ;;  %2037 = vrot.lane.b32.xlu1 %v5945_v2, %s6956_s16 }
 0x1fc   : > { %2466 = vrot.lane.b32.xlu0 %v5985_v39, %s7002_s27  ;;  %3842 = vst.msk [vmem:[%s5665_s28 + $0x58] sm:$0xff] %vm548_vm0, %v1100_v59  ;;  %v1095_v19 = vadd.f32 %v5651_v8, %v1094_v23 }
 0x1fd   : > { %v6004_v20 = vpop.permute.xlu1 %1987 }
 0x1fe   : > { %3841 = vst.msk [vmem:[%s5665_s28 + $0x50] sm:$0xff] %vm548_vm0, %v1095_v19  ;;  %v6008_v57 = vpop.permute.xlu0 %1985 }
 0x1ff   : > { %2420 = vrot.lane.b32.xlu1 %v5985_v39, %s6956_s16 }
 0x200   : > { %2398 = vrot.lane.b32.xlu0 %v6002_v13, %s6978_s15 }
 0x201   : > { %v6014_v61 = vpop.permute.xlu1 %1991 }
 0x202   : > { %7004 = vst [vmem:[#allocation11_spill] sm:$0xff] %v6014_v61  ;;  %v6016_v17 = vpop.permute.xlu0 %1989 }
 0x203   : > { %3083 = vrot.lane.b32.xlu1 %v5688_v18, %s7003_s17 }
 0x204   : > { %2700 = vrot.lane.b32.xlu0 %v5450_v50, %s7003_s17 }
 0x205   : > { %v6022_v30 = vpop.permute.xlu1 %2007 }
 0x206   : > { %v2006_v49 = vpop.permute.xlu0 %2005 }
 0x207   : > { %2061 = vrot.lane.b32.xlu1 %v5635_v40, %s6958_s7 }
 0x208   : > { %2039 = vrot.lane.b32.xlu0 %v6002_v13, %s6956_s16 }
 0x209   : > { %v6031_v24 = vpop.permute.xlu1 %2011 }
 0x20a   : > { %v6033_v28 = vpop.permute.xlu0 %2009 }
 0x20b   : > { %2444 = vrot.lane.b32.xlu1 %v6002_v13, %s6958_s7 }
 0x20c   : > { %2422 = vrot.lane.b32.xlu0 %v6029_v53, %s6956_s16 }
 0x20d   : > { %v6039_v18 = vpop.permute.xlu1 %2015 }
 0x20e   : > { %7006 = vst [vmem:[#allocation4_spill] sm:$0xff] %v6039_v18  ;;  %v6041_v55 = vpop.permute.xlu0 %2013  ;;  %v7010_v18 = vld [vmem:[#allocation10_spill] sm:$0xff] }
 0x20f   : > { %2724 = vrot.lane.b32.xlu1 %v5472_v11, %s6986_s30 }
 0x210   : > { %2702 = vrot.lane.b32.xlu0 %v5398_v62, %s7003_s17 }
 0x211   : > { %v6047_v40 = vpop.permute.xlu1 %2031 }
 0x212   : > { %v2030_v22 = vpop.permute.xlu0 %2029 }
 0x213   : > { %3107 = vrot.lane.b32.xlu1 %v5398_v62, %s6986_s30 }
 0x214   : > { %3085 = vrot.lane.b32.xlu0 %v5715_v54, %s7003_s17 }
 0x215   : > { %v2317_v12 = vpop.permute.xlu1 %2316 }
 0x216   : > { %v6056_v32 = vpop.permute.xlu0 %2033 }
 0x217   : > { %2085 = vrot.lane.b32.xlu1 %v6002_v13, %s7002_s27 }
 0x218   : > { %2063 = vrot.lane.b32.xlu0 %v6054_v9, %s6958_s7 }
 0x219   : > { %v2341_v52 = vpop.permute.xlu1 %2340 }
 0x21a   : > { %v6065_v33 = vpop.permute.xlu0 %2318 }
 0x21b   : > { %2468 = vrot.lane.b32.xlu1 %v6029_v53, %s7002_s27 }
 0x21c   : > { %2446 = vrot.lane.b32.xlu0 %v6063_v5, %s6958_s7 }
 0x21d   : > { %v2365_v6 = vpop.permute.xlu1 %2364 }
 0x21e   : > { %v2343_v41 = vpop.permute.xlu0 %2342 }
 0x21f   : > { %2748 = vrot.lane.b32.xlu1 %v5398_v62, %s6989_s9  ;;  %v6089_v62 = vld [vmem:[%s4712_s14 + $0x31] sm:$0xff] }
 0x220   : > { %2726 = vrot.lane.b32.xlu0 %v5492_v1, %s6986_s30 }
 0x221   : > { %v2389_v63 = vpop.permute.xlu1 %2388 }
 0x222   : > { %v2367_v27 = vpop.permute.xlu0 %2366 }
 0x223   : > { %3131 = vrot.lane.b32.xlu1 %v5715_v54, %s6989_s9 }
 0x224   : > { %3109 = vrot.lane.b32.xlu0 %v5395_v38, %s6986_s30  ;;  %v1878_v38 = vld [vmem:[%s4712_s14] sm:$0xff] }
 0x225   : > { %v2391_v51 = vpop.permute.xlu1 %2390  ;;  %v2095_v19 = vsel %vm548_vm0, %v1878_v38, %v5922_v35 }
 0x226   : > { %v6082_v60 = vpop.permute.xlu0 %2320 }
 0x227   : > { %2470 = vrot.lane.b32.xlu1 %v6080_v4, %s7002_s27 }
 0x228   : > { %2087 = vrot.lane.b32.xlu0 %v6063_v5, %s7002_s27 }
 0x229   : > { %v2054_v1 = vpop.permute.xlu1 %2053 }
 0x22a   : > { %v2413_v59 = vpop.permute.xlu0 %2412 }
 0x22b   : > { %2772 = vrot.lane.b32.xlu1 %v5609_v7, %s6978_s15  ;;  %v2101_v7 = vsel %vm555_vm1, %v2095_v19, %v5949_v21 }
 0x22c   : > { %2750 = vrot.lane.b32.xlu0 %v6089_v62, %s6989_s9  ;;  %v2107_v5 = vsel %vm562_vm2, %v2101_v7, %v5992_v58  ;;  %v7011_v58 = vld [vmem:[#allocation5_spill] sm:$0xff] }
 0x22d   : > { %v6096_v54 = vpop.permute.xlu1 %2344  ;;  %v2113_v53 = vsel %vm569_vm3, %v2107_v5, %v2006_v49  ;;  %v2478_v49 = vsel %vm548_vm0, %v7011_v58, %v2317_v12  ;;  %v6138_v12 = vld [vmem:[%s4712_s14 + $0x41] sm:$0xff] }
 0x22e   : > { %v6098_v23 = vpop.permute.xlu0 %2322  ;;  %v2119_v61 = vsel %vm576_vm4, %v2113_v53, %v2030_v22  ;;  %v2484_v53 = vsel %vm555_vm1, %v2478_v49, %v2341_v52  ;;  %v7013_v52 = vld [vmem:[#allocation8_spill] sm:$0xff] }
 0x22f   : > { %3155 = vrot.lane.b32.xlu1 %v5654_v31, %s6978_s15  ;;  %v2125_v35 = vsel %vm583_vm5, %v2119_v61, %v2054_v1  ;;  %v2490_v61 = vsel %vm562_vm2, %v2484_v53, %v2365_v6  ;;  %v2096_v7 = vsel %vm548_vm0, %v7013_v52, %v5917_v15 }
 0x230   : > { %3133 = vrot.lane.b32.xlu0 %v5741_v10, %s6989_s9  ;;  %v2496_v1 = vsel %vm569_vm3, %v2490_v61, %v2389_v63  ;;  %v2102_v63 = vsel %vm555_vm1, %v2096_v7, %v5947_v45 }
 0x231   : > { %v2437_v4 = vpop.permute.xlu1 %2436  ;;  %v2108_v58 = vsel %vm562_vm2, %v2102_v63, %v5987_v3 }
 0x232   : > { %v2415_v9 = vpop.permute.xlu0 %2414  ;;  %v2114_v15 = vsel %vm569_vm3, %v2108_v58, %v6022_v30 }
 0x233   : > { %2774 = vrot.lane.b32.xlu1 %v7010_v18, %s6978_s15  ;;  %v2120_v45 = vsel %vm576_vm4, %v2114_v15, %v6047_v40 }
 0x234   : > { %2704 = vrot.lane.b32.xlu0 %v6089_v62, %s7003_s17 }
 0x235   : > { %v2078_v38 = vpop.permute.xlu1 %2077 }
 0x236   : > { %v2131_v21 = vsel %vm590_vm6, %v2125_v35, %v2078_v38  ;;  %v2056_v19 = vpop.permute.xlu0 %2055 }
 0x237   : > { %3087 = vrot.lane.b32.xlu1 %v5741_v10, %s7003_s17  ;;  %4338 = vmatprep.mubr.msk.f32.mxu0 %vm607_vm7, %v2131_v21  ;;  %v7012_v10 = vld [vmem:[#allocation7_spill] sm:$0xff]  ;;  %v2126_v61 = vsel %vm583_vm5, %v2120_v45, %v2056_v19  ;;  %v4102_v45 = vld [vmem:[%s6903_s3 + $0xd8] sm:$0xff] }
 0x238   : > { %2796 = vrot.lane.b32.xlu0 %v5654_v31, %s6956_s16  ;;  %v2502_v31 = vsel %vm576_vm4, %v2496_v1, %v2413_v59  ;;  %v7014_v59 = vld [vmem:[#allocation6_spill] sm:$0xff]  ;;  %4364 = vmatprep.subr.mxu0 %v4102_v45 }
 0x239   : > { %v6126_v22 = vpop.permute.xlu1 %2368  ;;  %v2508_v6 = vsel %vm583_vm5, %v2502_v31, %v2437_v4  ;;  %v2479_v4 = vsel %vm548_vm0, %v5450_v50, %v6065_v33 }
 0x23a   : > { %v6129_v5 = vpop.permute.xlu0 %2346  ;;  %v2485_v3 = vsel %vm555_vm1, %v2479_v4, %v2343_v41 }
 0x23b   : > { %3179 = vrot.lane.b32.xlu1 %v7012_v10, %s6956_s16  ;;  %v2491_v53 = vsel %vm562_vm2, %v2485_v3, %v2367_v27 }
 0x23c   : > { %3157 = vrot.lane.b32.xlu0 %v5672_v29, %s6978_s15  ;;  %v2497_v30 = vsel %vm569_vm3, %v2491_v53, %v2391_v51 }
 0x23d   : > { %v2461_v35 = vpop.permute.xlu1 %2460  ;;  %v2503_v50 = vsel %vm576_vm4, %v2497_v30, %v2415_v9  ;;  %v4166_v30 = vld [vmem:[%s6903_s3 + $0xf8] sm:$0xff] }
 0x23e   : > { %v2514_v38 = vsel %vm590_vm6, %v2508_v6, %v2461_v35  ;;  %v2439_v21 = vpop.permute.xlu0 %2438  ;;  %4381 = vmatprep.subr.mxu1 %v4166_v30 }
 0x23f   : > { %2728 = vrot.lane.b32.xlu1 %v7014_v59, %s6986_s30  ;;  %4355 = vmatprep.mubr.msk.f32.mxu1 %vm607_vm7, %v2514_v38  ;;  %v2509_v40 = vsel %vm583_vm5, %v2503_v50, %v2439_v21  ;;  %v6202_v38 = vld [vmem:[%s4712_s14 + $0x50] sm:$0xff] }
 0x240   : > { %2706 = vrot.lane.b32.xlu0 %v6138_v12, %s7003_s17  ;;  %v6247_v50 = vld [vmem:[%s4712_s14 + $0x51] sm:$0xff] }
 0x241   : > { %v6162_v49 = vpop.permute.xlu1 %2370 }
 0x242   : > { %v2080_v1 = vpop.permute.xlu0 %2079 }
 0x243   : > { %v2132_v10 = vsel %vm590_vm6, %v2126_v61, %v2080_v1  ;;  %2820 = vrot.lane.b32.xlu1 %v7010_v18, %s6958_s7  ;;  %v4101_v61 = vld [vmem:[%s6903_s3 + $0xd0] sm:$0xff] }
 0x244   : > { %2798 = vrot.lane.b32.xlu0 %v5672_v29, %s6956_s16  ;;  %4339 = vmatmul.mubr.msk.f32.vlgmr.msra.gmra.mxu0 %vm607_vm7, %v2132_v10 }
 0x245   : > { %v4306_v33 = vpop.f32.mrf.mxu0  ;;  %v2463_v41 = vpop.permute.xlu1 %2462  ;;  %4365 = vmatpush3.msra.mxu0 %v4102_v45 }
 0x246   : > { %v1465_v27 = vadd.f32 %v4306_v33, %v5651_v8  ;;  %v2515_v51 = vsel %vm590_vm6, %v2509_v40, %v2463_v41  ;;  %v6177_v19 = vpop.permute.xlu0 %2392  ;;  %4366 = vmatprep.subr.mxu0 %v4101_v61  ;;  %v4164_v33 = vld [vmem:[%s6903_s3 + $0xe8] sm:$0xff]  ;;  %v2097_v41 = vsel %vm548_vm0, %v5472_v11, %v5930_v0  ;;  %v4077_v0 = vld [vmem:[%s5602_s6 + $0x30] sm:$0xff] }
 0x247   : > { %v1459_v18 = vpop.f32.mrf.mxu0  ;;  %3111 = vrot.lane.b32.xlu1 %v6138_v12, %s6986_s30  ;;  %4356 = vmatmul.mubr.msk.f32.vlgmr.msra.gmra.mxu1 %vm607_vm7, %v2515_v51  ;;  %v2103_v51 = vsel %vm555_vm1, %v2097_v41, %v5958_v43 }
 0x248   : > { %3089 = vrot.lane.b32.xlu0 %v5795_v26, %s7003_s17  ;;  %3902 = vst.msk [vmem:[%s5665_s28 + $0x68] sm:$0xff] %vm548_vm0, %v1465_v27  ;;  %v1460_v9 = vadd.f32 %v5651_v8, %v1459_v18  ;;  %4367 = vmatpush3.msra.mxu0 %v4101_v61 }
 0x249   : > { %v4309_v31 = vpop.f32.mrf.mxu0  ;;  %v6187_v52 = vpop.permute.xlu1 %2394  ;;  %4382 = vmatpush3.msra.mxu1 %v4166_v30 }
 0x24a   : > { %3901 = vst.msk [vmem:[%s5665_s28 + $0x60] sm:$0xff] %vm548_vm0, %v1460_v9  ;;  %v1475_v7 = vadd.f32 %v4309_v31, %v5651_v8  ;;  %v6192_v6 = vpop.permute.xlu0 %2324  ;;  %v2109_v9 = vsel %vm562_vm2, %v2103_v51, %v6008_v57 }
 0x24b   : > { %v1469_v35 = vpop.f32.mrf.mxu0  ;;  %3203 = vrot.lane.b32.xlu1 %v5672_v29, %s6958_s7  ;;  %v2115_v11 = vsel %vm569_vm3, %v2109_v9, %v6033_v28 }
 0x24c   : > { %3181 = vrot.lane.b32.xlu0 %v5806_v47, %s6956_s16  ;;  %3904 = vst.msk [vmem:[%s5665_s28 + $0x78] sm:$0xff] %vm548_vm0, %v1475_v7  ;;  %v1470_v63 = vadd.f32 %v5651_v8, %v1469_v35  ;;  %v2121_v43 = vsel %vm576_vm4, %v2115_v11, %v6056_v32  ;;  %v4467_v35 = vld [vmem:[%s4712_s14 + $0x30] sm:$0xff] }
 0x24d   : > { %v4312_v21 = vpop.f32.mrf.mxu0  ;;  %v6204_v58 = vpop.permute.xlu1 %2035  ;;  %v2098_v28 = vsel %vm548_vm0, %v4467_v35, %v5928_v48 }
 0x24e   : > { %3903 = vst.msk [vmem:[%s5665_s28 + $0x70] sm:$0xff] %vm548_vm0, %v1470_v63  ;;  %v1485_v59 = vadd.f32 %v4312_v21, %v5651_v8  ;;  %v6209_v15 = vpop.permute.xlu0 %2416  ;;  %v2104_v32 = vsel %vm555_vm1, %v2098_v28, %v5955_v36  ;;  %v4468_v63 = vld [vmem:[%s4712_s14 + $0x21] sm:$0xff]  ;;  %v4068_v28 = vld [vmem:[%s4712_s14 + $0x70] sm:$0xff] }
 0x24f   : > { %v1479_v4 = vpop.f32.mrf.mxu0  ;;  %2752 = vrot.lane.b32.xlu1 %v6138_v12, %s6989_s9  ;;  %v2480_v21 = vsel %vm548_vm0, %v4468_v63, %v6082_v60 }
 0x250   : > { %2730 = vrot.lane.b32.xlu0 %v6202_v38, %s6986_s30  ;;  %3906 = vst.msk [vmem:[%s5665_s28 + $0x88] sm:$0xff] %vm548_vm0, %v1485_v59  ;;  %v1480_v3 = vadd.f32 %v5651_v8, %v1479_v4  ;;  %v4100_v8 = vld [vmem:[%s6903_s3 + $0xc8] sm:$0xff]  ;;  %v2110_v4 = vsel %vm562_vm2, %v2104_v32, %v6004_v20  ;;  %v2486_v45 = vsel %vm555_vm1, %v2480_v21, %v6096_v54 }
 0x251   : > { %v6221_v53 = vpop.permute.xlu1 %2326  ;;  %4368 = vmatprep.subr.mxu0 %v4100_v8  ;;  %v2116_v48 = vsel %vm569_vm3, %v2110_v4, %v6031_v24  ;;  %v2492_v61 = vsel %vm562_vm2, %v2486_v45, %v6126_v22 }
 0x252   : > { %3905 = vst.msk [vmem:[%s5665_s28 + $0x80] sm:$0xff] %vm548_vm0, %v1480_v3  ;;  %v2058_v1 = vpop.permute.xlu0 %2057  ;;  %4369 = vmatpush3.msra.mxu0 %v4100_v8  ;;  %v2498_v36 = vsel %vm569_vm3, %v2492_v61, %v6177_v19  ;;  %v2122_v20 = vsel %vm576_vm4, %v2116_v48, %v6204_v58  ;;  %v4078_v19 = vld [vmem:[%s5602_s6 + $0x40] sm:$0xff]  ;;  %v2481_v58 = vsel %vm548_vm0, %v6089_v62, %v6098_v23 }
 0x253   : > { %2844 = vrot.lane.b32.xlu1 %v5672_v29, %s7002_s27  ;;  %v4165_v29 = vld [vmem:[%s6903_s3 + $0xf0] sm:$0xff]  ;;  %v2127_v57 = vsel %vm583_vm5, %v2121_v43, %v2058_v1  ;;  %v2504_v60 = vsel %vm576_vm4, %v2498_v36, %v6209_v15 }
 0x254   : > { %2822 = vrot.lane.b32.xlu0 %v5620_v46, %s6958_s7  ;;  %v4099_v46 = vld [vmem:[%s6903_s3 + $0xc0] sm:$0xff]  ;;  %4383 = vmatprep.subr.mxu1 %v4165_v29 }
 0x255   : > { %v6238_v10 = vpop.permute.xlu1 %2418  ;;  %4370 = vmatprep.subr.mxu0 %v4099_v46  ;;  %4384 = vmatpush3.msra.mxu1 %v4165_v29  ;;  %v2487_v29 = vsel %vm555_vm1, %v2481_v58, %v6129_v5 }
 0x256   : > { %v6249_v40 = vpop.permute.xlu0 %2348  ;;  %4371 = vmatpush3.msra.mxu0 %v4099_v46  ;;  %4385 = vmatprep.subr.mxu1 %v4164_v33 }
 0x257   : > { %3135 = vrot.lane.b32.xlu1 %v5795_v26, %s6989_s9  ;;  %v4163_v26 = vld [vmem:[%s6903_s3 + $0xe0] sm:$0xff]  ;;  %4386 = vmatpush3.msra.mxu1 %v4164_v33  ;;  %v2493_v33 = vsel %vm562_vm2, %v2487_v29, %v6162_v49 }
 0x258   : > { %3113 = vrot.lane.b32.xlu0 %v6247_v50, %s6986_s30  ;;  %4387 = vmatprep.subr.mxu1 %v4163_v26  ;;  %v2499_v41 = vsel %vm569_vm3, %v2493_v33, %v6187_v52  ;;  %v6354_v52 = vld [vmem:[%s4712_s14 + $0x60] sm:$0xff] }
 0x259   : > { %v2060_v27 = vpop.permute.xlu1 %2059  ;;  %4388 = vmatpush3.msra.mxu1 %v4163_v26  ;;  %v2505_v23 = vsel %vm576_vm4, %v2499_v41, %v6238_v10  ;;  %v6357_v10 = vld [vmem:[%s4712_s14 + $0x61] sm:$0xff] }
 0x25a   : > { %v2441_v18 = vpop.permute.xlu0 %2440  ;;  %v2128_v24 = vsel %vm583_vm5, %v2122_v20, %v2060_v27 }
 0x25b   : > { %3227 = vrot.lane.b32.xlu1 %v5806_v47, %s7002_s27  ;;  %v2510_v22 = vsel %vm583_vm5, %v2504_v60, %v2441_v18 }
 0x25c   : > { %3205 = vrot.lane.b32.xlu0 %v5832_v37, %s7015_s12 }
 0x25d   : > { %v6277_v31 = vpop.permute.xlu1 %2350 }
 0x25e   : > { %v2082_v7 = vpop.permute.xlu0 %2081 }
 0x25f   : > { %v2133_v47 = vsel %vm590_vm6, %v2127_v57, %v2082_v7  ;;  %2776 = vrot.lane.b32.xlu1 %v4077_v0, %s6978_s15  ;;  %v4115_v57 = vld [vmem:[%s4712_s14 + $0x11] sm:$0xff] }
 0x260   : > { %2754 = vrot.lane.b32.xlu0 %v6247_v50, %s6989_s9  ;;  %4341 = vmatprep.mubr.msk.f32.mxu0 %vm607_vm7, %v2133_v47  ;;  %v4469_v47 = vld [vmem:[%s4712_s14 + $0x40] sm:$0xff] }
 0x261   : > { %v2443_v59 = vpop.permute.xlu1 %2442  ;;  %v2099_v35 = vsel %vm548_vm0, %v4469_v47, %v5938_v42  ;;  %v2482_v42 = vsel %vm548_vm0, %v6138_v12, %v6192_v6 }
 0x262   : > { %v6297_v3 = vpop.permute.xlu0 %2372  ;;  %v2511_v5 = vsel %vm583_vm5, %v2505_v23, %v2443_v59  ;;  %v2105_v32 = vsel %vm555_vm1, %v2099_v35, %v5975_v16  ;;  %v2488_v61 = vsel %vm555_vm1, %v2482_v42, %v6249_v40  ;;  %v4132_v40 = vld [vmem:[%s4712_s14 + $0x71] sm:$0xff]  ;;  %v7017_v23 = vld [vmem:[#allocation11_spill] sm:$0xff] }
 0x263   : > { %3137 = vrot.lane.b32.xlu1 %v5896_v25, %s6989_s9  ;;  %v2111_v59 = vsel %vm562_vm2, %v2105_v32, %v6016_v17  ;;  %v4090_v17 = vld [vmem:[%s5602_s6 + $0x50] sm:$0xff] }
 0x264   : > { %2846 = vrot.lane.b32.xlu0 %v5832_v37, %s7002_s27  ;;  %v2117_v48 = vsel %vm569_vm3, %v2111_v59, %v6041_v55  ;;  %v2494_v55 = vsel %vm562_vm2, %v2488_v61, %v6297_v3  ;;  %v7019_v59 = vld [vmem:[#allocation9_spill] sm:$0xff] }
 0x265   : > { %v2084_v54 = vpop.permute.xlu1 %2083 }
 0x266   : > { %v2134_v1 = vsel %vm590_vm6, %v2128_v24, %v2084_v54  ;;  %v2465_v8 = vpop.permute.xlu0 %2464 }
 0x267   : > { %v2516_v30 = vsel %vm590_vm6, %v2510_v22, %v2465_v8  ;;  %3229 = vrot.lane.b32.xlu1 %v5914_v44, %s7002_s27  ;;  %4342 = vmatmul.mubr.msk.f32.gmra.mxu0 %vm607_vm7, %v2134_v1 }
 0x268   : > { %3159 = vrot.lane.b32.xlu0 %v5832_v37, %s6978_s15  ;;  %4358 = vmatprep.mubr.msk.f32.mxu1 %vm607_vm7, %v2516_v30 }
 0x269   : > { %v2397_v15 = vpop.permute.xlu1 %2396 }
 0x26a   : > { %v6329_v46 = vpop.permute.xlu0 %2374  ;;  %v2500_v54 = vsel %vm569_vm3, %v2494_v55, %v2397_v15 }
 0x26b   : > { %2778 = vrot.lane.b32.xlu1 %v4078_v19, %s6978_s15 }
 0x26c   : > { %2708 = vrot.lane.b32.xlu0 %v6247_v50, %s7003_s17 }
 0x26d   : > { %v2038_v27 = vpop.permute.xlu1 %2037 }
 0x26e   : > { %v2467_v26 = vpop.permute.xlu0 %2466  ;;  %v2123_v16 = vsel %vm576_vm4, %v2117_v48, %v2038_v27 }
 0x26f   : > { %v2517_v51 = vsel %vm590_vm6, %v2511_v5, %v2467_v26  ;;  %3091 = vrot.lane.b32.xlu1 %v5896_v25, %s7003_s17  ;;  %v4138_v5 = vld [vmem:[%s4712_s14 + $0x72] sm:$0xff] }
 0x270   : > { %2800 = vrot.lane.b32.xlu0 %v5832_v37, %s7016_s11  ;;  %4359 = vmatmul.mubr.msk.f32.gmra.mxu1 %vm607_vm7, %v2517_v51 }
 0x271   : > { %v2421_v49 = vpop.permute.xlu1 %2420 }
 0x272   : > { %v6347_v18 = vpop.permute.xlu0 %2398  ;;  %v2506_v6 = vsel %vm576_vm4, %v2500_v54, %v2421_v49  ;;  %v7021_v54 = vld [vmem:[#allocation14_spill] sm:$0xff] }
 0x273   : > { %3183 = vrot.lane.b32.xlu1 %v5914_v44, %s7016_s11 }
 0x274   : > { %3161 = vrot.lane.b32.xlu0 %v5945_v2, %s6978_s15 }
 0x275   : > { %v3084_v25 = vpop.permute.xlu1 %3083 }
 0x276   : > { %v6359_v9 = vpop.permute.xlu0 %2700  ;;  %v3245_v63 = vsel %vm548_vm0, %v4115_v57, %v3084_v25  ;;  %v6467_v25 = vld [vmem:[%s6904_s4] ss:$0 sm:$0xff] }
 0x277   : > { %2732 = vrot.lane.b32.xlu1 %v6354_v52, %s6986_s30 }
 0x278   : > { %2710 = vrot.lane.b32.xlu0 %v6357_v10, %s7003_s17 }
 0x279   : > { %v2062_v37 = vpop.permute.xlu1 %2061 }
 0x27a   : > { %v6365_v44 = vpop.permute.xlu0 %2039  ;;  %v2129_v36 = vsel %vm583_vm5, %v2123_v16, %v2062_v37 }
 0x27b   : > { %2824 = vrot.lane.b32.xlu1 %v4078_v19, %s7015_s12  ;;  %v2483_v19 = vsel %vm548_vm0, %v6247_v50, %v6221_v53 }
 0x27c   : > { %2802 = vrot.lane.b32.xlu0 %v5945_v2, %s7016_s11  ;;  %v2489_v15 = vsel %vm555_vm1, %v2483_v19, %v6277_v31 }
 0x27d   : > { %v2445_v11 = vpop.permute.xlu1 %2444  ;;  %v2495_v33 = vsel %vm562_vm2, %v2489_v15, %v6329_v46 }
 0x27e   : > { %v2423_v0 = vpop.permute.xlu0 %2422  ;;  %v2512_v22 = vsel %vm583_vm5, %v2506_v6, %v2445_v11  ;;  %v2501_v27 = vsel %vm569_vm3, %v2495_v33, %v6347_v18 }
 0x27f   : > { %3115 = vrot.lane.b32.xlu1 %v6357_v10, %s6986_s30 }
 0x280   : > { %3093 = vrot.lane.b32.xlu0 %v5968_v34, %s7003_s17 }
 0x281   : > { %v6374_v43 = vpop.permute.xlu1 %2724 }
 0x282   : > { %v6377_v7 = vpop.permute.xlu0 %2702 }
 0x283   : > { %3207 = vrot.lane.b32.xlu1 %v5945_v2, %s7015_s12 }
 0x284   : > { %3185 = vrot.lane.b32.xlu0 %v5985_v39, %s7016_s11 }
 0x285   : > { %v3108_v21 = vpop.permute.xlu1 %3107 }
 0x286   : > { %v6393_v4 = vsel %vm555_vm1, %v3245_v63, %v3108_v21  ;;  %v6395_v45 = vpop.permute.xlu0 %3085 }
 0x287   : > { %2756 = vrot.lane.b32.xlu1 %v6357_v10, %s6989_s9 }
 0x288   : > { %2734 = vrot.lane.b32.xlu0 %v4068_v28, %s6986_s30 }
 0x289   : > { %v2086_v20 = vpop.permute.xlu1 %2085 }
 0x28a   : > { %v2135_v60 = vsel %vm590_vm6, %v2129_v36, %v2086_v20  ;;  %v2064_v24 = vpop.permute.xlu0 %2063  ;;  %v7020_v20 = vld [vmem:[#allocation3_spill] sm:$0xff] }
 0x28b   : > { %2848 = vrot.lane.b32.xlu1 %v5945_v2, %s7002_s27  ;;  %4344 = vmatprep.mubr.msk.f32.mxu0 %vm607_vm7, %v2135_v60 }
 0x28c   : > { %2826 = vrot.lane.b32.xlu0 %v4090_v17, %s7015_s12 }
 0x28d   : > { %v2469_v1 = vpop.permute.xlu1 %2468 }
 0x28e   : > { %v2518_v3 = vsel %vm590_vm6, %v2512_v22, %v2469_v1  ;;  %v2447_v8 = vpop.permute.xlu0 %2446  ;;  %v4053_v22 = vld [vmem:[%s4712_s14 + $0x30] sm:$0xff] }
 0x28f   : > { %3139 = vrot.lane.b32.xlu1 %v5968_v34, %s6989_s9  ;;  %4361 = vmatprep.mubr.msk.f32.mxu1 %vm607_vm7, %v2518_v3  ;;  %v4470_v34 = vld [vmem:[%s4712_s14 + $0x50] sm:$0xff]  ;;  %v7022_v3 = vld [vmem:[#allocation12_spill] sm:$0xff] }
 0x290   : > { %3117 = vrot.lane.b32.xlu0 %v4132_v40, %s6986_s30  ;;  %v2100_v58 = vsel %vm548_vm0, %v4470_v34, %v5936_v56  ;;  %v7018_v56 = vld [vmem:[#allocation4_spill] sm:$0xff] }
 0x291   : > { %v6426_v2 = vpop.permute.xlu1 %2748 }
 0x292   : > { %v6428_v30 = vpop.permute.xlu0 %2726 }
 0x293   : > { %3231 = vrot.lane.b32.xlu1 %v5985_v39, %s7002_s27  ;;  %v2106_v39 = vsel %vm555_vm1, %v2100_v58, %v5970_v14  ;;  %v2507_v14 = vsel %vm576_vm4, %v2501_v27, %v2423_v0 }
 0x294   : > { %3209 = vrot.lane.b32.xlu0 %v6002_v13, %s7015_s12  ;;  %v2112_v53 = vsel %vm562_vm2, %v2106_v39, %v7017_v23  ;;  %v2513_v26 = vsel %vm583_vm5, %v2507_v14, %v2447_v8  ;;  %v4092_v8 = vld [vmem:[%s5602_s6 + $0x70] sm:$0xff] }
 0x295   : > { %v6442_v29 = vpop.permute.xlu1 %3131  ;;  %v2118_v31 = vsel %vm569_vm3, %v2112_v53, %v7018_v56  ;;  %v4156_v39 = vld [vmem:[%s5602_s6 + $0x71] sm:$0xff] }
 0x296   : > { %v6448_v41 = vpop.permute.xlu0 %3109  ;;  %v2124_v46 = vsel %vm576_vm4, %v2118_v31, %v6365_v44  ;;  %v4162_v53 = vld [vmem:[%s5602_s6 + $0x72] sm:$0xff] }
 0x297   : > { %2780 = vrot.lane.b32.xlu1 %v4090_v17, %s6978_s15  ;;  %v2130_v18 = vsel %vm583_vm5, %v2124_v46, %v2064_v24 }
 0x298   : > { %2758 = vrot.lane.b32.xlu0 %v4132_v40, %s6989_s9 }
 0x299   : > { %v4323_v51 = vpop.f32.mrf.mxu1  ;;  %v2471_v49 = vpop.permute.xlu1 %2470 }
 0x29a   : > { %v1848_v37 = vadd.f32 %v6467_v25, %v4323_v51  ;;  %v2519_v11 = vsel %vm590_vm6, %v2513_v26, %v2471_v49  ;;  %v2088_v0 = vpop.permute.xlu0 %2087  ;;  %v4054_v51 = vld [vmem:[%s4712_s14 + $0x40] sm:$0xff] }
 0x29b   : > { %v2136_v57 = vsel %vm590_vm6, %v2130_v18, %v2088_v0  ;;  %v1842_v44 = vpop.f32.mrf.mxu1  ;;  %3141 = vrot.lane.b32.xlu1 %v4138_v5, %s6989_s9  ;;  %4362 = vmatmul.mubr.msk.f32.gmra.mxu1 %vm607_vm7, %v2519_v11  ;;  %v4051_v5 = vld [vmem:[%s4712_s14 + $0x10] sm:$0xff] }
 0x29c   : > { %2850 = vrot.lane.b32.xlu0 %v6002_v13, %s7002_s27  ;;  %3966 = vst.msk [vmem:[%s5665_s28 + $0x98] sm:$0xff] %vm548_vm0, %v1848_v37  ;;  %v1843_v47 = vadd.f32 %v6467_v25, %v1842_v44  ;;  %4345 = vmatmul.mubr.msk.f32.gmra.mxu0 %vm607_vm7, %v2136_v57  ;;  %v2862_v49 = vsel %vm548_vm0, %v4051_v5, %v6359_v9 }
 0x29d   : > { %v4326_v35 = vpop.f32.mrf.mxu1  ;;  %v6480_v28 = vpop.permute.xlu1 %2772  ;;  %v2868_v18 = vsel %vm555_vm1, %v2862_v49, %v6374_v43 }
 0x29e   : > { %3965 = vst.msk [vmem:[%s5665_s28 + $0x90] sm:$0xff] %vm548_vm0, %v1843_v47  ;;  %v1858_v32 = vadd.f32 %v6467_v25, %v4326_v35  ;;  %v6485_v63 = vpop.permute.xlu0 %2750  ;;  %v2874_v37 = vsel %vm562_vm2, %v2868_v18, %v6426_v2 }
 0x29f   : > { %v1852_v21 = vpop.f32.mrf.mxu1  ;;  %3233 = vrot.lane.b32.xlu1 %v7019_v59, %s7002_s27  ;;  %v2880_v57 = vsel %vm569_vm3, %v2874_v37, %v6480_v28  ;;  %v3257_v28 = vsel %vm562_vm2, %v6393_v4, %v6442_v29  ;;  %v4116_v4 = vld [vmem:[%s4712_s14 + $0x21] sm:$0xff] }
 0x2a0   : > { %3163 = vrot.lane.b32.xlu0 %v6002_v13, %s6978_s15  ;;  %3968 = vst.msk [vmem:[%s5665_s28 + $0xa8] sm:$0xff] %vm548_vm0, %v1858_v32  ;;  %v1853_v48 = vadd.f32 %v6467_v25, %v1852_v21 }
 0x2a1   : > { %v4329_v42 = vpop.f32.mrf.mxu1  ;;  %v6494_v16 = vpop.permute.xlu1 %3155 }
 0x2a2   : > { %3967 = vst.msk [vmem:[%s5665_s28 + $0xa0] sm:$0xff] %vm548_vm0, %v1853_v48  ;;  %v1868_v17 = vadd.f32 %v6467_v25, %v4329_v42  ;;  %v6499_v61 = vpop.permute.xlu0 %3133  ;;  %v3263_v48 = vsel %vm569_vm3, %v3257_v28, %v6494_v16 }
 0x2a3   : > { %v1862_v36 = vpop.f32.mrf.mxu1  ;;  %2804 = vrot.lane.b32.xlu1 %v6002_v13, %s7016_s11 }
 0x2a4   : > { %2782 = vrot.lane.b32.xlu0 %v7020_v20, %s6978_s15  ;;  %3970 = vst.msk [vmem:[%s5665_s28 + $0xb8] sm:$0xff] %vm548_vm0, %v1868_v17  ;;  %v1863_v55 = vadd.f32 %v6467_v25, %v1862_v36 }
 0x2a5   : > { %v6508_v60 = vpop.permute.xlu1 %2774 }
 0x2a6   : > { %3969 = vst.msk [vmem:[%s5665_s28 + $0xb0] sm:$0xff] %vm548_vm0, %v1863_v55  ;;  %v2705_v24 = vpop.permute.xlu0 %2704  ;;  %v4052_v55 = vld [vmem:[%s4712_s14 + $0x20] sm:$0xff]  ;;  %s4400_s14 = smul.u32 (%p4611_p5), 6, %s4510_s20 }
 0x2a7   : > { %3187 = vrot.lane.b32.xlu1 %v7019_v59, %s7016_s11  ;;  %v2864_v19 = vsel %vm548_vm0, %v4053_v22, %v2705_v24 }
 0x2a8   : > { %3165 = vrot.lane.b32.xlu0 %v7021_v54, %s6978_s15  ;;  %s4401_s15 = smul.u32 (%p4611_p5), 144, %s4514_s21 }
 0x2a9   : > { %v3088_v13 = vpop.permute.xlu1 %3087 }
 0x2aa   : > { %v2797_v6 = vpop.permute.xlu0 %2796  ;;  %v3247_v27 = vsel %vm548_vm0, %v6089_v62, %v3088_v13  ;;  %s3421_s29 = sadd.s32 (%p4611_p5), %s4401_s15, %s4400_s14 }
 0x2ab   : > { %2828 = vrot.lane.b32.xlu1 %v7020_v20, %s7015_s12  ;;  %v2886_v9 = vsel %vm576_vm4, %v2880_v57, %v2797_v6  ;;  %s4179_s20 = sshll.u32 (%p4611_p5), %s3421_s29, 3 }
 0x2ac   : > { %2806 = vrot.lane.b32.xlu0 %v7021_v54, %s7016_s11  ;;  %s6796_s6 = scalar_lea.vmem (%p4611_p5), %s6905_s5, %s4179_s20 }
 0x2ad   : > { %v3180_v40 = vpop.permute.xlu1 %3179 }
 0x2ae   : > { %v6521_v1 = vpop.permute.xlu0 %3157  ;;  %v3269_v17 = vsel %vm576_vm4, %v3263_v48, %v3180_v40  ;;  %v3246_v40 = vsel %vm548_vm0, %v4116_v4, %v6395_v45 }
 0x2af   : > { %3211 = vrot.lane.b32.xlu1 %v7021_v54, %s7015_s12 }
 0x2b0   : > { %3189 = vrot.lane.b32.xlu0 %v7022_v3, %s7016_s11 }
 0x2b1   : > { %v2729_v34 = vpop.permute.xlu1 %2728 }
 0x2b2   : > { %v6530_v58 = vsel %vm555_vm1, %v2864_v19, %v2729_v34  ;;  %v2707_v15 = vpop.permute.xlu0 %2706 }
 0x2b3   : > { %2852 = vrot.lane.b32.xlu1 %v7021_v54, %s7002_s27  ;;  %v2865_v11 = vsel %vm548_vm0, %v4054_v51, %v2707_v15 }
 0x2b4   : > { %2830 = vrot.lane.b32.xlu0 %v4092_v8, %s7015_s12 }
 0x2b5   : > { %v2821_v33 = vpop.permute.xlu1 %2820 }
 0x2b6   : > { %v2799_v23 = vpop.permute.xlu0 %2798  ;;  %v2892_v47 = vsel %vm583_vm5, %v2886_v9, %v2821_v33 }
 0x2b7   : > { %3235 = vrot.lane.b32.xlu1 %v7022_v3, %s7002_s27  ;;  %v3252_v3 = vsel %vm555_vm1, %v3246_v40, %v6448_v41 }
 0x2b8   : > { %3213 = vrot.lane.b32.xlu0 %v4156_v39, %s7015_s12 }
 0x2b9   : > { %v3112_v56 = vpop.permute.xlu1 %3111 }
 0x2ba   : > { %v6543_v31 = vsel %vm555_vm1, %v3247_v27, %v3112_v56  ;;  %v3090_v14 = vpop.permute.xlu0 %3089 }
 0x2bb   : > { %3237 = vrot.lane.b32.xlu1 %v4162_v53, %s7002_s27  ;;  %v3248_v21 = vsel %vm548_vm0, %v6138_v12, %v3090_v14  ;;  %v2863_v12 = vsel %vm548_vm0, %v4052_v55, %v6377_v7 }
 0x2bc   : > { %2854 = vrot.lane.b32.xlu0 %v4156_v39, %s7002_s27  ;;  %v2869_v16 = vsel %vm555_vm1, %v2863_v12, %v6428_v30  ;;  %v3258_v30 = vsel %vm562_vm2, %v3252_v3, %v6499_v61 }
 0x2bd   : > { %v3204_v46 = vpop.permute.xlu1 %3203  ;;  %v2875_v6 = vsel %vm562_vm2, %v2869_v16, %v6485_v63  ;;  %v3264_v63 = vsel %vm569_vm3, %v3258_v30, %v6521_v1 }
 0x2be   : > { %v3182_v26 = vpop.permute.xlu0 %3181  ;;  %v3275_v36 = vsel %vm583_vm5, %v3269_v17, %v3204_v46  ;;  %v2881_v22 = vsel %vm569_vm3, %v2875_v6, %v6508_v60 }
 0x2bf   : > { %v2887_v7 = vsel %vm576_vm4, %v2881_v22, %v2799_v23  ;;  %v3270_v60 = vsel %vm576_vm4, %v3264_v63, %v3182_v26 }
 0x2c1   : > { %v6553_v62 = vpop.permute.xlu1 %2752 }
 0x2c2   : > { %v2731_v0 = vpop.permute.xlu0 %2730 }
 0x2c3   : > { %v6561_v44 = vsel %vm555_vm1, %v2865_v11, %v2731_v0  ;;  %v2876_v0 = vsel %vm562_vm2, %v6530_v58, %v6553_v62 }
 0x2c5   : > { %v2845_v43 = vpop.permute.xlu1 %2844 }
 0x2c6   : > { %v2898_v35 = vsel %vm590_vm6, %v2892_v47, %v2845_v43  ;;  %v2823_v32 = vpop.permute.xlu0 %2822 }
 0x2c7   : > { %4372 = vmatprep.mubr.msk.f32.mxu0 %vm607_vm7, %v2898_v35  ;;  %v2893_v19 = vsel %vm583_vm5, %v2887_v7, %v2823_v32 }
 0x2c9   : > { %v3136_v2 = vpop.permute.xlu1 %3135 }
 0x2ca   : > { %v3114_v59 = vpop.permute.xlu0 %3113  ;;  %v3259_v58 = vsel %vm562_vm2, %v6543_v31, %v3136_v2 }
 0x2cb   : > { %v6575_v42 = vsel %vm555_vm1, %v3248_v21, %v3114_v59 }
 0x2cd   : > { %v3228_v20 = vpop.permute.xlu1 %3227 }
 0x2ce   : > { %v3281_v24 = vsel %vm590_vm6, %v3275_v36, %v3228_v20  ;;  %v3206_v54 = vpop.permute.xlu0 %3205 }
 0x2cf   : > { %4389 = vmatprep.mubr.msk.f32.mxu1 %vm607_vm7, %v3281_v24  ;;  %v3276_v41 = vsel %vm583_vm5, %v3270_v60, %v3206_v54 }
 0x2d1   : > { %v2777_v29 = vpop.permute.xlu1 %2776 }
 0x2d2   : > { %v6587_v13 = vpop.permute.xlu0 %2754  ;;  %v2882_v9 = vsel %vm569_vm3, %v2876_v0, %v2777_v29 }
 0x2d3   : > { %v2877_v40 = vsel %vm562_vm2, %v6561_v44, %v6587_v13 }
 0x2d5   : > { %v6598_v8 = vpop.permute.xlu1 %3137 }
 0x2d6   : > { %v2847_v34 = vpop.permute.xlu0 %2846 }
 0x2d7   : > { %v2899_v45 = vsel %vm590_vm6, %v2893_v19, %v2847_v34  ;;  %v3260_v19 = vsel %vm562_vm2, %v6575_v42, %v6598_v8 }
 0x2d8   : > { %4373 = vmatmul.mubr.msk.f32.vlgmr.msra.gmra.mxu0 %vm607_vm7, %v2899_v45 }
 0x2d9   : > { %v3230_v15 = vpop.permute.xlu1 %3229 }
 0x2da   : > { %v3282_v39 = vsel %vm590_vm6, %v3276_v41, %v3230_v15  ;;  %v3160_v33 = vpop.permute.xlu0 %3159 }
 0x2db   : > { %4390 = vmatmul.mubr.msk.f32.vlgmr.msra.gmra.mxu1 %vm607_vm7, %v3282_v39  ;;  %v3265_v59 = vsel %vm569_vm3, %v3259_v58, %v3160_v33 }
 0x2dd   : > { %v2779_v61 = vpop.permute.xlu1 %2778 }
 0x2de   : > { %v6611_v23 = vpop.permute.xlu0 %2708  ;;  %v2883_v3 = vsel %vm569_vm3, %v2877_v40, %v2779_v61 }
 0x2e1   : > { %v6613_v53 = vpop.permute.xlu1 %3091 }
 0x2e2   : > { %v2801_v1 = vpop.permute.xlu0 %2800 }
 0x2e3   : > { %v2888_v47 = vsel %vm576_vm4, %v2882_v9, %v2801_v1  ;;  %v3249_v9 = vsel %vm548_vm0, %v6247_v50, %v6613_v53 }
 0x2e5   : > { %v3184_v27 = vpop.permute.xlu1 %3183 }
 0x2e6   : > { %v3162_v56 = vpop.permute.xlu0 %3161  ;;  %v3271_v48 = vsel %vm576_vm4, %v3265_v59, %v3184_v27 }
 0x2e7   : > { %v3266_v44 = vsel %vm569_vm3, %v3260_v19, %v3162_v56  ;;  %v2866_v56 = vsel %vm548_vm0, %v6202_v38, %v6611_v23 }
 0x2e9   : > { %v6615_v14 = vpop.permute.xlu1 %2732 }
 0x2ea   : > { %v6617_v5 = vpop.permute.xlu0 %2710 }
 0x2ed   : > { %v2825_v46 = vpop.permute.xlu1 %2824 }
 0x2ee   : > { %v2803_v26 = vpop.permute.xlu0 %2802  ;;  %v2894_v43 = vsel %vm583_vm5, %v2888_v47, %v2825_v46  ;;  %v2872_v46 = vsel %vm555_vm1, %v2866_v56, %v6615_v14 }
 0x2ef   : > { %v2889_v7 = vsel %vm576_vm4, %v2883_v3, %v2803_v26 }
 0x2f1   : > { %v6619_v51 = vpop.permute.xlu1 %3115 }
 0x2f2   : > { %v6621_v49 = vpop.permute.xlu0 %3093 }
 0x2f3   : > { %v3250_v50 = vsel %vm548_vm0, %v6357_v10, %v6621_v49 }
 0x2f5   : > { %v3208_v18 = vpop.permute.xlu1 %3207 }
 0x2f6   : > { %v3186_v37 = vpop.permute.xlu0 %3185  ;;  %v3277_v36 = vsel %vm583_vm5, %v3271_v48, %v3208_v18 }
 0x2f7   : > { %v3272_v45 = vsel %vm576_vm4, %v3266_v44, %v3186_v37 }
 0x2f9   : > { %v2757_v11 = vpop.permute.xlu1 %2756 }
 0x2fa   : > { %v6626_v57 = vpop.permute.xlu0 %2734  ;;  %v2878_v18 = vsel %vm562_vm2, %v2872_v46, %v2757_v11 }
 0x2fd   : > { %v2849_v35 = vpop.permute.xlu1 %2848 }
 0x2fe   : > { %v2900_v32 = vsel %vm590_vm6, %v2894_v43, %v2849_v35  ;;  %v2827_v28 = vpop.permute.xlu0 %2826  ;;  %v3255_v43 = vsel %vm555_vm1, %v3249_v9, %v6619_v51 }
 0x2ff   : > { %4375 = vmatprep.mubr.msk.f32.mxu0 %vm607_vm7, %v2900_v32  ;;  %v2895_v34 = vsel %vm583_vm5, %v2889_v7, %v2827_v28  ;;  %v2867_v28 = vsel %vm548_vm0, %v6354_v52, %v6617_v5 }
 0x301   : > { %v3140_v21 = vpop.permute.xlu1 %3139 }
 0x302   : > { %v6635_v62 = vpop.permute.xlu0 %3117  ;;  %v3261_v14 = vsel %vm562_vm2, %v3255_v43, %v3140_v21 }
 0x303   : > { %v3256_v21 = vsel %vm555_vm1, %v3250_v50, %v6635_v62  ;;  %v3552_v50 = vld [vmem:[%s5665_s28 + $0x18] sm:$0xff] (%p4611_p5) }
 0x304   : > { %v4340_v17 = vpop.f32.mrf.mxu0  ;;  %3553 = vst [vmem:[%s6796_s6 + $0x18] sm:$0xff] (%p4611_p5), %v3552_v50 }
 0x305   : > { %v2232_v20 = vadd.f32 %v6467_v25, %v4340_v17  ;;  %v3232_v55 = vpop.permute.xlu1 %3231  ;;  %v2873_v17 = vsel %vm555_vm1, %v2867_v28, %v6626_v57  ;;  %v3558_v28 = vld [vmem:[%s5665_s28 + $0x30] sm:$0xff] (%p4611_p5) }
 0x306   : > { %v3283_v24 = vsel %vm590_vm6, %v3277_v36, %v3232_v55  ;;  %v3210_v54 = vpop.permute.xlu0 %3209  ;;  %v2226_v12 = vpop.f32.mrf.mxu0  ;;  %3559 = vst [vmem:[%s6796_s6 + $0x90] sm:$0xff] (%p4611_p5), %v3558_v28 }
 0x307   : > { %4006 = vst.msk [vmem:[%s5665_s28 + $0xc8] sm:$0xff] %vm548_vm0, %v2232_v20  ;;  %v2227_v31 = vadd.f32 %v6467_v25, %v2226_v12  ;;  %4392 = vmatprep.mubr.msk.f32.mxu1 %vm607_vm7, %v3283_v24  ;;  %v4357_v2 = vpop.f32.mrf.mxu1  ;;  %v3278_v60 = vsel %vm583_vm5, %v3272_v45, %v3210_v54 }
 0x308   : > { %v2615_v4 = vadd.f32 %v6467_v25, %v4357_v2 }
 0x309   : > { %4005 = vst.msk [vmem:[%s5665_s28 + $0xc0] sm:$0xff] %vm548_vm0, %v2227_v31  ;;  %v2781_v29 = vpop.permute.xlu1 %2780  ;;  %v2609_v16 = vpop.f32.mrf.mxu1 }
 0x30a   : > { %v2759_v6 = vpop.permute.xlu0 %2758  ;;  %4046 = vst.msk [vmem:[%s5665_s28 + $0xf8] sm:$0xff] %vm548_vm0, %v2615_v4  ;;  %v2610_v22 = vadd.f32 %v6467_v25, %v2609_v16  ;;  %v2884_v0 = vsel %vm569_vm3, %v2878_v18, %v2781_v29 }
 0x30b   : > { %v2879_v52 = vsel %vm562_vm2, %v2873_v17, %v2759_v6  ;;  %v3568_v17 = vld [vmem:[%s5665_s28 + $0x58] sm:$0xff] (%p4611_p5) }
 0x30c   : > { %4045 = vst.msk [vmem:[%s5665_s28 + $0xf0] sm:$0xff] %vm548_vm0, %v2610_v22  ;;  %3569 = vst [vmem:[%s6796_s6 + $0xb8] sm:$0xff] (%p4611_p5), %v3568_v17 }
 0x30d   : > { %v3142_v30 = vpop.permute.xlu1 %3141 }
 0x30e   : > { %v2851_v63 = vpop.permute.xlu0 %2850  ;;  %v3262_v10 = vsel %vm562_vm2, %v3256_v21, %v3142_v30  ;;  %v3560_v21 = vld [vmem:[%s5665_s28 + $0x38] sm:$0xff] (%p4611_p5) }
 0x30f   : > { %v2901_v13 = vsel %vm590_vm6, %v2895_v34, %v2851_v63  ;;  %3561 = vst [vmem:[%s6796_s6 + $0x98] sm:$0xff] (%p4611_p5), %v3560_v21 }
 0x310   : > { %4376 = vmatmul.mubr.msk.f32.gmra.mxu0 %vm607_vm7, %v2901_v13 }
 0x311   : > { %v3234_v41 = vpop.permute.xlu1 %3233 }
 0x312   : > { %v3284_v15 = vsel %vm590_vm6, %v3278_v60, %v3234_v41  ;;  %v3164_v39 = vpop.permute.xlu0 %3163 }
 0x313   : > { %4393 = vmatmul.mubr.msk.f32.gmra.mxu1 %vm607_vm7, %v3284_v15  ;;  %v3267_v32 = vsel %vm569_vm3, %v3261_v14, %v3164_v39 }
 0x315   : > { %v2805_v42 = vpop.permute.xlu1 %2804 }
 0x316   : > { %v2783_v8 = vpop.permute.xlu0 %2782  ;;  %v2890_v47 = vsel %vm576_vm4, %v2884_v0, %v2805_v42 }
 0x317   : > { %v2885_v55 = vsel %vm569_vm3, %v2879_v52, %v2783_v8  ;;  %v3578_v52 = vld [vmem:[%s5665_s28 + $0x80] sm:$0xff] (%p4611_p5) }
 0x318   : > { %3579 = vst [vmem:[%s6796_s6 + $0x140] sm:$0xff] (%p4611_p5), %v3578_v52 }
 0x319   : > { %v3188_v33 = vpop.permute.xlu1 %3187 }
 0x31a   : > { %v3166_v61 = vpop.permute.xlu0 %3165  ;;  %v3273_v53 = vsel %vm576_vm4, %v3267_v32, %v3188_v33  ;;  %v3550_v32 = vld [vmem:[%s5665_s28 + $0x10] sm:$0xff] (%p4611_p5) }
 0x31b   : > { %v3268_v5 = vsel %vm569_vm3, %v3262_v10, %v3166_v61  ;;  %v3570_v10 = vld [vmem:[%s5665_s28 + $0x60] sm:$0xff] (%p4611_p5)  ;;  %3551 = vst [vmem:[%s6796_s6 + $0x10] sm:$0xff] (%p4611_p5), %v3550_v32 }
 0x31c   : > { %3571 = vst [vmem:[%s6796_s6 + $0x120] sm:$0xff] (%p4611_p5), %v3570_v10 }
 0x31d   : > { %v2829_v1 = vpop.permute.xlu1 %2828 }
 0x31e   : > { %v2807_v27 = vpop.permute.xlu0 %2806  ;;  %v2896_v38 = vsel %vm583_vm5, %v2890_v47, %v2829_v1 }
 0x31f   : > { %v2891_v24 = vsel %vm576_vm4, %v2885_v55, %v2807_v27  ;;  %v3584_v55 = vld [vmem:[%s5665_s28 + $0x98] sm:$0xff] (%p4611_p5) }
 0x320   : > { %3585 = vst [vmem:[%s6796_s6 + $0x1b8] sm:$0xff] (%p4611_p5), %v3584_v55 }
 0x321   : > { %v3212_v26 = vpop.permute.xlu1 %3211 }
 0x322   : > { %v3190_v37 = vpop.permute.xlu0 %3189  ;;  %v3279_v58 = vsel %vm583_vm5, %v3273_v53, %v3212_v26  ;;  %v3554_v53 = vld [vmem:[%s5665_s28 + $0x20] sm:$0xff] (%p4611_p5) }
 0x323   : > { %v3274_v57 = vsel %vm576_vm4, %v3268_v5, %v3190_v37  ;;  %v3580_v5 = vld [vmem:[%s5665_s28 + $0x88] sm:$0xff] (%p4611_p5)  ;;  %3555 = vst [vmem:[%s6796_s6 + $0x20] sm:$0xff] (%p4611_p5), %v3554_v53 }
 0x324   : > { %3581 = vst [vmem:[%s6796_s6 + $0x148] sm:$0xff] (%p4611_p5), %v3580_v5 }
 0x325   : > { %v2853_v23 = vpop.permute.xlu1 %2852 }
 0x326   : > { %v2902_v35 = vsel %vm590_vm6, %v2896_v38, %v2853_v23  ;;  %v2831_v11 = vpop.permute.xlu0 %2830 }
 0x327   : > { %4378 = vmatprep.mubr.msk.f32.mxu0 %vm607_vm7, %v2902_v35  ;;  %v4343_v51 = vpop.f32.mrf.mxu0  ;;  %v2897_v31 = vsel %vm583_vm5, %v2891_v24, %v2831_v11  ;;  %v3548_v11 = vld [vmem:[%s5665_s28 + $0x8] sm:$0xff] (%p4611_p5) }
 0x328   : > { %v2242_v59 = vadd.f32 %v6467_v25, %v4343_v51  ;;  %v3556_v51 = vld [vmem:[%s5665_s28 + $0x28] sm:$0xff] (%p4611_p5)  ;;  %3549 = vst [vmem:[%s6796_s6 + $0x8] sm:$0xff] (%p4611_p5), %v3548_v11 }
 0x329   : > { %v3236_v48 = vpop.permute.xlu1 %3235  ;;  %v2236_v20 = vpop.f32.mrf.mxu0  ;;  %3557 = vst [vmem:[%s6796_s6 + $0x28] sm:$0xff] (%p4611_p5), %v3556_v51  ;;  %v3588_v24 = vld [vmem:[%s5665_s28 + $0xa8] sm:$0xff] (%p4611_p5) }
 0x32a   : > { %v3285_v49 = vsel %vm590_vm6, %v3279_v58, %v3236_v48  ;;  %v3214_v36 = vpop.permute.xlu0 %3213  ;;  %4008 = vst.msk [vmem:[%s5665_s28 + $0xd8] sm:$0xff] %vm548_vm0, %v2242_v59  ;;  %v2237_v62 = vadd.f32 %v6467_v25, %v2236_v20  ;;  %v3562_v58 = vld [vmem:[%s5665_s28 + $0x40] sm:$0xff] (%p4611_p5)  ;;  %v3564_v59 = vld [vmem:[%s5665_s28 + $0x48] sm:$0xff] (%p4611_p5)  ;;  %v3566_v48 = vld [vmem:[%s5665_s28 + $0x50] sm:$0xff] (%p4611_p5) }
 0x32b   : > { %4395 = vmatprep.mubr.msk.f32.mxu1 %vm607_vm7, %v3285_v49  ;;  %v3280_v54 = vsel %vm583_vm5, %v3274_v57, %v3214_v36  ;;  %v3572_v49 = vld [vmem:[%s5665_s28 + $0x68] sm:$0xff] (%p4611_p5)  ;;  %v3574_v36 = vld [vmem:[%s5665_s28 + $0x70] sm:$0xff] (%p4611_p5)  ;;  %v3576_v20 = vld [vmem:[%s5665_s28 + $0x78] sm:$0xff] (%p4611_p5)  ;;  %3563 = vst [vmem:[%s6796_s6 + $0xa0] sm:$0xff] (%p4611_p5), %v3562_v58 }
 0x32c   : > { %4007 = vst.msk [vmem:[%s5665_s28 + $0xd0] sm:$0xff] %vm548_vm0, %v2237_v62  ;;  %3565 = vst [vmem:[%s6796_s6 + $0xa8] sm:$0xff] (%p4611_p5), %v3564_v59  ;;  %v3582_v62 = vld [vmem:[%s5665_s28 + $0x90] sm:$0xff] (%p4611_p5)  ;;  %v3586_v57 = vld [vmem:[%s5665_s28 + $0xa0] sm:$0xff] (%p4611_p5) }
 0x32d   : > { %v3238_v12 = vpop.permute.xlu1 %3237  ;;  %3567 = vst [vmem:[%s6796_s6 + $0xb0] sm:$0xff] (%p4611_p5), %v3566_v48  ;;  %3573 = vst [vmem:[%s6796_s6 + $0x128] sm:$0xff] (%p4611_p5), %v3572_v49 }
 0x32e   : > { %v3286_v2 = vsel %vm590_vm6, %v3280_v54, %v3238_v12  ;;  %v2855_v4 = vpop.permute.xlu0 %2854  ;;  %3575 = vst [vmem:[%s6796_s6 + $0x130] sm:$0xff] (%p4611_p5), %v3574_v36  ;;  %3577 = vst [vmem:[%s6796_s6 + $0x138] sm:$0xff] (%p4611_p5), %v3576_v20  ;;  %v3590_v54 = vld [vmem:[%s5665_s28 + $0xb0] sm:$0xff] (%p4611_p5)  ;;  %v3592_v12 = vld [vmem:[%s5665_s28 + $0xb8] sm:$0xff] (%p4611_p5) }
 0x32f   : > { %v2903_v29 = vsel %vm590_vm6, %v2897_v31, %v2855_v4  ;;  %4396 = vmatmul.mubr.msk.f32.gmra.mxu1 %vm607_vm7, %v3286_v2  ;;  %3583 = vst [vmem:[%s6796_s6 + $0x1b0] sm:$0xff] (%p4611_p5), %v3582_v62  ;;  %3587 = vst [vmem:[%s6796_s6 + $0x1c0] sm:$0xff] (%p4611_p5), %v3586_v57  ;;  %v3594_v31 = vld [vmem:[%s5665_s28 + $0xc0] sm:$0xff] (%p4611_p5)  ;;  %v3596_v2 = vld [vmem:[%s5665_s28 + $0xc8] sm:$0xff] (%p4611_p5) }
 0x330   : > { %v4360_v16 = vpop.f32.mrf.mxu1  ;;  %4379 = vmatmul.mubr.msk.f32.gmra.mxu0 %vm607_vm7, %v2903_v29  ;;  %3589 = vst [vmem:[%s6796_s6 + $0x1c8] sm:$0xff] (%p4611_p5), %v3588_v24  ;;  %3591 = vst [vmem:[%s6796_s6 + $0x1d0] sm:$0xff] (%p4611_p5), %v3590_v54 }
 0x331   : > { %v2625_v6 = vadd.f32 %v6467_v25, %v4360_v16  ;;  %3593 = vst [vmem:[%s6796_s6 + $0x1d8] sm:$0xff] (%p4611_p5), %v3592_v12  ;;  %3595 = vst [vmem:[%s6796_s6 + $0x240] sm:$0xff] (%p4611_p5), %v3594_v31  ;;  %v3600_v29 = vld [vmem:[%s5665_s28 + $0xd8] sm:$0xff] (%p4611_p5) }
 0x332   : > { %v2619_v40 = vpop.f32.mrf.mxu1  ;;  %3597 = vst [vmem:[%s6796_s6 + $0x248] sm:$0xff] (%p4611_p5), %v3596_v2  ;;  %3601 = vst [vmem:[%s6796_s6 + $0x258] sm:$0xff] (%p4611_p5), %v3600_v29 }
 0x333   : > { %4048 = vst.msk [vmem:[%s5665_s28 + $0x108] sm:$0xff] %vm548_vm0, %v2625_v6  ;;  %v2620_v22 = vadd.f32 %v6467_v25, %v2619_v40  ;;  %v3598_v4 = vld [vmem:[%s5665_s28 + $0xd0] sm:$0xff] (%p4611_p5) }
 0x334   : > { %3599 = vst [vmem:[%s6796_s6 + $0x250] sm:$0xff] (%p4611_p5), %v3598_v4  ;;  %v3606_v40 = vld [vmem:[%s5665_s28 + $0xf0] sm:$0xff] (%p4611_p5) }
 0x335   : > { %4047 = vst.msk [vmem:[%s5665_s28 + $0x100] sm:$0xff] %vm548_vm0, %v2620_v22  ;;  %v3608_v22 = vld [vmem:[%s5665_s28 + $0xf8] sm:$0xff] (%p4611_p5)  ;;  %3607 = vst [vmem:[%s6796_s6 + $0x2d0] sm:$0xff] (%p4611_p5), %v3606_v40 }
 0x336   : > { %3609 = vst [vmem:[%s6796_s6 + $0x2d8] sm:$0xff] (%p4611_p5), %v3608_v22 }
 0x35b   : > { %v4363_v7 = vpop.f32.mrf.mxu1 }
 0x35c   : > { %v4346_v3 = vpop.f32.mrf.mxu0  ;;  %v2635_v19 = vadd.f32 %v6467_v25, %v4363_v7  ;;  %v3612_v7 = vld [vmem:[%s5665_s28 + $0x108] sm:$0xff] (%p4611_p5) }
 0x35d   : > { %v2252_v30 = vadd.f32 %v6467_v25, %v4346_v3  ;;  %v2629_v63 = vpop.f32.mrf.mxu1  ;;  %v3610_v3 = vld [vmem:[%s5665_s28 + $0x100] sm:$0xff] (%p4611_p5)  ;;  %3613 = vst [vmem:[%s6796_s6 + $0x2e8] sm:$0xff] (%p4611_p5), %v3612_v7 }
 0x35e   : > { %v2246_v34 = vpop.f32.mrf.mxu0  ;;  %4050 = vst.msk [vmem:[%s5665_s28 + $0x118] sm:$0xff] %vm548_vm0, %v2635_v19  ;;  %v2630_v13 = vadd.f32 %v6467_v25, %v2629_v63  ;;  %3611 = vst [vmem:[%s6796_s6 + $0x2e0] sm:$0xff] (%p4611_p5), %v3610_v3 }
 0x35f   : > { %4010 = vst.msk [vmem:[%s5665_s28 + $0xe8] sm:$0xff] %vm548_vm0, %v2252_v30  ;;  %v2247_v44 = vadd.f32 %v6467_v25, %v2246_v34 }
 0x360   : > { %4049 = vst.msk [vmem:[%s5665_s28 + $0x110] sm:$0xff] %vm548_vm0, %v2630_v13 }
 0x361   : > { %4009 = vst.msk [vmem:[%s5665_s28 + $0xe0] sm:$0xff] %vm548_vm0, %v2247_v44 }
 0x365   : > { %v3616_v19 = vld [vmem:[%s5665_s28 + $0x118] sm:$0xff] (%p4611_p5) }
 0x366   : > { %v3604_v6 = vld [vmem:[%s5665_s28 + $0xe8] sm:$0xff] (%p4611_p5)  ;;  %3617 = vst [vmem:[%s6796_s6 + $0x2f8] sm:$0xff] (%p4611_p5), %v3616_v19 }
 0x367   : > { %3605 = vst [vmem:[%s6796_s6 + $0x268] sm:$0xff] (%p4611_p5), %v3604_v6  ;;  %v3614_v30 = vld [vmem:[%s5665_s28 + $0x110] sm:$0xff] (%p4611_p5) }
 0x368   : > { %v3602_v16 = vld [vmem:[%s5665_s28 + $0xe0] sm:$0xff] (%p4611_p5)  ;;  %3615 = vst [vmem:[%s6796_s6 + $0x2f0] sm:$0xff] (%p4611_p5), %v3614_v30 }
 0x369   : > { %3603 = vst [vmem:[%s6796_s6 + $0x260] sm:$0xff] (%p4611_p5), %v3602_v16 }
 0x398   : > { %v4374_v45 = vpop.f32.mrf.mxu0 }
 0x399   : > { %v2999_v60 = vadd.f32 %v6467_v25, %v4374_v45 }
 0x39a   : > { %v2993_v41 = vpop.f32.mrf.mxu0 }
 0x39b   : > { %4110 = vst.msk [vmem:[%s5665_s28 + $0x128] sm:$0xff] %vm548_vm0, %v2999_v60  ;;  %v2994_v15 = vadd.f32 %v6467_v25, %v2993_v41  ;;  %v4391_v39 = vpop.f32.mrf.mxu1 }
 0x39c   : > { %v3382_v42 = vadd.f32 %v6467_v25, %v4391_v39 }
 0x39d   : > { %4109 = vst.msk [vmem:[%s5665_s28 + $0x120] sm:$0xff] %vm548_vm0, %v2994_v15  ;;  %v3376_v8 = vpop.f32.mrf.mxu1 }
 0x39e   : > { %4174 = vst.msk [vmem:[%s5665_s28 + $0x158] sm:$0xff] %vm548_vm0, %v3382_v42  ;;  %v3377_v33 = vadd.f32 %v6467_v25, %v3376_v8 }
 0x3a0   : > { %4173 = vst.msk [vmem:[%s5665_s28 + $0x150] sm:$0xff] %vm548_vm0, %v3377_v33 }
 0x3a2   : > { %v3620_v63 = vld [vmem:[%s5665_s28 + $0x128] sm:$0xff] (%p4611_p5) }
 0x3a3   : > { %3621 = vst [vmem:[%s6796_s6 + $0x368] sm:$0xff] (%p4611_p5), %v3620_v63 }
 0x3a4   : > { %v3618_v34 = vld [vmem:[%s5665_s28 + $0x120] sm:$0xff] (%p4611_p5) }
 0x3a5   : > { %3619 = vst [vmem:[%s6796_s6 + $0x360] sm:$0xff] (%p4611_p5), %v3618_v34  ;;  %v3632_v15 = vld [vmem:[%s5665_s28 + $0x158] sm:$0xff] (%p4611_p5) }
 0x3a6   : > { %3633 = vst [vmem:[%s6796_s6 + $0x3f8] sm:$0xff] (%p4611_p5), %v3632_v15 }
 0x3a7   : > { %v3630_v41 = vld [vmem:[%s5665_s28 + $0x150] sm:$0xff] (%p4611_p5) }
 0x3a8   : > { %3631 = vst [vmem:[%s6796_s6 + $0x3f0] sm:$0xff] (%p4611_p5), %v3630_v41 }
 0x3d0   : > { %v4377_v61 = vpop.f32.mrf.mxu0 }
 0x3d1   : > { %v3009_v1 = vadd.f32 %v6467_v25, %v4377_v61 }
 0x3d2   : > { %v3003_v27 = vpop.f32.mrf.mxu0 }
 0x3d3   : > { %4112 = vst.msk [vmem:[%s5665_s28 + $0x138] sm:$0xff] %vm548_vm0, %v3009_v1  ;;  %v3004_v56 = vadd.f32 %v6467_v25, %v3003_v27  ;;  %v4394_v46 = vpop.f32.mrf.mxu1 }
 0x3d4   : > { %v3392_v26 = vadd.f32 %v6467_v25, %v4394_v46 }
 0x3d5   : > { %4111 = vst.msk [vmem:[%s5665_s28 + $0x130] sm:$0xff] %vm548_vm0, %v3004_v56  ;;  %v3386_v18 = vpop.f32.mrf.mxu1 }
 0x3d6   : > { %4176 = vst.msk [vmem:[%s5665_s28 + $0x168] sm:$0xff] %vm548_vm0, %v3392_v26  ;;  %v3387_v37 = vadd.f32 %v6467_v25, %v3386_v18 }
 0x3d8   : > { %4175 = vst.msk [vmem:[%s5665_s28 + $0x160] sm:$0xff] %vm548_vm0, %v3387_v37 }
 0x3da   : > { %v3624_v13 = vld [vmem:[%s5665_s28 + $0x138] sm:$0xff] (%p4611_p5) }
 0x3db   : > { %3625 = vst [vmem:[%s6796_s6 + $0x378] sm:$0xff] (%p4611_p5), %v3624_v13 }
 0x3dc   : > { %v3622_v44 = vld [vmem:[%s5665_s28 + $0x130] sm:$0xff] (%p4611_p5) }
 0x3dd   : > { %3623 = vst [vmem:[%s6796_s6 + $0x370] sm:$0xff] (%p4611_p5), %v3622_v44  ;;  %v3636_v42 = vld [vmem:[%s5665_s28 + $0x168] sm:$0xff] (%p4611_p5) }
 0x3de   : > { %3637 = vst [vmem:[%s6796_s6 + $0x408] sm:$0xff] (%p4611_p5), %v3636_v42 }
 0x3df   : > { %v3634_v39 = vld [vmem:[%s5665_s28 + $0x160] sm:$0xff] (%p4611_p5) }
 0x3e0   : > { %3635 = vst [vmem:[%s6796_s6 + $0x400] sm:$0xff] (%p4611_p5), %v3634_v39 }
 0x3ef   : > { %v4397_v0 = vpop.f32.mrf.mxu1 }
 0x3f0   : > { %v4380_v9 = vpop.f32.mrf.mxu0  ;;  %v3402_v47 = vadd.f32 %v6467_v25, %v4397_v0 }
 0x3f1   : > { %v3019_v43 = vadd.f32 %v6467_v25, %v4380_v9  ;;  %v3396_v38 = vpop.f32.mrf.mxu1  ;;  %3418 = sbr.rel (!%p4611_p5) target bundleno = 1022 (0x3fe), region = 44 }
 0x3f2   : > { %4178 = vst.msk [vmem:[%s5665_s28 + $0x178] sm:$0xff] %vm548_vm0, %v3402_v47  ;;  %v3013_v23 = vpop.f32.mrf.mxu0  ;;  %v3397_v14 = vadd.f32 %v6467_v25, %v3396_v38 }
 0x3f3   : > { %4114 = vst.msk [vmem:[%s5665_s28 + $0x148] sm:$0xff] %vm548_vm0, %v3019_v43  ;;  %v3014_v35 = vadd.f32 %v6467_v25, %v3013_v23  ;;  %v3546_v25 = vld [vmem:[%s5665_s28] sm:$0xff] (%p4611_p5) }
 0x3f4   : > { %4177 = vst.msk [vmem:[%s5665_s28 + $0x170] sm:$0xff] %vm548_vm0, %v3397_v14  ;;  %3547 = vst [vmem:[%s6796_s6] sm:$0xff] (%p4611_p5), %v3546_v25 }
 0x3f5   : > { %4113 = vst.msk [vmem:[%s5665_s28 + $0x140] sm:$0xff] %vm548_vm0, %v3014_v35 }
 0x3f9   : > { %v3640_v33 = vld [vmem:[%s5665_s28 + $0x178] sm:$0xff] }
 0x3fa   : > { %v3628_v60 = vld [vmem:[%s5665_s28 + $0x148] sm:$0xff]  ;;  %3641 = vst [vmem:[%s6796_s6 + $0x418] sm:$0xff] %v3640_v33 }
 0x3fb   : > { %3629 = vst [vmem:[%s6796_s6 + $0x388] sm:$0xff] %v3628_v60  ;;  %v3638_v8 = vld [vmem:[%s5665_s28 + $0x170] sm:$0xff] }
 0x3fc   : > { %v3626_v45 = vld [vmem:[%s5665_s28 + $0x140] sm:$0xff]  ;;  %3639 = vst [vmem:[%s6796_s6 + $0x410] sm:$0xff] %v3638_v8 }
 0x3fd   : > { %3627 = vst [vmem:[%s6796_s6 + $0x380] sm:$0xff] %v3626_v45 }
 0x3fe PF: > { %s15_s24 = sadd.s32 1, %s4526_s24   ;;  %s7023_s18 = smov %s4506_s19 }
 0x3ff   : > { %p12_p13 = scmp.ge.s32.totalorder %s15_s24, 8   ;;  %s7024_s19 = smov %s4622_s8 }
 0x400   : > { %s7025_s20 = smov %s4518_s22  ;;  %s7026_s21 = smov %s4522_s23 }
 0x401   : > { %s7027_s22 = smov %s7030_s25  ;;  %s7028_s23 = smov %s7034_s26 }
 0x402   :  { %14 = sbr.rel (!%p12_p13) target bundleno = 6 (0x6), region = 134 }

</bundles_post_ra>
